<compile_context>
chip_gen: v7x
topology: tpu7x:2x2x1
jax: 0.10.0
libtpu: 0.0.40
codegen_flags: <defaults>
</compile_context>

<pallas_src>
import functools

import numpy as np
import jax
import jax.numpy as jnp
from jax.experimental import pallas as pl
from jax.experimental.pallas import tpu as pltpu


# ------------------------------------------------------------------------
# pano affinity buffer (deterministic glue; replicates get_pano_affinity)
# ------------------------------------------------------------------------
def get_pano_affinity():
    pano_a = np.eye(36, dtype=np.float64)
    for view_id in range(0, 12):
        pano_a[view_id, view_id + 12] = 1
        if view_id == 0:
            pano_a[view_id, 11] = 1
            pano_a[view_id, 11 + 12] = 1
        else:
            pano_a[view_id, view_id - 1] = 1
            pano_a[view_id, view_id - 1 + 12] = 1
        if view_id == 11:
            pano_a[view_id, 0] = 1
            pano_a[view_id, 0 + 12] = 1
        else:
            pano_a[view_id, view_id + 1] = 1
            pano_a[view_id, view_id + 1 + 12] = 1
    for view_id in range(12, 24):
        pano_a[view_id, view_id + 12] = 1
        pano_a[view_id, view_id - 12] = 1
        if view_id == 12:
            pano_a[view_id, 23] = 1
            pano_a[view_id, 23 + 12] = 1
            pano_a[view_id, 23 - 12] = 1
        else:
            pano_a[view_id, view_id - 1] = 1
            pano_a[view_id, view_id - 1 + 12] = 1
            pano_a[view_id, view_id - 1 - 12] = 1
        if view_id == 23:
            pano_a[view_id, 12] = 1
            pano_a[view_id, 12 + 12] = 1
            pano_a[view_id, 12 - 12] = 1
        else:
            pano_a[view_id, view_id + 1] = 1
            pano_a[view_id, view_id + 1 + 12] = 1
            pano_a[view_id, view_id + 1 - 12] = 1
    for view_id in range(24, 36):
        pano_a[view_id, view_id - 12] = 1
        if view_id == 24:
            pano_a[view_id, 35] = 1
            pano_a[view_id, 35 - 12] = 1
        else:
            pano_a[view_id, view_id - 1] = 1
            pano_a[view_id, view_id - 1 - 12] = 1
        if view_id == 35:
            pano_a[view_id, 24] = 1
            pano_a[view_id, 24 - 12] = 1
        else:
            pano_a[view_id, view_id + 1] = 1
            pano_a[view_id, view_id + 1 - 12] = 1
    assert np.sum(pano_a - pano_a.T) == 0
    # 3x3 Gaussian blur, sigma=0 -> OpenCV small-kernel tap [0.25, 0.5, 0.25].
    # TODO(synk): cv2 border behavior is ambiguous in the original call (the
    # BORDER_TRANSPARENT flag is passed in the `dst` slot); border pixels are
    # left untouched here (the BORDER_TRANSPARENT intent).
    k2d = np.outer([0.25, 0.5, 0.25], [0.25, 0.5, 0.25])
    blurred = pano_a.copy()
    for i in range(1, 35):
        for j in range(1, 35):
            blurred[i, j] = np.sum(pano_a[i - 1:i + 2, j - 1:j + 2] * k2d)
    pano_a = blurred
    pano_a[np.eye(36, dtype=int) == 1] = 1
    return pano_a


def build_pano_buffer():
    pano = get_pano_affinity().astype(np.float32)  # .float() in the module
    pano[pano == 1] = 0.95
    pano[pano == 0] = 0.05
    return jnp.asarray(pano)  # (36, 36)


def _round_up(x, m):
    return (x + m - 1) // m * m


def _cdiv(a, b):
    return (a + b - 1) // b


# ------------------------------------------------------------------------
# Pallas kernel: one batch tile (B_TILE samples) per grid step
# ------------------------------------------------------------------------
def _pano_att_kernel(ctx_ref, h2_ref, det_ref, hkv_ref, pano_ref,
                     wfused_ref, wdk_ref, whk_ref, out_ref,
                     *, scale, q_dim, n_views, sp, out_w):
    bt = h2_ref.shape[0]

    # Fused context projection on the MXU (bf16 in, f32 acc):
    #   proj[:, :Q]   = ctx @ (wk_ctx @ wq^T)   -> wq-folded attention keys
    #   proj[:, Q:2Q] = ctx @ wo_ctx            -> output projection of ctx
    proj = jnp.dot(ctx_ref[...], wfused_ref[...],
                   preferred_element_type=jnp.float32)       # (BT*SP, 2Q)
    # SP is a multiple of 8, so this reshape is layout-preserving (no copy).
    proj3 = proj.reshape(bt, sp, 2 * q_dim)                  # (BT, SP, 2Q)

    h2 = h2_ref[...]                                          # (BT, 2Q) f32, lanes Q:2Q are zero

    # detect-feature contribution to the logits (wq folded into the weight):
    #   v[b] = (det @ wk_det @ wq^T) . h[b]
    det_q = jnp.dot(det_ref[...], wdk_ref[...],
                    preferred_element_type=jnp.float32)       # (BT, 2Q), lanes Q:2Q zero
    v = jnp.sum(det_q * h2, axis=-1, keepdims=True)           # (BT, 1)

    # attention logits; the ctx-projection half of `proj` is multiplied by the
    # zero half of h2, so only the key half contributes.
    logits = jnp.sum(proj3 * h2[:, None, :], axis=-1) + v     # (BT, SP)
    scaled = logits * scale

    # TODO(synk): mask=None path only; masked_fill_(-inf) not implemented.
    if sp > n_views:  # mask the zero-padded views out of the softmax
        view_ids = jax.lax.broadcasted_iota(jnp.int32, (bt, sp), 1)
        scaled = jnp.where(view_ids < n_views, scaled, -1e30)

    m = jnp.max(scaled, axis=-1, keepdims=True)
    e = jnp.exp(scaled - m)
    denom = jnp.sum(e, axis=-1, keepdims=True)
    attn = e / denom                                          # (BT, SP)

    # GCN gating with the pano-affinity row of the teacher view.
    attn_gcn = attn * pano_ref[...]                           # (BT, SP)

    # Exact reassociation of  (weighted_context @ wo_ctx):
    #   lanes Q:2Q of pre_raw == (sum_s attn_gcn * ctx[:,s,:]) @ wo_ctx
    pre_raw = jnp.sum(attn_gcn[:, :, None] * proj3, axis=1)   # (BT, 2Q)

    # linear_out(cat(weighted_context, h, knowledge_vector)); [wo_h; wo_kv] is
    # stacked into one (Q+KV, 2Q) weight whose result lands in lanes Q:2Q.
    pre = pre_raw + jnp.dot(hkv_ref[...], whk_ref[...],
                            preferred_element_type=jnp.float32)
    h_tilde = jnp.tanh(pre[:, q_dim:2 * q_dim])               # (BT, Q)

    # Pack both outputs into one lane-dense slab: [h_tilde | attn | zero pad]
    pad = out_w - q_dim - n_views
    parts = [h_tilde, attn[:, :n_views]]
    if pad > 0:
        parts.append(jnp.zeros((bt, pad), jnp.float32))
    out_ref[...] = jnp.concatenate(parts, axis=-1)


def pano_att_gcn_v5_forward(h, context, detect_feats, knowledge_vector,
                            teacher_action_view_ids, params, pano_a,
                            *, b_tile=None):
    B, Q = h.shape
    _, S, C = context.shape
    assert S == 36
    KD = detect_feats.shape[1]
    KV = knowledge_vector.shape[1]

    # Views padded 36 -> 40 so the in-kernel (BT*SP, .) <-> (BT, SP, .) reshape
    # of the f32 projection is tile-aligned (SP % 8 == 0); only +11% ctx bytes.
    SP = _round_up(S, 8)

    # Batch tiling: always >= 2 grid steps (DMA/compute overlap + v7x megacore),
    # per-tile rows capped at 256 (v7x has 64 MiB VMEM), multiple of 16 for bf16.
    if b_tile is None:
        n_tiles = max(2, _cdiv(B, 128))
        b_tile = _round_up(_cdiv(B, n_tiles), 16)
    b_tile = int(max(16, min(256, _round_up(b_tile, 16))))
    Bp = _round_up(B, b_tile)
    grid_b = Bp // b_tile
    pad_b = Bp - B

    def padb(x):
        if pad_b == 0:
            return x
        return jnp.concatenate(
            [x, jnp.zeros((pad_b,) + x.shape[1:], x.dtype)], axis=0)

    # Glue (tiny, done in XLA): gather the teacher-action pano row per sample.
    pano_rows = pano_a[teacher_action_view_ids].astype(jnp.float32)   # (B, 36)
    pano_b = padb(jnp.pad(pano_rows, ((0, 0), (0, SP - S))))           # (Bp, SP)

    # Context: pad views, pad batch, flatten to 2-D (free in XLA), cast bf16.
    ctx_p = jnp.pad(context, ((0, 0), (0, SP - S), (0, 0)))
    ctx_flat = padb(ctx_p).reshape(Bp * SP, C).astype(jnp.bfloat16)    # (Bp*SP, C)

    # h zero-padded to 2Q lanes (f32, used for the logit reductions).
    h2_b = padb(jnp.pad(h.astype(jnp.float32), ((0, 0), (0, Q))))      # (Bp, 2Q)
    # h & knowledge_vector concatenated for the fused output matmul.
    hkv_b = padb(jnp.concatenate([h, knowledge_vector], axis=1)
                 ).astype(jnp.bfloat16)                                # (Bp, Q+KV)
    det_b = padb(detect_feats).astype(jnp.bfloat16)                    # (Bp, KD)

    # Weight prep: fold linear_query into the key weights, fuse projections.
    f32 = jnp.float32
    wq = params["wq"].astype(f32)
    wck = params["wk_ctx"].astype(f32) @ wq.T                          # (C, Q)
    wfused = jnp.concatenate([wck, params["wo_ctx"].astype(f32)],
                             axis=1).astype(jnp.bfloat16)              # (C, 2Q)
    wdk = jnp.concatenate([params["wk_det"].astype(f32) @ wq.T,
                           jnp.zeros((KD, Q), f32)],
                          axis=1).astype(jnp.bfloat16)                 # (KD, 2Q)
    whk = jnp.concatenate(
        [jnp.zeros((Q + KV, Q), f32),
         jnp.concatenate([params["wo_h"].astype(f32),
                          params["wo_kv"].astype(f32)], axis=0)],
        axis=1).astype(jnp.bfloat16)                                   # (Q+KV, 2Q)

    out_w = _round_up(Q + S, 128)          # lane-dense packed output width
    scale = float(Q) ** (-0.5)

    kernel = functools.partial(_pano_att_kernel, scale=scale, q_dim=Q,
                               n_views=S, sp=SP, out_w=out_w)

    tile2 = lambda i: (i, 0)
    fixed2 = lambda i: (0, 0)

    cparams = dict(dimension_semantics=("parallel",))
    if b_tile > 128:
        # larger tiles exceed the small default scoped-VMEM on v5e (16 MiB)
        cparams["vmem_limit_bytes"] = 64 * 1024 * 1024
    compiler_params = pltpu.CompilerParams(**cparams)

    # NOTE: weight BlockSpecs use constant index maps so they are not
    # re-fetched per grid step (they total < 150 KB even double-buffered).
    slab = pl.pallas_call(
        kernel,
        out_shape=jax.ShapeDtypeStruct((Bp, out_w), jnp.float32),
        grid_spec=pltpu.PrefetchScalarGridSpec(
            num_scalar_prefetch=0,
            grid=(grid_b,),
            in_specs=[
                pl.BlockSpec((b_tile * SP, C), tile2),   # flattened context
                pl.BlockSpec((b_tile, 2 * Q), tile2),    # h zero-padded to 2Q (f32)
                pl.BlockSpec((b_tile, KD), tile2),       # detect_feats
                pl.BlockSpec((b_tile, Q + KV), tile2),   # [h | knowledge_vector]
                pl.BlockSpec((b_tile, SP), tile2),       # pano rows (gathered)
                pl.BlockSpec((C, 2 * Q), fixed2),        # [wk_ctx@wq^T | wo_ctx]
                pl.BlockSpec((KD, 2 * Q), fixed2),       # [wk_det@wq^T | 0]
                pl.BlockSpec((Q + KV, 2 * Q), fixed2),   # [0 | wo_h; wo_kv]
            ],
            out_specs=pl.BlockSpec((b_tile, out_w), tile2),
        ),
        compiler_params=compiler_params,
    )(ctx_flat, h2_b, det_b, hkv_b, pano_b, wfused, wdk, whk)

    h_tilde = slab[:B, :Q]
    attn = slab[:B, Q:Q + S]
    return h_tilde, attn


# ------------------------------------------------------------------------
# pure-JAX reference for a correctness check (f32 throughout)
# ------------------------------------------------------------------------
def reference_forward(h, context, det, kv, tids, params, pano_a):
    Q = h.shape[1]
    target = h @ params["wq"]
    keys = context @ params["wk_ctx"] + (det @ params["wk_det"])[:, None, :]
    logits = jnp.einsum("bsq,bq->bs", keys, target)
    attn = jax.nn.softmax(logits * (float(Q) ** (-0.5)), axis=-1)
    gcn = attn * pano_a[tids]
    wctx = jnp.einsum("bs,bsc->bc", gcn, context)
    pre = wctx @ params["wo_ctx"] + h @ params["wo_h"] + kv @ params["wo_kv"]
    return jnp.tanh(pre), attn


if __name__ == "__main__":
    B, Q, C = 32, 64, 128    # batch, query_dim, ctx_dim
    KD, KV = 300, 100        # knowledge_dim (hardcoded 300), knowledge_vector dim

    key = jax.random.PRNGKey(0)
    ks = jax.random.split(key, 12)
    params = {
        "wq":     jax.random.normal(ks[0], (Q, Q), jnp.float32) * 0.05,
        "wk_ctx": jax.random.normal(ks[1], (C, Q), jnp.float32) * 0.05,
        "wk_det": jax.random.normal(ks[2], (KD, Q), jnp.float32) * 0.05,
        "wo_ctx": jax.random.normal(ks[3], (C, Q), jnp.float32) * 0.05,
        "wo_h":   jax.random.normal(ks[4], (Q, Q), jnp.float32) * 0.05,
        "wo_kv":  jax.random.normal(ks[5], (KV, Q), jnp.float32) * 0.05,
    }

    h = jax.random.normal(ks[6], (B, Q), jnp.float32)
    context = jax.random.normal(ks[7], (B, 36, C), jnp.float32)
    detect_feats = jax.random.normal(ks[8], (B, KD), jnp.float32)
    knowledge_vector = jax.random.normal(ks[9], (B, KV), jnp.float32)
    teacher_ids = jax.random.randint(ks[10], (B,), 0, 36)

    pano_a = build_pano_buffer()

    # default b_tile -> 16 rows/tile, grid of 2 parallel batch tiles.
    h_tilde, attn = pano_att_gcn_v5_forward(
        h, context, detect_feats, knowledge_vector, teacher_ids, params,
        pano_a)
    jax.block_until_ready((h_tilde, attn))

    ht_ref, attn_ref = reference_forward(
        h, context, detect_feats, knowledge_vector, teacher_ids, params, pano_a)

    assert h_tilde.shape == (B, Q) and attn.shape == (B, 36)
    assert np.allclose(np.asarray(h_tilde), np.asarray(ht_ref), atol=3e-2), "h_tilde mismatch"
    assert np.allclose(np.asarray(attn), np.asarray(attn_ref), atol=3e-2), "attn mismatch"

    print("KERNEL_OK")
</pallas_src>

<mosaic_0001>
module attributes {stable_mosaic.version = 11 : i64} {
  func.func @_pano_att_kernel(%arg0: i32, %arg1: memref<640x128xbf16, #tpu.memory_space<vmem>>, %arg2: memref<16x128xf32, #tpu.memory_space<vmem>>, %arg3: memref<16x300xbf16, #tpu.memory_space<vmem>>, %arg4: memref<16x164xbf16, #tpu.memory_space<vmem>>, %arg5: memref<16x40xf32, #tpu.memory_space<vmem>>, %arg6: memref<128x128xbf16, #tpu.memory_space<vmem>>, %arg7: memref<300x128xbf16, #tpu.memory_space<vmem>>, %arg8: memref<164x128xbf16, #tpu.memory_space<vmem>>, %arg9: memref<16x128xf32, #tpu.memory_space<vmem>>) attributes {dimension_semantics = [#tpu.dimension_semantics<parallel>], iteration_bounds = array<i64: 2>, scalar_prefetch = 0 : i64, scratch_operands = 0 : i64, tpu.core_type = #tpu.core_type<tc>, window_params = [{transform_indices = @transform_0, window_bounds = array<i64: 640, 128>}, {transform_indices = @transform_1, window_bounds = array<i64: 16, 128>}, {transform_indices = @transform_2, window_bounds = array<i64: 16, 300>}, {transform_indices = @transform_3, window_bounds = array<i64: 16, 164>}, {transform_indices = @transform_4, window_bounds = array<i64: 16, 40>}, {pipeline_mode = #tpu.pipeline_mode<synchronous>, transform_indices = @transform_5, window_bounds = array<i64: 128, 128>}, {pipeline_mode = #tpu.pipeline_mode<synchronous>, transform_indices = @transform_6, window_bounds = array<i64: 300, 128>}, {pipeline_mode = #tpu.pipeline_mode<synchronous>, transform_indices = @transform_7, window_bounds = array<i64: 164, 128>}, {transform_indices = @transform_8, window_bounds = array<i64: 16, 128>}]} {
    %c0 = arith.constant 0 : index
    %c0_0 = arith.constant 0 : index
    %0 = vector.load %arg1[%c0, %c0_0] : memref<640x128xbf16, #tpu.memory_space<vmem>>, vector<640x128xbf16>
    %c0_1 = arith.constant 0 : index
    %c0_2 = arith.constant 0 : index
    %1 = vector.load %arg6[%c0_1, %c0_2] : memref<128x128xbf16, #tpu.memory_space<vmem>>, vector<128x128xbf16>
    %cst = arith.constant dense<0.000000e+00> : vector<640x128xf32>
    %2 = tpu.matmul %0, %1, %cst {dimension_numbers = #tpu.dot_dimension_numbers<[1], [0], [0], [1], [0, 0, 1, 1], [], []>} : vector<640x128xbf16>, vector<128x128xbf16>, vector<640x128xf32> -> vector<640x128xf32>
    %3 = vector.shape_cast %2 : vector<640x128xf32> to vector<16x40x128xf32>
    %c0_3 = arith.constant 0 : index
    %c0_4 = arith.constant 0 : index
    %4 = vector.load %arg2[%c0_3, %c0_4] : memref<16x128xf32, #tpu.memory_space<vmem>>, vector<16x128xf32>
    %c0_5 = arith.constant 0 : index
    %c0_6 = arith.constant 0 : index
    %5 = vector.load %arg3[%c0_5, %c0_6] : memref<16x300xbf16, #tpu.memory_space<vmem>>, vector<16x300xbf16>
    %c0_7 = arith.constant 0 : index
    %c0_8 = arith.constant 0 : index
    %6 = vector.load %arg7[%c0_7, %c0_8] : memref<300x128xbf16, #tpu.memory_space<vmem>>, vector<300x128xbf16>
    %cst_9 = arith.constant dense<0.000000e+00> : vector<16x128xf32>
    %7 = tpu.matmul %5, %6, %cst_9 {dimension_numbers = #tpu.dot_dimension_numbers<[1], [0], [0], [1], [0, 0, 1, 1], [], []>} : vector<16x300xbf16>, vector<300x128xbf16>, vector<16x128xf32> -> vector<16x128xf32>
    %8 = arith.mulf %7, %4 : vector<16x128xf32>
    %cst_10 = arith.constant dense<0.000000e+00> : vector<16xf32>
    %9 = vector.multi_reduction <add>, %8, %cst_10 [1] : vector<16x128xf32> to vector<16xf32>
    %10 = vector.shape_cast %9 : vector<16xf32> to vector<16x1xf32>
    %11 = vector.shape_cast %4 : vector<16x128xf32> to vector<16x1x128xf32>
    %12 = vector.broadcast %11 : vector<16x1x128xf32> to vector<16x40x128xf32>
    %13 = arith.mulf %3, %12 : vector<16x40x128xf32>
    %cst_11 = arith.constant dense<0.000000e+00> : vector<16x40xf32>
    %14 = vector.multi_reduction <add>, %13, %cst_11 [2] : vector<16x40x128xf32> to vector<16x40xf32>
    %15 = vector.broadcast %10 : vector<16x1xf32> to vector<16x40xf32>
    %16 = arith.addf %14, %15 : vector<16x40xf32>
    %cst_12 = arith.constant 1.250000e-01 : f32
    %17 = vector.broadcast %cst_12 : f32 to vector<16x40xf32>
    %18 = arith.mulf %16, %17 : vector<16x40xf32>
    %19 = tpu.iota {dimensions = array<i32: 1>} : vector<16x40xi32>
    %c36_i32 = arith.constant 36 : i32
    %20 = vector.broadcast %c36_i32 : i32 to vector<16x40xi32>
    %21 = arith.cmpi slt, %19, %20 : vector<16x40xi32>
    %cst_13 = arith.constant -1.000000e+30 : f32
    %22 = vector.broadcast %cst_13 : f32 to vector<16x40xf32>
    %23 = arith.select %21, %18, %22 : vector<16x40xi1>, vector<16x40xf32>
    %cst_14 = arith.constant dense<0xFF800000> : vector<16xf32>
    %24 = vector.multi_reduction <maximumf>, %23, %cst_14 [1] : vector<16x40xf32> to vector<16xf32>
    %25 = vector.shape_cast %24 : vector<16xf32> to vector<16x1xf32>
    %26 = vector.broadcast %25 : vector<16x1xf32> to vector<16x40xf32>
    %27 = arith.subf %23, %26 : vector<16x40xf32>
    %28 = math.exp %27 : vector<16x40xf32>
    %cst_15 = arith.constant dense<0.000000e+00> : vector<16xf32>
    %29 = vector.multi_reduction <add>, %28, %cst_15 [1] : vector<16x40xf32> to vector<16xf32>
    %30 = vector.shape_cast %29 : vector<16xf32> to vector<16x1xf32>
    %31 = vector.broadcast %30 : vector<16x1xf32> to vector<16x40xf32>
    %32 = arith.divf %28, %31 : vector<16x40xf32>
    %c0_16 = arith.constant 0 : index
    %c0_17 = arith.constant 0 : index
    %33 = vector.load %arg5[%c0_16, %c0_17] : memref<16x40xf32, #tpu.memory_space<vmem>>, vector<16x40xf32>
    %34 = arith.mulf %32, %33 : vector<16x40xf32>
    %35 = vector.shape_cast %34 : vector<16x40xf32> to vector<16x40x1xf32>
    %36 = vector.broadcast %35 : vector<16x40x1xf32> to vector<16x40x128xf32>
    %37 = arith.mulf %36, %3 : vector<16x40x128xf32>
    %cst_18 = arith.constant dense<0.000000e+00> : vector<16x128xf32>
    %38 = vector.multi_reduction <add>, %37, %cst_18 [1] : vector<16x40x128xf32> to vector<16x128xf32>
    %c0_19 = arith.constant 0 : index
    %c0_20 = arith.constant 0 : index
    %39 = vector.load %arg4[%c0_19, %c0_20] : memref<16x164xbf16, #tpu.memory_space<vmem>>, vector<16x164xbf16>
    %c0_21 = arith.constant 0 : index
    %c0_22 = arith.constant 0 : index
    %40 = vector.load %arg8[%c0_21, %c0_22] : memref<164x128xbf16, #tpu.memory_space<vmem>>, vector<164x128xbf16>
    %cst_23 = arith.constant dense<0.000000e+00> : vector<16x128xf32>
    %41 = tpu.matmul %39, %40, %cst_23 {dimension_numbers = #tpu.dot_dimension_numbers<[1], [0], [0], [1], [0, 0, 1, 1], [], []>} : vector<16x164xbf16>, vector<164x128xbf16>, vector<16x128xf32> -> vector<16x128xf32>
    %42 = arith.addf %38, %41 : vector<16x128xf32>
    %43 = vector.extract_strided_slice %42 {offsets = [0, 64], sizes = [16, 64], strides = [1, 1]} : vector<16x128xf32> to vector<16x64xf32>
    %44 = math.tanh %43 : vector<16x64xf32>
    %45 = vector.extract_strided_slice %32 {offsets = [0, 0], sizes = [16, 36], strides = [1, 1]} : vector<16x40xf32> to vector<16x36xf32>
    %cst_24 = arith.constant 0.000000e+00 : f32
    %46 = vector.broadcast %cst_24 : f32 to vector<16x28xf32>
    %47 = tpu.concatenate %44, %45, %46 in 1 : vector<16x64xf32>, vector<16x36xf32>, vector<16x28xf32> -> vector<16x128xf32>
    %c0_25 = arith.constant 0 : index
    %c0_26 = arith.constant 0 : index
    %48 = vector.load %arg9[%c0_25, %c0_26] : memref<16x128xf32, #tpu.memory_space<vmem>>, vector<16x128xf32>
    tpu.vector_store %arg9[%c0_25, %c0_26], %47 {strides = array<i32>} : memref<16x128xf32, #tpu.memory_space<vmem>>, vector<16x128xf32>,
    return
  }
  func.func @transform_0(%arg0: i32) -> (i32, i32) {
    %c0_i32 = arith.constant 0 : i32
    %c0_i32_0 = arith.constant 0 : i32
    return %arg0, %c0_i32 : i32, i32
  }
  func.func @transform_1(%arg0: i32) -> (i32, i32) {
    %c0_i32 = arith.constant 0 : i32
    %c0_i32_0 = arith.constant 0 : i32
    return %arg0, %c0_i32 : i32, i32
  }
  func.func @transform_2(%arg0: i32) -> (i32, i32) {
    %c0_i32 = arith.constant 0 : i32
    %c0_i32_0 = arith.constant 0 : i32
    return %arg0, %c0_i32 : i32, i32
  }
  func.func @transform_3(%arg0: i32) -> (i32, i32) {
    %c0_i32 = arith.constant 0 : i32
    %c0_i32_0 = arith.constant 0 : i32
    return %arg0, %c0_i32 : i32, i32
  }
  func.func @transform_4(%arg0: i32) -> (i32, i32) {
    %c0_i32 = arith.constant 0 : i32
    %c0_i32_0 = arith.constant 0 : i32
    return %arg0, %c0_i32 : i32, i32
  }
  func.func @transform_5(%arg0: i32) -> (i32, i32) {
    %c0_i32 = arith.constant 0 : i32
    %c0_i32_0 = arith.constant 0 : i32
    %c0_i32_1 = arith.constant 0 : i32
    return %c0_i32, %c0_i32_0 : i32, i32
  }
  func.func @transform_6(%arg0: i32) -> (i32, i32) {
    %c0_i32 = arith.constant 0 : i32
    %c0_i32_0 = arith.constant 0 : i32
    %c0_i32_1 = arith.constant 0 : i32
    return %c0_i32, %c0_i32_0 : i32, i32
  }
  func.func @transform_7(%arg0: i32) -> (i32, i32) {
    %c0_i32 = arith.constant 0 : i32
    %c0_i32_0 = arith.constant 0 : i32
    %c0_i32_1 = arith.constant 0 : i32
    return %c0_i32, %c0_i32_0 : i32, i32
  }
  func.func @transform_8(%arg0: i32) -> (i32, i32) {
    %c0_i32 = arith.constant 0 : i32
    %c0_i32_0 = arith.constant 0 : i32
    return %arg0, %c0_i32 : i32, i32
  }
}

</mosaic_0001>

<bundles_post_ra>
// kernel: tpu_custom_call.1
= control target key start
LH: loop header
LB: loop body
LE: loop exit
PB: predicated region body
PF: predicated region fallthrough
CT: control target
= control target key end

     0   :  { %s6765_s0 = inlined_call_operand.hbm [shape: bf16[1280,128], index: 0, kind: input, shape index: {}]   ;;  %s6766_s1 = inlined_call_operand.hbm [shape: f32[32,128], index: 1, kind: input, shape index: {}]   ;;  %s6767_s2 = inlined_call_operand.hbm [shape: bf16[32,300], index: 2, kind: input, shape index: {}]   ;;  %s6768_s3 = inlined_call_operand.hbm [shape: bf16[32,164], index: 3, kind: input, shape index: {}]   ;;  %s6769_s4 = inlined_call_operand.hbm [shape: f32[32,40], index: 4, kind: input, shape index: {}]   ;;  %s6770_s5 = inlined_call_operand.hbm [shape: bf16[128,128], index: 5, kind: input, shape index: {}]   ;;  %s6771_s6 = inlined_call_operand.hbm [shape: bf16[300,128], index: 6, kind: input, shape index: {}]   ;;  %s6772_s7 = inlined_call_operand.hbm [shape: bf16[164,128], index: 7, kind: input, shape index: {}]   ;;  %s6773_s8 = inlined_call_operand.hbm [shape: f32[32,128], index: 8, kind: output, shape index: {}]  }
   0x1   :  { %6909 = sst [smem:[#allocation136_spill]] %s6766_s1 }
   0x2   :  { %6910 = sst [smem:[#allocation137_spill]] %s6768_s3 }
   0x3   :  { %6911 = sst [smem:[#allocation138_spill]] %s6770_s5 }
   0x4   :  { %6912 = sst [smem:[#allocation139_spill]] %s6773_s8 }
   0x5   :  { %13 = vsyncpa [#allocation3], 0 }
   0x6   :  { %15 = vsyncpa [#allocation3 + $0x1], 0 }
   0x7   :  { %16 = vsyncpa [#allocation6], 0 }
   0x8   :  { %18 = vsyncpa [#allocation6 + $0x1], 0 }
   0x9   :  { %19 = vsyncpa [#allocation9], 0 }
   0xa   :  { %21 = vsyncpa [#allocation9 + $0x1], 0 }
   0xb   :  { %22 = vsyncpa [#allocation12], 0 }
   0xc   :  { %23 = vsyncpa [#allocation15], 0 }
   0xd   :  { %24 = vsyncpa [#allocation4], 0 }
   0xe   :  { %26 = vsyncpa [#allocation4 + $0x1], 0  ;;  %s4998_s27 = smov 0   ;;  %s5000_s28 = smov 0  }
   0xf   :  { %s5002_s29 = smov 0   ;;  %s5004_s30 = smov 0  }
  0x10 LB: > { %6913 = sst [smem:[#allocation23_spill]] %s4917_s27  ;;  %s5019_s9 = sadd.s32 4294967295, %s4929_s30   ;;  %s4929_s30 = sphi %s5004_s30, %s7178_s30   ;;  %s4925_s29 = sphi %s5002_s29, %s7181_s29   ;;  %s4921_s28 = sphi %s5000_s28, %s7180_s28   ;;  %s4917_s27 = sphi %s4998_s27, %s7179_s27  }
  0x11   : > { %6914 = sst [smem:[#allocation24_spill]] %s4921_s28  ;;  %s4049_s10 = sadd.s32 4294967294, %s4929_s30  }
  0x12   : > { %6915 = sst [smem:[#allocation25_spill]] %s4925_s29  ;;  %s5023_s11 = sadd.s32 1, %s4929_s30  }
  0x13   : > { %6916 = sst [smem:[#allocation26_spill]] %s5019_s9  ;;  %s39_s12 = sadd.s32 1, %s4925_s29 }
  0x14   : > { %6917 = sst [smem:[#allocation27_spill]] %s5023_s11  ;;  %s36_s13 = ssub.s32 %s4929_s30, %s5023_s11 }
  0x15   : > { %p46_p0 = scmp.ne.s32.totalorder %s4925_s29, %s4921_s28  ;;  %p37_p1 = scmp.eq.s32.totalorder %s36_s13, 0 }
  0x16   : > { %p47_p2 = scmp.eq.s32.totalorder %s4929_s30, 0  ;;  %p52_p3 = scmp.ne.s32.totalorder %s4921_s28, %s4917_s27 }
  0x17   : > { %p6775_p4 = scmp.eq.s32.totalorder %s5019_s9, 0  ;;  %p243_p7 = scmp.eq.s32.totalorder %s5019_s9, 1 }
  0x18   : > { %s5035_s14 = scalar_select %p37_p1, %s4925_s29, %s39_s12  }
  0x19   : > { %p5037_p5 = por %p47_p2, %p46_p0  ;;  %p5043_p6 = por %p6775_p4, %p52_p3 }
  0x1a   : > { %6918 = sst [smem:[#allocation28_spill]] %s5035_s14  ;;  %p249_p8 = scmp.eq.s32.totalorder %s4049_s10, 1 }
  0x1b   : > { %s6919_s15 = scalar_select %p5037_p5, 1, 0 }
  0x1c   : > { %s6920_s16 = scalar_select %p5043_p6, 1, 0 }
  0x1d   : > { %p4050_p9 = scmp.ge.s32.totalorder %s4929_s30, 1  ;;  %p256_p10 = scmp.lt.s32.totalorder %s4929_s30, 3 }
  0x1e   : > { %6921 = sst [smem:[#allocation29_spill]] %s6920_s16  ;;  %p5050_p11 = por %p243_p7, %p46_p0 }
  0x1f   : > { %p5054_p12 = por %p249_p8, %p52_p3  ;;  %p5058_p13 = pnand %p4050_p9, %p256_p10 }
  0x20   : > { %s6922_s17 = scalar_select %p5050_p11, 1, 0 }
  0x21   : > { %s6924_s18 = scalar_select %p5054_p12, 1, 0 }
  0x22   : > { %6923 = sst [smem:[#allocation30_spill]] %s6922_s17  ;;  %p4398_p1 = pneg %p5058_p13 }
  0x23   : > { %6925 = sst [smem:[#allocation31_spill]] %s6924_s18  ;;  %s4931_s20 = smov [#allocation11]  }
  0x24   : > { %s6926_s19 = scalar_select %p5058_p13, 1, 0 }
  0x25   : > { %s268_s21 = sshll.u32 %s4931_s20, 4  ;;  %p5066_p2 = pnand %p4398_p1, %p6775_p4  ;;  %s269_s21 = int_to_ptr.vmem [resolvable:$true] %s268_s21 }
  0x26   : > { %6927 = sst [smem:[#allocation32_spill]] %s6926_s19  ;;  %s5073_s23 = sand.u32 1, %s4925_s29  }
  0x27   : > { %s6928_s22 = scalar_select %p5066_p2, 1, 0 }
  0x28   : > { %s6929_s5 = sld [smem:[#allocation138_spill]]  ;;  %p5084_p8 = pneg %p5066_p2 }
  0x2a   : > { %s6930_s20 = scalar_select %p5084_p8, 1, 0 }
  0x2e   : > { %s4613_s10 = scalar_lea.hbm %s6929_s5, 1024 }
  0x2f   : > { %p4614_p7 = scmp.ne.s32.totalorder %s6929_s5, %s4613_s10  ;;  %p4620_p1 = scmp.lt.u32.totalorder %s4613_s10, %s6929_s5 }
  0x31   : > { %p4616_p9 = pnand %p5084_p8, %p4614_p7 }
  0x33   : > { %p4617_p10 = pneg %p4616_p9 }
  0x35   : > { %p4622_p0 = pnand %p4620_p1, %p4617_p10 }
  0x37   : > { %4625 = shalt.err (!%p4622_p0)
}
  0x38   : > { %s4626_s25 = scalar_lea.vmem %s269_s21, 1024  ;;  %p4634_p11 = scmp.lt.s32.totalorder %s269_s21, %s269_s21 }
  0x39   : > { %p4627_p4 = scmp.ne.s32.totalorder %s269_s21, %s4626_s25  ;;  %p4635_p6 = scmp.lt.s32.totalorder %s4626_s25, %s4626_s25 }
  0x3b   : > { %p4629_p3 = pnand %p4627_p4, %p5084_p8  ;;  %p4636_p13 = por %p4635_p6, %p4634_p11 }
  0x3d   : > { %p4630_p12 = pneg %p4629_p3 }
  0x3f   : > { %p4637_p5 = pnand %p4636_p13, %p4630_p12 }
  0x41   : > { %4640 = shalt.err (!%p4637_p5)
}
  0x42   : > { %s6782_s26 = smov 64   ;;  %s6784_s29 = smov 4  }
  0x43   : > { %4401 = dma.hbm_to_vmem [thread:$0]  (!%p5066_p2), %s6929_s5, 1024, %s269_s21, [#allocation12], %s6782_s26, %s6782_s26, %s6784_s29  }
  0x44   : > { %p6931_p4 = scmp.ne.s32.totalorder %s6919_s15, 0  ;;  %p6932_p6 = scmp.lt.s32.totalorder %s4929_s30, 2 }
  0x45   : > { %s5112_s13 = sshll.u32 %s5073_s23, 4  ;;  %s5115_s25 = sshll.u32 %s4929_s30, 8 }
  0x46   : > { %p5107_p11 = pnand %p6932_p6, %p6931_p4  ;;  %s6934_s1 = sld [smem:[#allocation136_spill]] }
  0x47   : > { %s333_s15 = scalar_lea.vmem [#allocation5], %s5112_s13  ;;  %s6935_s14 = sand.u32 1, %s4929_s30  }
  0x48   : > { %s6933_s12 = scalar_select %p5107_p11, 1, 0 }
  0x49   : > { %s340_s21 = sshll.u32 %s333_s15, 4  ;;  %s5128_s10 = scalar_lea.sflag [#allocation6], %s6935_s14  ;;  %s5124_s21 = int_to_ptr.vmem [resolvable:$true] %s340_s21 }
  0x4a   : > { %p5134_p12 = pneg %p5107_p11 }
  0x4c   : > { %s5121_s18 = scalar_lea.hbm %s6934_s1, %s5115_s25  ;;  %s4646_s15 = scalar_lea.hbm %s6934_s1, 512 }
  0x4d   : > { %s4641_s26 = scalar_lea.hbm %s5121_s18, 256  ;;  %p4647_p3 = scmp.lt.u32.totalorder %s5121_s18, %s6934_s1 }
  0x4e   : > { %p4642_p5 = scmp.ne.s32.totalorder %s5121_s18, %s4641_s26  ;;  %p4648_p7 = scmp.lt.u32.totalorder %s4646_s15, %s4641_s26 }
  0x4f   : > { %s6936_s29 = scalar_select %p5134_p12, 1, 0 }
  0x50   : > { %p4644_p13 = pnand %p5134_p12, %p4642_p5  ;;  %p4649_p9 = por %p4648_p7, %p4647_p3 }
  0x51   : > { %p4650_p10 = scmp.lt.u32.totalorder %s4641_s26, %s5121_s18 }
  0x52   : > { %p4645_p0 = pneg %p4644_p13 }
  0x53   : > { %p4651_p1 = por %p4650_p10, %p4649_p9 }
  0x55   : > { %p4652_p4 = pnand %p4651_p1, %p4645_p0 }
  0x57   : > { %4655 = shalt.err (!%p4652_p4)
}
  0x58   : > { %s4656_s14 = scalar_lea.vmem %s5124_s21, 256  ;;  %s4934_s11 = smov [#allocation5]  }
  0x59   : > { %p4657_p6 = scmp.ne.s32.totalorder %s5124_s21, %s4656_s14  ;;  %s4661_s24 = sshll.u32 %s4934_s11, 4  ;;  %s4662_s24 = int_to_ptr.vmem [resolvable:$false] %s4661_s24 }
  0x5a   : > { %s4663_s5 = scalar_lea.vmem %s4662_s24, 512  ;;  %p4664_p2 = scmp.lt.s32.totalorder %s5124_s21, %s4662_s24 }
  0x5b   : > { %p4659_p5 = pnand %p4657_p6, %p5134_p12  ;;  %p4665_p8 = scmp.lt.s32.totalorder %s4663_s5, %s4656_s14 }
  0x5d   : > { %p4660_p13 = pneg %p4659_p5  ;;  %p4666_p3 = por %p4665_p8, %p4664_p2 }
  0x5f   : > { %p4667_p7 = pnand %p4666_p3, %p4660_p13 }
  0x61   : > { %4670 = shalt.err (!%p4667_p7)
}
  0x62   : > { %s6796_s27 = smov 128   ;;  %s6798_s26 = smov 8  }
  0x63   : > { %4414 = dma.hbm_to_vmem [thread:$0]  (!%p5107_p11), %s5121_s18, 256, %s5124_s21, %s5128_s10, %s6796_s27, %s6796_s27, %s6798_s26  }
  0x64   : > { %s6937_s3 = sld [smem:[#allocation137_spill]]  ;;  %s376_s24 = scalar_lea.vmem [#allocation8], %s5112_s13 }
  0x65   : > { %s384_s5 = sshll.u32 %s376_s24, 4  ;;  %s4937_s1 = smov [#allocation13]   ;;  %s5168_s5 = int_to_ptr.vmem [resolvable:$true] %s384_s5 }
  0x66   : > { %s5170_s8 = sshll.u32 %s4937_s1, 4  ;;  %s6938_s17 = sand.u32 1, %s4929_s30   ;;  %s282_s8 = int_to_ptr.vmem [resolvable:$true] %s5170_s8 }
  0x67   : > { %s5174_s9 = scalar_lea.sflag [#allocation9], %s6938_s17 }
  0x6a   : > { %s5165_s11 = scalar_lea.hbm %s6937_s3, %s5115_s25  ;;  %s4676_s14 = scalar_lea.hbm %s6937_s3, 512 }
  0x6b   : > { %s4671_s18 = scalar_lea.hbm %s5165_s11, 256  ;;  %p4677_p9 = scmp.lt.u32.totalorder %s5165_s11, %s6937_s3 }
  0x6c   : > { %p4672_p2 = scmp.ne.s32.totalorder %s5165_s11, %s4671_s18  ;;  %p4678_p10 = scmp.lt.u32.totalorder %s4676_s14, %s4671_s18 }
  0x6d   : > { %p4680_p4 = scmp.lt.u32.totalorder %s4671_s18, %s5165_s11 }
  0x6e   : > { %p4674_p8 = pnand %p4672_p2, %p5134_p12  ;;  %p4679_p1 = por %p4678_p10, %p4677_p9 }
  0x70   : > { %p4675_p0 = pneg %p4674_p8  ;;  %p4681_p6 = por %p4680_p4, %p4679_p1 }
  0x72   : > { %p4682_p5 = pnand %p4681_p6, %p4675_p0 }
  0x74   : > { %4685 = shalt.err (!%p4682_p5)
}
  0x75   : > { %s4686_s1 = scalar_lea.vmem %s5168_s5, 256  ;;  %s4938_s17 = smov [#allocation8]  }
  0x76   : > { %p4687_p13 = scmp.ne.s32.totalorder %s5168_s5, %s4686_s1  ;;  %s4691_s24 = sshll.u32 %s4938_s17, 4  ;;  %s4692_s24 = int_to_ptr.vmem [resolvable:$false] %s4691_s24 }
  0x77   : > { %s4693_s27 = scalar_lea.vmem %s4692_s24, 512  ;;  %p4694_p2 = scmp.lt.s32.totalorder %s5168_s5, %s4692_s24 }
  0x78   : > { %p4689_p3 = pnand %p4687_p13, %p5134_p12  ;;  %p4695_p8 = scmp.lt.s32.totalorder %s4693_s27, %s4686_s1 }
  0x7a   : > { %p4690_p7 = pneg %p4689_p3  ;;  %p4696_p9 = por %p4695_p8, %p4694_p2 }
  0x7c   : > { %p4697_p10 = pnand %p4696_p9, %p4690_p7 }
  0x7e   : > { %4700 = shalt.err (!%p4697_p10)
}
  0x7f   : > { %s6939_s26 = smov 8   ;;  %s6940_s18 = smov 128  }
  0x80   : > { %4420 = dma.hbm_to_vmem [thread:$0]  (!%p5107_p11), %s5165_s11, 256, %s5168_s5, %s5174_s9, %s6940_s18, %s6940_s18, %s6939_s26  }
  0x81   : > { %s4701_s14 = scalar_lea.hbm %s6771_s6, 2432  ;;  %p6941_p1 = scmp.ne.s32.totalorder %s6930_s20, 0 }
  0x82   : > { %p4702_p0 = scmp.ne.s32.totalorder %s6771_s6, %s4701_s14  ;;  %p4708_p5 = scmp.lt.u32.totalorder %s4701_s14, %s6771_s6 }
  0x84   : > { %p4704_p4 = pnand %p4702_p0, %p6941_p1 }
  0x86   : > { %p4705_p6 = pneg %p4704_p4 }
  0x88   : > { %p4710_p13 = pnand %p4708_p5, %p4705_p6 }
  0x8a   : > { %4713 = shalt.err (!%p4710_p13)
}
  0x8b   : > { %s4714_s3 = scalar_lea.vmem %s282_s8, 2432  ;;  %p4722_p8 = scmp.lt.s32.totalorder %s282_s8, %s282_s8 }
  0x8c   : > { %p4715_p3 = scmp.ne.s32.totalorder %s282_s8, %s4714_s3  ;;  %p4723_p9 = scmp.lt.s32.totalorder %s4714_s3, %s4714_s3 }
  0x8e   : > { %p4717_p7 = pnand %p4715_p3, %p6941_p1  ;;  %p4724_p10 = por %p4723_p9, %p4722_p8 }
  0x90   : > { %p4718_p2 = pneg %p4717_p7 }
  0x92   : > { %p4725_p11 = pnand %p4724_p10, %p4718_p2 }
  0x94   : > { %4728 = shalt.err (!%p4725_p11)
}
  0x95   : > { %p6942_p0 = scmp.ne.s32.totalorder %s6928_s22, 0  ;;  %s6943_s11 = smov 4  }
  0x96   : > { %s6944_s5 = smov 64   ;;  %s4939_s14 = smov [#allocation14]  }
  0x97   : > { %4404 = dma.hbm_to_vmem [thread:$0]  (!%p6942_p0), %s6771_s6, 2432, %s282_s8, [#allocation12], %s6944_s5, %s6944_s5, %s6943_s11  }
  0x98   : > { %s294_s1 = sshll.u32 %s4939_s14, 4  ;;  %s4369_s17 = smul.u32 320, %s5073_s23  ;;  %s295_s1 = int_to_ptr.vmem [resolvable:$true] %s294_s1 }
  0x99   : > { %s4729_s27 = scalar_lea.hbm %s6772_s7, 1344 }
  0x9a   : > { %p4730_p11 = scmp.ne.s32.totalorder %s6772_s7, %s4729_s27  ;;  %p4736_p5 = scmp.lt.u32.totalorder %s4729_s27, %s6772_s7 }
  0x9c   : > { %p4732_p4 = pnand %p4730_p11, %p6941_p1 }
  0x9e   : > { %p4733_p6 = pneg %p4732_p4 }
  0xa0   : > { %p4738_p13 = pnand %p4736_p5, %p4733_p6 }
  0xa2   : > { %4741 = shalt.err (!%p4738_p13)
}
  0xa3   : > { %s4742_s8 = scalar_lea.vmem %s295_s1, 1344  ;;  %p4750_p8 = scmp.lt.s32.totalorder %s295_s1, %s295_s1 }
  0xa4   : > { %p4743_p3 = scmp.ne.s32.totalorder %s295_s1, %s4742_s8  ;;  %p4751_p9 = scmp.lt.s32.totalorder %s4742_s8, %s4742_s8 }
  0xa6   : > { %p4745_p7 = pnand %p4743_p3, %p6941_p1  ;;  %p4752_p10 = por %p4751_p9, %p4750_p8 }
  0xa8   : > { %p4746_p2 = pneg %p4745_p7 }
  0xaa   : > { %p4753_p12 = pnand %p4752_p10, %p4746_p2 }
  0xac   : > { %4756 = shalt.err (!%p4753_p12)
}
  0xad   : > { %4407 = dma.hbm_to_vmem [thread:$0]  (!%p6942_p0), %s6772_s7, 1344, %s295_s1, [#allocation15], %s6944_s5, %s6944_s5, %s6943_s11  }
  0xae   : > { %s4167_s19 = smul.u32 5120, %s4929_s30  ;;  %s312_s20 = scalar_lea.vmem [#allocation2], %s4369_s17 }
  0xaf   : > { %s319_s15 = sshll.u32 %s312_s20, 4  ;;  %s4370_s14 = smul.u32 24, %s5073_s23  ;;  %s5252_s15 = int_to_ptr.vmem [resolvable:$true] %s319_s15 }
  0xb0   : > { %s5250_s27 = scalar_lea.hbm %s6765_s0, %s4167_s19  ;;  %s309_s22 = scalar_lea.sflag [#allocation3], %s5073_s23 }
  0xb1   : > { %s4757_s21 = scalar_lea.hbm %s5250_s27, 5120  ;;  %p6945_p1 = scmp.ne.s32.totalorder %s6936_s29, 0 }
  0xb2   : > { %p4758_p12 = scmp.ne.s32.totalorder %s5250_s27, %s4757_s21  ;;  %s4762_s8 = scalar_lea.hbm %s6765_s0, 10240 }
  0xb3   : > { %p4763_p4 = scmp.lt.u32.totalorder %s5250_s27, %s6765_s0  ;;  %p4764_p6 = scmp.lt.u32.totalorder %s4762_s8, %s4757_s21 }
  0xb4   : > { %p4760_p0 = pnand %p4758_p12, %p6945_p1  ;;  %p4766_p13 = scmp.lt.u32.totalorder %s4757_s21, %s5250_s27 }
  0xb5   : > { %p4765_p5 = por %p4764_p6, %p4763_p4 }
  0xb6   : > { %p4761_p11 = pneg %p4760_p0 }
  0xb7   : > { %p4767_p3 = por %p4766_p13, %p4765_p5 }
  0xb9   : > { %p4768_p7 = pnand %p4767_p3, %p4761_p11 }
  0xbb   : > { %4771 = shalt.err (!%p4768_p7)
}
  0xbc   : > { %s4772_s19 = scalar_lea.vmem %s5252_s15, 5120  ;;  %s4940_s20 = smov [#allocation2]  }
  0xbd   : > { %p4773_p2 = scmp.ne.s32.totalorder %s5252_s15, %s4772_s19  ;;  %s4777_s24 = sshll.u32 %s4940_s20, 4  ;;  %s4778_s24 = int_to_ptr.vmem [resolvable:$false] %s4777_s24 }
  0xbe   : > { %s4779_s3 = scalar_lea.vmem %s4778_s24, 10240  ;;  %p4780_p10 = scmp.lt.s32.totalorder %s5252_s15, %s4778_s24 }
  0xbf   : > { %p4775_p8 = pnand %p4773_p2, %p6945_p1  ;;  %p4781_p12 = scmp.lt.s32.totalorder %s4779_s3, %s4772_s19 }
  0xc1   : > { %p4776_p9 = pneg %p4775_p8  ;;  %p4782_p0 = por %p4781_p12, %p4780_p10 }
  0xc3   : > { %p4783_p4 = pnand %p4782_p0, %p4776_p9 }
  0xc5   : > { %4786 = shalt.err (!%p4783_p4)
}
  0xc6   : > { %p6946_p11 = scmp.ne.s32.totalorder %s6933_s12, 0  ;;  %s4371_s21 = smul.u32 384, %s4929_s30 }
  0xc7   : > { %s354_s1 = scalar_lea.vmem [#allocation7], %s4370_s14 }
  0xc8   : > { %4411 = dma.hbm_to_vmem [thread:$0]  (!%p6946_p11), %s5250_s27, 5120, %s5252_s15, %s309_s22, %s6944_s5, %s6944_s5, %s6943_s11  }
  0xc9   : > { %s362_s17 = sshll.u32 %s354_s1, 4  ;;  %s5287_s16 = scalar_lea.hbm %s6767_s2, %s4371_s21  ;;  %s5289_s17 = int_to_ptr.vmem [resolvable:$true] %s362_s17 }
  0xca   : > { %s4787_s19 = scalar_lea.hbm %s5287_s16, 384  ;;  %s4792_s5 = scalar_lea.hbm %s6767_s2, 768 }
  0xcb   : > { %p4788_p6 = scmp.ne.s32.totalorder %s5287_s16, %s4787_s19  ;;  %p4793_p3 = scmp.lt.u32.totalorder %s5287_s16, %s6767_s2 }
  0xcc   : > { %p4794_p7 = scmp.lt.u32.totalorder %s4792_s5, %s4787_s19  ;;  %p4796_p8 = scmp.lt.u32.totalorder %s4787_s19, %s5287_s16 }
  0xcd   : > { %p4790_p5 = pnand %p4788_p6, %p6945_p1 }
  0xce   : > { %p4795_p2 = por %p4794_p7, %p4793_p3 }
  0xcf   : > { %p4791_p13 = pneg %p4790_p5 }
  0xd0   : > { %p4797_p9 = por %p4796_p8, %p4795_p2 }
  0xd2   : > { %p4798_p10 = pnand %p4797_p9, %p4791_p13 }
  0xd4   : > { %4801 = shalt.err (!%p4798_p10)
}
  0xd5   : > { %s4802_s27 = scalar_lea.vmem %s5289_s17, 384  ;;  %s4941_s22 = smov [#allocation7]  }
  0xd6   : > { %p4803_p12 = scmp.ne.s32.totalorder %s5289_s17, %s4802_s27  ;;  %s4807_s20 = sshll.u32 %s4941_s22, 4  ;;  %s4808_s20 = int_to_ptr.vmem [resolvable:$false] %s4807_s20 }
  0xd7   : > { %s4809_s24 = scalar_lea.vmem %s4808_s20, 768  ;;  %p4810_p6 = scmp.lt.s32.totalorder %s5289_s17, %s4808_s20 }
  0xd8   : > { %p4805_p0 = pnand %p4803_p12, %p6945_p1  ;;  %p4811_p5 = scmp.lt.s32.totalorder %s4809_s24, %s4802_s27 }
  0xda   : > { %p4806_p4 = pneg %p4805_p0  ;;  %p4812_p3 = por %p4811_p5, %p4810_p6 }
  0xdc   : > { %p4813_p7 = pnand %p4812_p3, %p4806_p4 }
  0xde   : > { %4816 = shalt.err (!%p4813_p7)
}
  0xdf   : > { %s4942_s3 = smov 192   ;;  %s4943_s21 = smov 12  }
  0xe0   : > { %4417 = dma.hbm_to_vmem [thread:$0]  (!%p6946_p11), %s5287_s16, 384, %s5289_s17, %s5128_s10, %s4942_s3, %s4942_s3, %s4943_s21  }
  0xe1   : > { %s5317_s28 = scalar_lea.hbm %s6769_s4, %s5115_s25  ;;  %s398_s19 = scalar_lea.vmem [#allocation10], %s5112_s13 }
  0xe2   : > { %s405_s11 = sshll.u32 %s398_s19, 4  ;;  %s4817_s23 = scalar_lea.hbm %s5317_s28, 256  ;;  %s5320_s11 = int_to_ptr.vmem [resolvable:$true] %s405_s11 }
  0xe3   : > { %p4818_p13 = scmp.ne.s32.totalorder %s5317_s28, %s4817_s23  ;;  %s4822_s17 = scalar_lea.hbm %s6769_s4, 512 }
  0xe4   : > { %p4823_p9 = scmp.lt.u32.totalorder %s5317_s28, %s6769_s4  ;;  %p4824_p10 = scmp.lt.u32.totalorder %s4822_s17, %s4817_s23 }
  0xe5   : > { %p4820_p2 = pnand %p4818_p13, %p6945_p1  ;;  %p4826_p0 = scmp.lt.u32.totalorder %s4817_s23, %s5317_s28 }
  0xe6   : > { %p4825_p12 = por %p4824_p10, %p4823_p9 }
  0xe7   : > { %p4821_p8 = pneg %p4820_p2 }
  0xe8   : > { %p4827_p4 = por %p4826_p0, %p4825_p12 }
  0xea   : > { %p4828_p6 = pnand %p4827_p4, %p4821_p8 }
  0xec   : > { %4831 = shalt.err (!%p4828_p6)
}
  0xed   : > { %s4832_s13 = scalar_lea.vmem %s5320_s11, 256  ;;  %s4944_s15 = smov [#allocation10]  }
  0xee   : > { %p4833_p5 = scmp.ne.s32.totalorder %s5320_s11, %s4832_s13  ;;  %s4837_s14 = sshll.u32 %s4944_s15, 4  ;;  %s4838_s14 = int_to_ptr.vmem [resolvable:$false] %s4837_s14 }
  0xef   : > { %s4839_s27 = scalar_lea.vmem %s4838_s14, 512  ;;  %p4840_p13 = scmp.lt.s32.totalorder %s5320_s11, %s4838_s14 }
  0xf0   : > { %p4835_p3 = pnand %p4833_p5, %p6945_p1  ;;  %p4841_p2 = scmp.lt.s32.totalorder %s4839_s27, %s4832_s13 }
  0xf2   : > { %p4836_p7 = pneg %p4835_p3  ;;  %p4842_p9 = por %p4841_p2, %p4840_p13 }
  0xf4   : > { %p4843_p10 = pnand %p4842_p9, %p4836_p7 }
  0xf6   : > { %4846 = shalt.err (!%p4843_p10)
}
  0xf7   : > { %4423 = dma.hbm_to_vmem [thread:$0]  (!%p6946_p11), %s5317_s28, 256, %s5320_s11, %s5174_s9, %s6940_s18, %s6940_s18, %s6939_s26  }
  0xf8   : > { %s6947_s29 = sld [smem:[#allocation32_spill]] }
  0xfe   : > { %p6948_p1 = scmp.ne.s32.totalorder %s6947_s29, 0 }
 0x100   : > { %417 = sbr.rel (%p6948_p1) target bundleno = 1855 (0x73f), region = 52 }
 0x107   : > { %s6949_s22 = sld [smem:[#allocation24_spill]]  ;;  %s6950_s20 = sld [smem:[#allocation29_spill]] }
 0x10d   : > { %s5350_s24 = sand.u32 1, %s6949_s22   ;;  %p6951_p8 = scmp.ne.s32.totalorder %s6950_s20, 0 }
 0x10e   : > { %s4372_s3 = smul.u32 320, %s5350_s24  ;;  %s420_s21 = scalar_lea.sflag [#allocation3], %s5350_s24 }
 0x110   : > { %s5354_s1 = scalar_lea.vmem [#allocation2], %s4372_s3 }
 0x111   : > { %4892 = dma.done.wait (%p6951_p8), %s420_s21, 5120  }
 0x112   : > { %4894 = vsyncadd (%p6951_p8), %s420_s21, 4294962176  ;;  %s6952_s12 = sld [smem:[#allocation26_spill]]  ;;  %s5362_s26 = sshll.u32 %s5350_s24, 4 }
 0x113   : > { %s432_s8 = scalar_lea.vmem [#allocation5], %s5362_s26 }
 0x118   : > { %s428_s9 = sand.u32 1, %s6952_s12  }
 0x119   : > { %s429_s18 = scalar_lea.sflag [#allocation6], %s428_s9 }
 0x11a   : > { %4896 = dma.done.wait (%p6951_p8), %s429_s18, 640  }
 0x11b   : > { %4898 = vsyncadd (%p6951_p8), %s429_s18, 4294966656  ;;  %s4373_s28 = smul.u32 24, %s5350_s24  ;;  %s447_s11 = scalar_lea.sflag [#allocation9], %s428_s9 }
 0x11c   : > { %s450_s23 = scalar_lea.vmem [#allocation8], %s5362_s26 }
 0x11d   : > { %s5370_s19 = scalar_lea.vmem [#allocation7], %s4373_s28 }
 0x11e   : > { %4900 = dma.done.wait (%p6951_p8), %s447_s11, 512  }
 0x11f   : > { %4902 = vsyncadd (%p6951_p8), %s447_s11, 4294966784  ;;  %s459_s5 = scalar_lea.vmem [#allocation10], %s5362_s26  ;;  %p6953_p11 = scmp.eq.s32.totalorder %s6952_s12, 0 }
 0x121   : > { %4904 = dma.done.wait (%p6953_p11), [#allocation12], 3456   ;;  %p6954_p12 = pmov %p6953_p11 }
 0x122   : > { %p6955_p0 = pmov %p6953_p11 }
 0x123   : > { %4906 = vsyncadd (%p6954_p12), [#allocation12], 4294963840 }
 0x124   : > { %4908 = dma.done.wait (%p6955_p0), [#allocation15], 1344   ;;  %p6956_p4 = pmov %p6955_p0 }
 0x125   : > { %v4486_v0 = vld [vmem:[#allocation11] sm:$0xff]   ;;  %v4487_v1 = vld [vmem:[#allocation11 + $0x8] sm:$0xff]   ;;  %v4488_v2 = vld [vmem:[#allocation11 + $0x10] sm:$0xff]   ;;  %v4945_v46 = vmov 0.0   ;;  %vm4946_vm0 = vmmov 0   ;;  %vm1444_vm1 = vcmask 1045504  }
 0x126   : > { %4910 = vsyncadd (%p6956_p4), [#allocation15], 4294965952  ;;  %4247 = vmatprep.subr.bf16.mxu0 %v4486_v0  ;;  %4353 = vmatprep.subr.bf16.mxu1 %v4486_v0  ;;  %v4489_v3 = vld [vmem:[#allocation11 + $0x18] sm:$0xff]   ;;  %v4494_v4 = vld [vmem:[%s5354_s1] sm:$0xff]   ;;  %vm1440_vm2 = vcmask 359424   ;;  %vm2530_vm3 = vcmask 130112  }
 0x127   : > { %4248 = vmatpush3.bf16.msra.mxu0 %v4486_v0  ;;  %4361 = vmatpush3.bf16.msra.mxu1 %v4486_v0  ;;  %v4496_v5 = vld [vmem:[%s5354_s1 + $0xe0] sm:$0xff]   ;;  %v4490_v6 = vld [vmem:[#allocation11 + $0x20] sm:$0xff]   ;;  %v4491_v7 = vld [vmem:[#allocation11 + $0x28] sm:$0xff]   ;;  %vm2537_vm4 = vcmask 195712   ;;  %vm2544_vm5 = vcmask 261312   ;;  %vm2551_vm6 = vcmask 326912  }
 0x128   : > { %4249 = vmatprep.subr.bf16.mxu0 %v4487_v1  ;;  %4354 = vmatprep.subr.bf16.mxu1 %v4487_v1  ;;  %v4492_v8 = vld [vmem:[#allocation11 + $0x30] sm:$0xff]   ;;  %v4493_v9 = vld [vmem:[#allocation11 + $0x38] sm:$0xff]   ;;  %v4510_v11 = vld [vmem:[#allocation13 + $0x40] sm:$0xff]   ;;  %vm2913_vm7 = vcmask 1041409   ;;  %vm2915_vm8 = vcmask 1042434   ;;  %vm2917_vm9 = vcmask 1043459  }
 0x129   : > { %4263 = vmatprep.mubr.bf16.mxu0 %v4494_v4  ;;  %4319 = vmatprep.mubr.bf16.mxu1 %v4496_v5  ;;  %v4495_v10 = vld [vmem:[%s5354_s1 + $0x8] sm:$0xff]   ;;  %v4498_v13 = vld [vmem:[%s5354_s1 + $0x10] sm:$0xff]   ;;  %v4512_v16 = vld [vmem:[#allocation13 + $0x48] sm:$0xff]   ;;  %vm2919_vm10 = vcmask 1044484   ;;  %vm2921_vm11 = vcmask 1045509   ;;  %vm2925_vm12 = vcmask 1047559  }
 0x12a   : > { %v4497_v12 = vld [vmem:[%s5354_s1 + $0xe8] sm:$0xff]   ;;  %v4500_v14 = vld [vmem:[%s5354_s1 + $0xf0] sm:$0xff]   ;;  %v4499_v17 = vld [vmem:[%s5354_s1 + $0x18] sm:$0xff]   ;;  %vm2923_vm14 = vcmask 1046534   ;;  %vm2938_vm15 = vcmask 326656   ;;  %s4949_s10 = smov 64  }
 0x12b   : > { %4250 = vmatpush3.bf16.msra.mxu0 %v4487_v1  ;;  %4362 = vmatpush3.bf16.msra.mxu1 %v4487_v1  ;;  %v4511_v15 = vld [vmem:[#allocation13] sm:$0xff]   ;;  %v4501_v18 = vld [vmem:[%s5354_s1 + $0xf8] sm:$0xff]   ;;  %v4516_v20 = vld [vmem:[#allocation13 + $0x50] sm:$0xff]   ;;  %s523_s17 = scalar_lea.vmem [#allocation16], %s5362_s26  ;;  %s7170_s25 = sld [smem:[#allocation30_spill]] }
 0x12c   : > { %4251 = vmatprep.subr.bf16.mxu0 %v4488_v2  ;;  %4355 = vmatprep.subr.bf16.mxu1 %v4488_v2  ;;  %v4513_v19 = vld [vmem:[#allocation13 + $0x8] sm:$0xff]   ;;  %v4502_v21 = vld [vmem:[%s5354_s1 + $0x20] sm:$0xff]   ;;  %v4520_v24 = vld [vmem:[#allocation13 + $0x58] sm:$0xff]   ;;  %s3861_s16 = sshll.u32 %s523_s17, 4  ;;  %s4172_s13 = sshll.u32 %s6952_s12, 8  ;;  %s6716_s16 = int_to_ptr.vmem [resolvable:$true] %s3861_s16 }
 0x12d   : > { %v4504_v22 = vld [vmem:[%s5354_s1 + $0x100] sm:$0xff]   ;;  %v4503_v25 = vld [vmem:[%s5354_s1 + $0x28] sm:$0xff]   ;;  %v4522_v28 = vld [vmem:[#allocation13 + $0x60] sm:$0xff]   ;;  %s7171_s27 = sld [smem:[#allocation139_spill]]  ;;  %s3848_s20 = scalar_lea.sflag [#allocation4], %s5350_s24 }
 0x12e   : > { %v4517_v23 = vld [vmem:[#allocation13 + $0x10] sm:$0xff]   ;;  %v4505_v26 = vld [vmem:[%s5354_s1 + $0x108] sm:$0xff]   ;;  %v4506_v29 = vld [vmem:[%s5354_s1 + $0x30] sm:$0xff]   ;;  %s4847_s3 = scalar_lea.vmem %s6716_s16, 256  ;;  %s4950_s21 = smov [#allocation16]  }
 0x12f   : > { %4252 = vmatpush3.bf16.msra.mxu0 %v4488_v2  ;;  %4363 = vmatpush3.bf16.msra.mxu1 %v4488_v2  ;;  %v4521_v27 = vld [vmem:[#allocation13 + $0x18] sm:$0xff]   ;;  %v4508_v30 = vld [vmem:[%s5354_s1 + $0x110] sm:$0xff]   ;;  %v4524_v32 = vld [vmem:[#allocation13 + $0x68] sm:$0xff]   ;;  %p4848_p6 = scmp.ne.s32.totalorder %s6716_s16, %s4847_s3 }
 0x130   : > { %4253 = vmatprep.subr.bf16.mxu0 %v4489_v3  ;;  %4356 = vmatprep.subr.bf16.mxu1 %v4489_v3  ;;  %v4523_v31 = vld [vmem:[#allocation13 + $0x20] sm:$0xff]   ;;  %v4507_v33 = vld [vmem:[%s5354_s1 + $0x38] sm:$0xff]   ;;  %v4529_v36 = vld [vmem:[#allocation13 + $0x70] sm:$0xff]  }
 0x131   : > { %v4509_v34 = vld [vmem:[%s5354_s1 + $0x118] sm:$0xff]   ;;  %v4514_v37 = vld [vmem:[%s5354_s1 + $0x40] sm:$0xff]   ;;  %v4532_v40 = vld [vmem:[#allocation13 + $0x78] sm:$0xff]   ;;  %p7173_p5 = scmp.ne.s32.totalorder %s7170_s25, 0 }
 0x132   : > { %v4526_v35 = vld [vmem:[#allocation13 + $0x28] sm:$0xff]   ;;  %v4518_v38 = vld [vmem:[%s5354_s1 + $0x120] sm:$0xff]   ;;  %v4515_v41 = vld [vmem:[%s5354_s1 + $0x48] sm:$0xff]  }
 0x133   : > { %4254 = vmatpush3.bf16.msra.mxu0 %v4489_v3  ;;  %4364 = vmatpush3.bf16.msra.mxu1 %v4489_v3  ;;  %v4531_v39 = vld [vmem:[#allocation13 + $0x30] sm:$0xff]   ;;  %v4533_v42 = vld [vmem:[#allocation13 + $0x38] sm:$0xff]   ;;  %v4525_v44 = vld [vmem:[%s5354_s1 + $0x50] sm:$0xff]   ;;  %s7172_s22 = smov %s7171_s27  ;;  %s6721_s29 = scalar_lea.hbm %s7171_s27, %s4172_s13 }
 0x134   : > { %4255 = vmatprep.subr.bf16.mxu0 %v4490_v6  ;;  %4357 = vmatprep.subr.bf16.mxu1 %v4490_v6  ;;  %v4519_v43 = vld [vmem:[%s5354_s1 + $0x128] sm:$0xff]   ;;  %v4528_v45 = vld [vmem:[%s5354_s1 + $0x130] sm:$0xff]   ;;  %v4527_v47 = vld [vmem:[%s5354_s1 + $0x58] sm:$0xff]   ;;  %p4849_p3 = pnand %p4848_p6, %p7173_p5 }
 0x135   : > { %v4530_v48 = vld [vmem:[%s5354_s1 + $0x138] sm:$0xff]   ;;  %v4538_v50 = vld [vmem:[%s5354_s1 + $0x60] sm:$0xff]   ;;  %v4540_v52 = vld [vmem:[%s5354_s1 + $0x68] sm:$0xff]  }
 0x136   : > { %v4536_v49 = vld [vmem:[%s5370_s19 + $0x4] ss:$12 sps:$4 sm:$0xff]   ;;  %v4534_v51 = vld [vmem:[%s5370_s19] ss:$12 sps:$4 sm:$0xff]   ;;  %v4542_v60 = vld [vmem:[%s5370_s19 + $0x8] ss:$12 sps:$4 sm:$0xff]   ;;  %p4850_p7 = pneg %p4849_p3 }
 0x137   : > { %4256 = vmatpush3.bf16.msra.mxu0 %v4490_v6  ;;  %4365 = vmatpush3.bf16.msra.mxu1 %v4490_v6  ;;  %v4537_v53 = vld [vmem:[#allocation13 + $0x80] sm:$0xff]   ;;  %v4539_v55 = vld [vmem:[#allocation13 + $0x88] sm:$0xff]   ;;  %v4541_v56 = vld [vmem:[#allocation13 + $0x90] sm:$0x3f]  }
 0x138   : > { %4257 = vmatprep.subr.bf16.mxu0 %v4491_v7  ;;  %4358 = vmatprep.subr.bf16.mxu1 %v4491_v7  ;;  %v4543_v54 = vld [vmem:[%s5354_s1 + $0x70] sm:$0xff]   ;;  %v4544_v57 = vld [vmem:[%s5354_s1 + $0x78] sm:$0xff]   ;;  %v4545_v58 = vld [vmem:[%s5354_s1 + $0x80] sm:$0xff]   ;;  %v1446_v59 = vsel %vm1444_vm1, %v4541_v56, 0  ;;  %vm3672_vm1 = vcmask 1041408  }
 0x139   : > { %v4546_v61 = vld [vmem:[%s5354_s1 + $0x88] sm:$0xff]   ;;  %v4547_v62 = vld [vmem:[%s5354_s1 + $0x90] sm:$0xff]   ;;  %v4548_v63 = vld [vmem:[%s5354_s1 + $0x98] sm:$0xff]  }
 0x13a   : > { %v4549_v0 = vld [vmem:[%s5354_s1 + $0xa0] sm:$0xff]   ;;  %v4550_v1 = vld [vmem:[%s5354_s1 + $0xa8] sm:$0xff]   ;;  %v4551_v2 = vld [vmem:[%s5354_s1 + $0xb0] sm:$0xff]  }
 0x13b   : > { %4258 = vmatpush3.bf16.msra.mxu0 %v4491_v7  ;;  %4366 = vmatpush3.bf16.msra.mxu1 %v4491_v7  ;;  %v4552_v3 = vld [vmem:[%s5354_s1 + $0xb8] sm:$0xff]   ;;  %v4553_v4 = vld [vmem:[%s5354_s1 + $0xc0] sm:$0xff]   ;;  %v4554_v5 = vld [vmem:[%s5354_s1 + $0xc8] sm:$0xff]  }
 0x13c   : > { %4259 = vmatprep.subr.bf16.mxu0 %v4492_v8  ;;  %4359 = vmatprep.subr.bf16.mxu1 %v4492_v8  ;;  %v4555_v6 = vld [vmem:[%s5354_s1 + $0xd0] sm:$0xff]   ;;  %v4556_v7 = vld [vmem:[%s5354_s1 + $0xd8] sm:$0xff]   ;;  %s4851_s1 = sshll.u32 %s4950_s21, 4  ;;  %s4852_s1 = int_to_ptr.vmem [resolvable:$false] %s4851_s1 }
 0x13d   : > { %s4853_s12 = scalar_lea.vmem %s4852_s1, 512  ;;  %p4854_p13 = scmp.lt.s32.totalorder %s6716_s16, %s4852_s1 }
 0x13e   : > { %p4855_p2 = scmp.lt.s32.totalorder %s4853_s12, %s4847_s3 }
 0x13f   : > { %4260 = vmatpush3.bf16.msra.mxu0 %v4492_v8  ;;  %4367 = vmatpush3.bf16.msra.mxu1 %v4492_v8  ;;  %v4947_v8 = vmov 1966171168  }
 0x140   : > { %4261 = vmatprep.subr.bf16.mxu0 %v4493_v9  ;;  %4360 = vmatprep.subr.bf16.mxu1 %v4493_v9  ;;  %p4856_p9 = por %p4855_p2, %p4854_p13 }
 0x142   : > { %p4857_p10 = pnand %p4856_p9, %p4850_p7 }
 0x143   : > { %4262 = vmatpush3.bf16.msra.mxu0 %v4493_v9  ;;  %4368 = vmatpush3.bf16.msra.mxu1 %v4493_v9  ;;  %v1540_v9 = vunpack.c.l.s4 %v4947_v8 }
 0x144   : > { %4221 = vmatprep.subr.bf16.mxu1 %v4510_v11 }
 0x145   : > { %v1541_v11 = vunpack.c.0.s8 %v1540_v9 }
 0x146   : > { %4264 = vmatmul.mubr.bf16.vlgmr.msra.gmra.mrb[0].mxu0 %v4495_v10  ;;  %4320 = vmatmul.mubr.bf16.vlgmr.msra.gmra.mrb[0].mxu1 %v4497_v12  ;;  %v6808_v10 = vlaneseq }
 0x147   : > { %4267 = vmatprep.mubr.bf16.mxu0 %v4498_v13  ;;  %4323 = vmatprep.mubr.bf16.mxu1 %v4500_v14  ;;  %v5437_v14 = vld [vmem:[%s432_s8 + $0x8] sm:$0xff] }
 0x148   : > { %4222 = vmatpush3.bf16.msra.mxu1 %v4511_v15  ;;  %v5430_v12 = vshrl.u32 %v6808_v10, 7 }
 0x149   : > { %4223 = vmatprep.subr.bf16.mxu1 %v4512_v16  ;;  %v5445_v16 = vld [vmem:[%s432_s8] sm:$0xff] }
 0x14a   : > { %v5433_v13 = vsub.s32 %v1541_v11, %v5430_v12 }
 0x14c   : > { %4224 = vmatpush3.bf16.msra.mxu1 %v4513_v19  ;;  %v5441_v15 = vrot.slane %v5437_v14, %v5433_v13 }
 0x14d   : > { %4225 = vmatprep.subr.bf16.mxu1 %v4516_v20 }
 0x14e   : > { %4268 = vmatmul.mubr.bf16.gmra.mrb[4].mxu0 %v4499_v17  ;;  %4324 = vmatmul.mubr.bf16.gmra.mrb[4].mxu1 %v4501_v18  ;;  %v1602_v17 = vcombine.high %v5441_v15, %v5441_v15  ;;  %v1545_v18 = vrot.slane %v5445_v16, %v5433_v13 }
 0x14f   : > { %4271 = vmatprep.mubr.bf16.mxu0 %v4502_v21  ;;  %4327 = vmatprep.mubr.bf16.mxu1 %v4504_v22  ;;  %v5456_v21 = vsub.s32 0, %v5430_v12 }
 0x150   : > { %4226 = vmatpush3.bf16.msra.mxu1 %v4517_v23  ;;  %v5452_v19 = vrot.slane %v1602_v17, %v5433_v13  ;;  %v1561_v20 = vrot.slane %v1545_v18, %v5433_v13 }
 0x151   : > { %4227 = vmatprep.subr.bf16.mxu1 %v4520_v24  ;;  %6957 = vst [vmem:[#allocation33_spill] sm:$0xff] %v5456_v21 }
 0x152   : > { %v1634_v22 = vcombine.high %v5452_v19, %v5452_v19  ;;  %v1639_v23 = vrot.slane %v1561_v20, %v5456_v21 }
 0x154   : > { %4228 = vmatpush3.bf16.msra.mxu1 %v4521_v27  ;;  %v5462_v24 = vrot.slane %v1634_v22, %v5456_v21 }
 0x155   : > { %4229 = vmatprep.subr.bf16.mxu1 %v4522_v28 }
 0x156   : > { %4272 = vmatmul.mubr.bf16.gmra.mrb[8].mxu0 %v4503_v25  ;;  %4328 = vmatmul.mubr.bf16.gmra.mrb[8].mxu1 %v4505_v26  ;;  %v1553_v25 = vcombine.high %v1545_v18, %v1545_v18  ;;  %v1587_v26 = vcombine.high %v5437_v14, %v5437_v14 }
 0x157   : > { %4275 = vmatprep.mubr.bf16.mxu0 %v4506_v29  ;;  %4331 = vmatprep.mubr.bf16.mxu1 %v4508_v30 }
 0x158   : > { %4230 = vmatpush3.bf16.msra.mxu1 %v4523_v31 }
 0x159   : > { %4231 = vmatprep.subr.bf16.mxu1 %v4524_v32 }
 0x15c   : > { %4232 = vmatpush3.bf16.msra.mxu1 %v4526_v35 }
 0x15d   : > { %4233 = vmatprep.subr.bf16.mxu1 %v4529_v36 }
 0x15e   : > { %4276 = vmatmul.mubr.bf16.gmra.mrb[12].mxu0 %v4507_v33  ;;  %4332 = vmatmul.mubr.bf16.gmra.mrb[12].mxu1 %v4509_v34 }
 0x15f   : > { %4279 = vmatprep.mubr.bf16.mxu0 %v4514_v37  ;;  %4335 = vmatprep.mubr.bf16.mxu1 %v4518_v38  ;;  %v5487_v38 = vrot.slane %v1553_v25, %v5433_v13 }
 0x160   : > { %4234 = vmatpush3.bf16.msra.mxu1 %v4531_v39  ;;  %v1601_v39 = vrot.slane %v1587_v26, %v5433_v13 }
 0x161   : > { %4235 = vmatprep.subr.bf16.mxu1 %v4532_v40 }
 0x164   : > { %4236 = vmatpush3.bf16.msra.mxu1 %v4533_v42  ;;  %v5496_v42 = vrot.slane %v1601_v39, %v5433_v13 }
 0x165   : > { %4343 = vmatprep.subr.bf16.mxu1 %v4945_v46 }
 0x166   : > { %4280 = vmatmul.mubr.bf16.gmra.mrb[16].mxu0 %v4515_v41  ;;  %4336 = vmatmul.mubr.bf16.gmra.mrb[16].mxu1 %v4519_v43  ;;  %v5493_v41 = vrot.slane %v5487_v38, %v5456_v21 }
 0x167   : > { %4283 = vmatprep.mubr.bf16.mxu0 %v4525_v44  ;;  %4339 = vmatprep.mubr.bf16.mxu1 %v4528_v45 }
 0x16e   : > { %4284 = vmatmul.mubr.bf16.gmra.mrb[20].mxu0 %v4527_v47  ;;  %4340 = vmatmul.mubr.bf16.gmra.mrb[20].mxu1 %v4530_v48 }
 0x16f   : > { %1480 = vmatprep.mubr.bf16.mxu1 %v4536_v49  ;;  %4287 = vmatprep.mubr.bf16.mxu0 %v4538_v50 }
 0x176   : > { %1481 = vmatmul.mubr.bf16.vlgmr.msra.gmra.mrb[24].mxu1 %v4534_v51  ;;  %4288 = vmatmul.mubr.bf16.gmra.mrb[24].mxu0 %v4540_v52 }
 0x177   : > { %4344 = vmatpush3.bf16.msra.mxu1 %v4537_v53  ;;  %4349 = vmatprep.mubr.msk.bf16.mxu1 %vm4946_vm0, %v4945_v46  ;;  %vm3668_vm0 = vcmask 293888  }
 0x178   : > { %4345 = vmatprep.subr.bf16.mxu1 %v4945_v46  ;;  %4291 = vmatprep.mubr.bf16.mxu0 %v4543_v54  ;;  %v1687_v54 = vrot.slane %v5496_v42, %v5456_v21 }
 0x17b   : > { %4346 = vmatpush3.bf16.msra.mxu1 %v4539_v55 }
 0x17c   : > { %4347 = vmatprep.subr.bf16.mxu1 %v4945_v46 }
 0x17e   : > { %4292 = vmatmul.mubr.bf16.gmra.mrb[28].mxu0 %v4544_v57 }
 0x17f   : > { %4348 = vmatpush3.bf16.msra.mxu1 %v1446_v59  ;;  %4295 = vmatprep.mubr.bf16.mxu0 %v4545_v58 }
 0x182   : > { %4350 = vmatmul.mubr.msk.bf16.vlgmr.msra.gmra.mrb[28].mxu1 %vm1440_vm2, %v4542_v60  ;;  %vm3839_vm2 = vcmask 523264  }
 0x186   : > { %4296 = vmatmul.mubr.bf16.gmra.mrb[32].mxu0 %v4546_v61 }
 0x187   : > { %4299 = vmatprep.mubr.bf16.mxu0 %v4547_v62 }
 0x18e   : > { %4300 = vmatmul.mubr.bf16.gmra.mrb[36].mxu0 %v4548_v63 }
 0x18f   : > { %4303 = vmatprep.mubr.bf16.mxu0 %v4549_v0 }
 0x196   : > { %4304 = vmatmul.mubr.bf16.gmra.mrb[40].mxu0 %v4550_v1  ;;  %v1583_v1 = vcombine.high %v1561_v20, %v1561_v20 }
 0x197   : > { %4307 = vmatprep.mubr.bf16.mxu0 %v4551_v2 }
 0x19e   : > { %4308 = vmatmul.mubr.bf16.gmra.mrb[44].mxu0 %v4552_v3  ;;  %v1603_v3 = vcombine.high %v1601_v39, %v1601_v39 }
 0x19f   : > { %4311 = vmatprep.mubr.bf16.mxu0 %v4553_v4 }
 0x1a6   : > { %4312 = vmatmul.mubr.bf16.gmra.mrb[48].mxu0 %v4554_v5 }
 0x1a7   : > { %4315 = vmatprep.mubr.bf16.mxu0 %v4555_v6  ;;  %v5546_v6 = vrot.slane %v1583_v1, %v5456_v21 }
 0x1ae   : > { %4316 = vmatmul.mubr.bf16.gmra.mrb[52].mxu0 %v4556_v7  ;;  %v5549_v7 = vrot.slane %v1603_v3, %v5433_v13 }
 0x1b0   : > { %v5569_v26 = vrot.slane %v5549_v7, %v5456_v21 }
 0x219   : > { %v5466_v27 = vpop.f32.mrb[0].mxu0  ;;  %v5468_v28 = vpop.f32.mrb[0].mxu1 }
 0x21a   : > { %6958 = vst [vmem:[#allocation34_spill] sm:$0xff] %v5466_v27  ;;  %6959 = vst [vmem:[#allocation35_spill] sm:$0xff] %v5468_v28  ;;  %v5470_v29 = vpop.f32.mrb[1].mxu0  ;;  %v5472_v30 = vpop.f32.mrb[1].mxu1  ;;  %v1718_v31 = vmul.f32 %v5466_v27, %v1639_v23  ;;  %v1774_v37 = vmul.f32 %v5468_v28, %v5462_v24  ;;  %v1585_v28 = vcombine.high %v5487_v38, %v5487_v38 }
 0x21b   : > { %6960 = vst [vmem:[#allocation36_spill] sm:$0xff] %v5470_v29  ;;  %6961 = vst [vmem:[#allocation37_spill] sm:$0xff] %v5472_v30  ;;  %v5475_v32 = vpop.f32.mrb[2].mxu0  ;;  %v5477_v33 = vpop.f32.mrb[2].mxu1  ;;  %v1716_v34 = vmul.f32 %v1639_v23, %v5470_v29  ;;  %v1772_v46 = vmul.f32 %v5462_v24, %v5472_v30  ;;  %v5892_v29 = vsub.s32 3, %v5430_v12 }
 0x21c   : > { %6962 = vst [vmem:[#allocation38_spill] sm:$0xff] %v5475_v32  ;;  %6963 = vst [vmem:[#allocation39_spill] sm:$0xff] %v5477_v33  ;;  %1800 = vadd.xlane.f32.xlu0 %v1718_v31  ;;  %v5480_v35 = vpop.f32.mrb[3].mxu0  ;;  %v5482_v36 = vpop.f32.mrb[3].mxu1  ;;  %v1719_v40 = vmul.f32 %v5475_v32, %v1639_v23  ;;  %v1775_v49 = vmul.f32 %v5477_v33, %v5462_v24 }
 0x21d   : > { %6964 = vst [vmem:[#allocation40_spill] sm:$0xff] %v5480_v35  ;;  %6965 = vst [vmem:[#allocation41_spill] sm:$0xff] %v5482_v36  ;;  %1796 = vadd.xlane.f32.xlu1 %v1716_v34  ;;  %v1717_v55 = vmul.f32 %v1639_v23, %v5480_v35  ;;  %v1773_v61 = vmul.f32 %v5462_v24, %v5482_v36 }
 0x21e   : > { %7042 = vst [vmem:[#allocation118_spill] sm:$0xff] %v5892_v29 }
 0x220   : > { %1912 = vadd.xlane.f32.xlu0 %v1774_v37 }
 0x221   : > { %1802 = vadd.xlane.f32.xlu1 %v1719_v40  ;;  %v5498_v43 = vpop.f32.mrb[4].mxu0  ;;  %v5500_v44 = vpop.f32.mrb[4].mxu1 }
 0x222   : > { %6966 = vst [vmem:[#allocation42_spill] sm:$0xff] %v5498_v43  ;;  %6967 = vst [vmem:[#allocation43_spill] sm:$0xff] %v5500_v44  ;;  %v5502_v45 = vpop.f32.mrb[5].mxu0  ;;  %v5506_v47 = vpop.f32.mrb[5].mxu1  ;;  %v1722_v52 = vmul.f32 %v5498_v43, %v5493_v41  ;;  %v1778_v56 = vmul.f32 %v5500_v44, %v1687_v54 }
 0x223   : > { %6968 = vst [vmem:[#allocation44_spill] sm:$0xff] %v5502_v45  ;;  %6969 = vst [vmem:[#allocation45_spill] sm:$0xff] %v5506_v47  ;;  %v5508_v48 = vpop.f32.mrb[6].mxu0  ;;  %v5512_v50 = vpop.f32.mrb[6].mxu1  ;;  %v1720_v4 = vmul.f32 %v1639_v23, %v5502_v45  ;;  %v1776_v11 = vmul.f32 %v1687_v54, %v5506_v47 }
 0x224   : > { %6970 = vst [vmem:[#allocation46_spill] sm:$0xff] %v5508_v48  ;;  %6971 = vst [vmem:[#allocation47_spill] sm:$0xff] %v5512_v50  ;;  %1908 = vadd.xlane.f32.xlu0 %v1772_v46  ;;  %v5514_v51 = vpop.f32.mrb[7].mxu0  ;;  %v5518_v53 = vpop.f32.mrb[7].mxu1  ;;  %v1723_v5 = vmul.f32 %v5508_v48, %v5493_v41  ;;  %v1779_v20 = vmul.f32 %v5512_v50, %v1687_v54 }
 0x225   : > { %6972 = vst [vmem:[#allocation48_spill] sm:$0xff] %v5514_v51  ;;  %6973 = vst [vmem:[#allocation49_spill] sm:$0xff] %v5518_v53  ;;  %1914 = vadd.xlane.f32.xlu1 %v1775_v49  ;;  %v1721_v37 = vmul.f32 %v5493_v41, %v5514_v51 }
 0x228   : > { %1808 = vadd.xlane.f32.xlu0 %v1722_v52 }
 0x229   : > { %1798 = vadd.xlane.f32.xlu1 %v1717_v55  ;;  %v5524_v57 = vpop.f32.mrb[8].mxu0  ;;  %v5526_v58 = vpop.f32.mrb[8].mxu1  ;;  %v1777_v55 = vmul.f32 %v1687_v54, %v5518_v53  ;;  %v1651_v53 = vrot.slane %v1585_v28, %v5456_v21 }
 0x22a   : > { %6974 = vst [vmem:[#allocation50_spill] sm:$0xff] %v5524_v57  ;;  %6975 = vst [vmem:[#allocation51_spill] sm:$0xff] %v5526_v58  ;;  %v5528_v59 = vpop.f32.mrb[9].mxu0  ;;  %v5530_v60 = vpop.f32.mrb[9].mxu1  ;;  %v1726_v25 = vmul.f32 %v5524_v57, %v5546_v6  ;;  %v1782_v39 = vmul.f32 %v5526_v58, %v5569_v26 }
 0x22b   : > { %6976 = vst [vmem:[#allocation52_spill] sm:$0xff] %v5528_v59  ;;  %6977 = vst [vmem:[#allocation53_spill] sm:$0xff] %v5530_v60  ;;  %v5534_v62 = vpop.f32.mrb[10].mxu0  ;;  %v5536_v63 = vpop.f32.mrb[10].mxu1 }
 0x22c   : > { %6978 = vst [vmem:[#allocation54_spill] sm:$0xff] %v5534_v62  ;;  %6979 = vst [vmem:[#allocation55_spill] sm:$0xff] %v5536_v63  ;;  %1920 = vadd.xlane.f32.xlu0 %v1778_v56  ;;  %v5538_v0 = vpop.f32.mrb[11].mxu0  ;;  %v5540_v2 = vpop.f32.mrb[11].mxu1  ;;  %v1783_v10 = vmul.f32 %v5536_v63, %v5569_v26 }
 0x22d   : > { %6980 = vst [vmem:[#allocation56_spill] sm:$0xff] %v5538_v0  ;;  %6981 = vst [vmem:[#allocation57_spill] sm:$0xff] %v5540_v2  ;;  %1910 = vadd.xlane.f32.xlu1 %v1773_v61 }
 0x230   : > { %1804 = vadd.xlane.f32.xlu0 %v1720_v4  ;;  %v1724_v4 = vmul.f32 %v5493_v41, %v5528_v59 }
 0x231   : > { %1810 = vadd.xlane.f32.xlu1 %v1723_v5  ;;  %v5551_v8 = vpop.f32.mrb[12].mxu0  ;;  %v5553_v9 = vpop.f32.mrb[12].mxu1  ;;  %v1727_v5 = vmul.f32 %v5534_v62, %v5546_v6 }
 0x232   : > { %6982 = vst [vmem:[#allocation58_spill] sm:$0xff] %v5551_v8  ;;  %6983 = vst [vmem:[#allocation59_spill] sm:$0xff] %v5553_v9  ;;  %v5556_v17 = vpop.f32.mrb[13].mxu0  ;;  %v5558_v18 = vpop.f32.mrb[13].mxu1 }
 0x233   : > { %6984 = vst [vmem:[#allocation60_spill] sm:$0xff] %v5556_v17  ;;  %6985 = vst [vmem:[#allocation61_spill] sm:$0xff] %v5558_v18  ;;  %v5561_v22 = vpop.f32.mrb[14].mxu0  ;;  %v5563_v23 = vpop.f32.mrb[14].mxu1  ;;  %v1728_v36 = vmul.f32 %v5546_v6, %v5556_v17  ;;  %v1784_v28 = vmul.f32 %v5569_v26, %v5558_v18 }
 0x234   : > { %6986 = vst [vmem:[#allocation62_spill] sm:$0xff] %v5561_v22  ;;  %6987 = vst [vmem:[#allocation63_spill] sm:$0xff] %v5563_v23  ;;  %1916 = vadd.xlane.f32.xlu0 %v1776_v11  ;;  %v5571_v31 = vpop.f32.mrb[15].mxu0  ;;  %v5573_v34 = vpop.f32.mrb[15].mxu1  ;;  %v1633_v11 = vcombine.high %v5496_v42, %v5496_v42  ;;  %v1730_v42 = vmul.f32 %v5551_v8, %v5546_v6  ;;  %v1731_v30 = vmul.f32 %v5561_v22, %v1651_v53 }
 0x235   : > { %6988 = vst [vmem:[#allocation64_spill] sm:$0xff] %v5571_v31  ;;  %6989 = vst [vmem:[#allocation65_spill] sm:$0xff] %v5573_v34  ;;  %1922 = vadd.xlane.f32.xlu1 %v1779_v20  ;;  %v1729_v45 = vmul.f32 %v5546_v6, %v5571_v31  ;;  %v1635_v6 = vcombine.high %v5549_v7, %v5549_v7 }
 0x238   : > { %1816 = vadd.xlane.f32.xlu0 %v1726_v25 }
 0x239   : > { %1806 = vadd.xlane.f32.xlu1 %v1721_v37  ;;  %v5579_v40 = vpop.f32.mrb[16].mxu0  ;;  %v5581_v46 = vpop.f32.mrb[16].mxu1  ;;  %v1780_v37 = vmul.f32 %v1687_v54, %v5530_v60  ;;  %v1725_v60 = vmul.f32 %v5493_v41, %v5538_v0 }
 0x23a   : > { %6990 = vst [vmem:[#allocation66_spill] sm:$0xff] %v5579_v40  ;;  %6991 = vst [vmem:[#allocation67_spill] sm:$0xff] %v5581_v46  ;;  %v5583_v49 = vpop.f32.mrb[17].mxu0  ;;  %v5585_v52 = vpop.f32.mrb[17].mxu1 }
 0x23b   : > { %6992 = vst [vmem:[#allocation68_spill] sm:$0xff] %v5583_v49  ;;  %6993 = vst [vmem:[#allocation69_spill] sm:$0xff] %v5585_v52  ;;  %v5588_v56 = vpop.f32.mrb[18].mxu0  ;;  %v5590_v61 = vpop.f32.mrb[18].mxu1 }
 0x23c   : > { %6994 = vst [vmem:[#allocation70_spill] sm:$0xff] %v5588_v56  ;;  %6995 = vst [vmem:[#allocation71_spill] sm:$0xff] %v5590_v61  ;;  %1928 = vadd.xlane.f32.xlu0 %v1782_v39  ;;  %v5592_v1 = vpop.f32.mrb[19].mxu0  ;;  %v5594_v3 = vpop.f32.mrb[19].mxu1 }
 0x23d   : > { %6996 = vst [vmem:[#allocation72_spill] sm:$0xff] %v5592_v1  ;;  %6997 = vst [vmem:[#allocation73_spill] sm:$0xff] %v5594_v3  ;;  %1918 = vadd.xlane.f32.xlu1 %v1777_v55 }
 0x240   : > { %1812 = vadd.xlane.f32.xlu0 %v1724_v4 }
 0x241   : > { %1818 = vadd.xlane.f32.xlu1 %v1727_v5  ;;  %v5602_v20 = vpop.f32.mrb[20].mxu0  ;;  %v5604_v25 = vpop.f32.mrb[20].mxu1  ;;  %v5620_v5 = vrot.slane %v1633_v11, %v5456_v21 }
 0x242   : > { %6998 = vst [vmem:[#allocation74_spill] sm:$0xff] %v5602_v20  ;;  %6999 = vst [vmem:[#allocation75_spill] sm:$0xff] %v5604_v25  ;;  %v5607_v39 = vpop.f32.mrb[21].mxu0  ;;  %v5609_v55 = vpop.f32.mrb[21].mxu1 }
 0x243   : > { %7000 = vst [vmem:[#allocation76_spill] sm:$0xff] %v5607_v39  ;;  %7001 = vst [vmem:[#allocation77_spill] sm:$0xff] %v5609_v55  ;;  %v5613_v50 = vpop.f32.mrb[22].mxu0  ;;  %v5615_v4 = vpop.f32.mrb[22].mxu1  ;;  %v1788_v7 = vmul.f32 %v5620_v5, %v5585_v52 }
 0x244   : > { %7002 = vst [vmem:[#allocation78_spill] sm:$0xff] %v5613_v50  ;;  %7003 = vst [vmem:[#allocation79_spill] sm:$0xff] %v5615_v4  ;;  %1924 = vadd.xlane.f32.xlu0 %v1780_v37  ;;  %v5622_v33 = vpop.f32.mrb[23].mxu0  ;;  %v5624_v54 = vpop.f32.mrb[23].mxu1  ;;  %v1786_v37 = vmul.f32 %v5553_v9, %v5620_v5 }
 0x245   : > { %7004 = vst [vmem:[#allocation80_spill] sm:$0xff] %v5622_v33  ;;  %7005 = vst [vmem:[#allocation81_spill] sm:$0xff] %v5624_v54  ;;  %1930 = vadd.xlane.f32.xlu1 %v1783_v10  ;;  %v1781_v10 = vmul.f32 %v5569_v26, %v5540_v2 }
 0x248   : > { %1824 = vadd.xlane.f32.xlu0 %v1730_v42 }
 0x249   : > { %1814 = vadd.xlane.f32.xlu1 %v1725_v60  ;;  %v5632_v63 = vpop.f32.mrb[24].mxu0  ;;  %v4237_v11 = vpop.f32.mrb[24].mxu1 }
 0x24a   : > { %7006 = vst [vmem:[#allocation82_spill] sm:$0xff] %v5632_v63  ;;  %v5634_v58 = vpop.f32.mrb[25].mxu0  ;;  %v4238_v44 = vpop.f32.mrb[25].mxu1 }
 0x24b   : > { %7007 = vst [vmem:[#allocation83_spill] sm:$0xff] %v5634_v58  ;;  %v5639_v41 = vpop.f32.mrb[26].mxu0  ;;  %v4239_v47 = vadd.f32 %v4238_v44, %v4237_v11  ;;  %v4240_v38 = vpop.f32.mrb[26].mxu1 }
 0x24c   : > { %7008 = vst [vmem:[#allocation84_spill] sm:$0xff] %v5639_v41  ;;  %1936 = vadd.xlane.f32.xlu0 %v1786_v37  ;;  %v5641_v42 = vpop.f32.mrb[27].mxu0  ;;  %v4241_v9 = vpop.f32.mrb[27].mxu1  ;;  %v1787_v37 = vmul.f32 %v5563_v23, %v5620_v5 }
 0x24d   : > { %7009 = vst [vmem:[#allocation85_spill] sm:$0xff] %v5641_v42  ;;  %1926 = vadd.xlane.f32.xlu1 %v1781_v10  ;;  %v4242_v60 = vadd.f32 %v4241_v9, %v4240_v38  ;;  %v1734_v9 = vmul.f32 %v5579_v40, %v1651_v53  ;;  %v1538_v10 = vcombine.high %v5445_v16, %v5445_v16 }
 0x24f   : > { %v1552_v23 = vrot.slane %v1538_v10, %v5433_v13 }
 0x250   : > { %1820 = vadd.xlane.f32.xlu0 %v1728_v36 }
 0x251   : > { %1826 = vadd.xlane.f32.xlu1 %v1731_v30  ;;  %v5646_v2 = vpop.f32.mrb[28].mxu0 }
 0x252   : > { %7010 = vst [vmem:[#allocation86_spill] sm:$0xff] %v5646_v2  ;;  %v5650_v44 = vpop.f32.mrb[29].mxu0 }
 0x253   : > { %7011 = vst [vmem:[#allocation87_spill] sm:$0xff] %v5650_v44  ;;  %v5654_v11 = vpop.f32.mrb[30].mxu0 }
 0x254   : > { %7012 = vst [vmem:[#allocation88_spill] sm:$0xff] %v5654_v11  ;;  %1932 = vadd.xlane.f32.xlu0 %v1784_v28  ;;  %v5659_v36 = vpop.f32.mrb[31].mxu0  ;;  %v1790_v28 = vmul.f32 %v5581_v46, %v5620_v5 }
 0x255   : > { %7013 = vst [vmem:[#allocation89_spill] sm:$0xff] %v5659_v36  ;;  %1938 = vadd.xlane.f32.xlu1 %v1787_v37  ;;  %v1523_v30 = vpop.f32.mrb[28].mxu1 }
 0x256   : > { %v5661_v38 = vadd.f32 %v4239_v47, %v1523_v30  ;;  %v4351_v18 = vpop.f32.mrb[29].mxu1  ;;  %v1785_v47 = vmul.f32 %v5569_v26, %v5573_v34 }
 0x257   : > { %v1526_v8 = vpop.f32.mrb[30].mxu1 }
 0x258   : > { %1832 = vadd.xlane.f32.xlu0 %v1734_v9  ;;  %v5668_v40 = vadd.f32 %v4242_v60, %v1526_v8  ;;  %v4352_v0 = vpop.f32.mrb[31].mxu1  ;;  %v1568_v9 = vrot.slane %v1552_v23, %v5433_v13  ;;  %v1699_v8 = vrot.slane %v1635_v6, %v5456_v21  ;;  %v1733_v6 = vmul.f32 %v1651_v53, %v5592_v1 }
 0x259   : > { %1822 = vadd.xlane.f32.xlu1 %v1729_v45  ;;  %v5670_v32 = vpop.f32.mrb[32].mxu0  ;;  %v1732_v45 = vmul.f32 %v1651_v53, %v5583_v49  ;;  %v1735_v0 = vmul.f32 %v5588_v56, %v1651_v53 }
 0x25a   : > { %7014 = vst [vmem:[#allocation90_spill] sm:$0xff] %v5670_v32  ;;  %v5672_v37 = vpop.f32.mrb[33].mxu0  ;;  %v1655_v26 = vrot.slane %v1568_v9, %v5456_v21 }
 0x25b   : > { %7015 = vst [vmem:[#allocation91_spill] sm:$0xff] %v5672_v37  ;;  %v5678_v18 = vpop.f32.mrb[34].mxu0 }
 0x25c   : > { %7016 = vst [vmem:[#allocation92_spill] sm:$0xff] %v5678_v18  ;;  %1944 = vadd.xlane.f32.xlu0 %v1790_v28  ;;  %v5681_v10 = vpop.f32.mrb[35].mxu0  ;;  %v1791_v28 = vmul.f32 %v5590_v61, %v1699_v8  ;;  %v1738_v34 = vmul.f32 %v5602_v20, %v1655_v26  ;;  %v1789_v61 = vmul.f32 %v5620_v5, %v5594_v3 }
 0x25d   : > { %7017 = vst [vmem:[#allocation93_spill] sm:$0xff] %v5681_v10  ;;  %1934 = vadd.xlane.f32.xlu1 %v1785_v47  ;;  %v1736_v53 = vmul.f32 %v1655_v26, %v5607_v39  ;;  %v1792_v5 = vmul.f32 %v1699_v8, %v5609_v55  ;;  %v1584_v3 = vcombine.high %v1568_v9, %v1568_v9  ;;  %v5879_v39 = vsub.s32 2, %v5430_v12 }
 0x25f   : > { %7041 = vst [vmem:[#allocation117_spill] sm:$0xff] %v5879_v39 }
 0x260   : > { %1828 = vadd.xlane.f32.xlu0 %v1732_v45  ;;  %v1794_v45 = vmul.f32 %v5604_v25, %v1699_v8 }
 0x261   : > { %1834 = vadd.xlane.f32.xlu1 %v1735_v0  ;;  %v5687_v60 = vpop.f32.mrb[36].mxu0  ;;  %v1554_v0 = vcombine.high %v1552_v23, %v1552_v23  ;;  %v1739_v23 = vmul.f32 %v5613_v50, %v1655_v26  ;;  %v1740_v50 = vmul.f32 %v1655_v26, %v5634_v58 }
 0x262   : > { %7018 = vst [vmem:[#allocation94_spill] sm:$0xff] %v5687_v60  ;;  %v5691_v30 = vpop.f32.mrb[37].mxu0 }
 0x263   : > { %7019 = vst [vmem:[#allocation95_spill] sm:$0xff] %v5691_v30  ;;  %v5694_v47 = vpop.f32.mrb[38].mxu0  ;;  %v1582_v20 = vrot.slane %v1554_v0, %v5433_v13 }
 0x264   : > { %7020 = vst [vmem:[#allocation96_spill] sm:$0xff] %v5694_v47  ;;  %1940 = vadd.xlane.f32.xlu0 %v1788_v7  ;;  %v5697_v46 = vpop.f32.mrb[39].mxu0 }
 0x265   : > { %7021 = vst [vmem:[#allocation97_spill] sm:$0xff] %v5697_v46  ;;  %1946 = vadd.xlane.f32.xlu1 %v1791_v28  ;;  %v1586_v58 = vcombine.high %v1582_v20, %v1582_v20 }
 0x268   : > { %1840 = vadd.xlane.f32.xlu0 %v1738_v34  ;;  %v1659_v34 = vrot.slane %v1582_v20, %v5456_v21 }
 0x269   : > { %1830 = vadd.xlane.f32.xlu1 %v1733_v6  ;;  %v5701_v52 = vpop.f32.mrb[40].mxu0 }
 0x26a   : > { %7022 = vst [vmem:[#allocation98_spill] sm:$0xff] %v5701_v52  ;;  %v5703_v56 = vpop.f32.mrb[41].mxu0 }
 0x26b   : > { %7023 = vst [vmem:[#allocation99_spill] sm:$0xff] %v5703_v56  ;;  %v5707_v7 = vpop.f32.mrb[42].mxu0 }
 0x26c   : > { %7024 = vst [vmem:[#allocation100_spill] sm:$0xff] %v5707_v7  ;;  %1952 = vadd.xlane.f32.xlu0 %v1794_v45  ;;  %v5710_v28 = vpop.f32.mrb[43].mxu0  ;;  %v1795_v45 = vmul.f32 %v5615_v4, %v1699_v8 }
 0x26d   : > { %7025 = vst [vmem:[#allocation101_spill] sm:$0xff] %v5710_v28  ;;  %1942 = vadd.xlane.f32.xlu1 %v1789_v61  ;;  %v1742_v61 = vmul.f32 %v5632_v63, %v1659_v34  ;;  %v5872_v63 = vsub.s32 1, %v5430_v12 }
 0x26f   : > { %7040 = vst [vmem:[#allocation116_spill] sm:$0xff] %v5872_v63 }
 0x270   : > { %1836 = vadd.xlane.f32.xlu0 %v1736_v53  ;;  %v1737_v53 = vmul.f32 %v1655_v26, %v5622_v33  ;;  %v1744_v26 = vmul.f32 %v1659_v34, %v5650_v44  ;;  %v1531_v44 = vmul.f32 %v5668_v40, %v5437_v14  ;;  %v1610_v14 = vrot.slane %v5441_v15, %v5433_v13 }
 0x271   : > { %1842 = vadd.xlane.f32.xlu1 %v1739_v23  ;;  %v5715_v6 = vpop.f32.mrb[44].mxu0  ;;  %v1663_v23 = vrot.slane %v1584_v3, %v5456_v21 }
 0x272   : > { %7026 = vst [vmem:[#allocation102_spill] sm:$0xff] %v5715_v6  ;;  %v5718_v25 = vpop.f32.mrb[45].mxu0 }
 0x273   : > { %7027 = vst [vmem:[#allocation103_spill] sm:$0xff] %v5718_v25  ;;  %v5721_v0 = vpop.f32.mrb[46].mxu0  ;;  %v1746_v9 = vmul.f32 %v5646_v2, %v1663_v23 }
 0x274   : > { %7028 = vst [vmem:[#allocation104_spill] sm:$0xff] %v5721_v0  ;;  %1948 = vadd.xlane.f32.xlu0 %v1792_v5  ;;  %v5724_v31 = vpop.f32.mrb[47].mxu0  ;;  %v1793_v5 = vmul.f32 %v1699_v8, %v5624_v54  ;;  %v1741_v8 = vmul.f32 %v1659_v34, %v5641_v42 }
 0x275   : > { %7029 = vst [vmem:[#allocation105_spill] sm:$0xff] %v5724_v31  ;;  %1954 = vadd.xlane.f32.xlu1 %v1795_v45 }
 0x278   : > { %1848 = vadd.xlane.f32.xlu0 %v1742_v61  ;;  %v1743_v61 = vmul.f32 %v5639_v41, %v1659_v34  ;;  %v1745_v41 = vmul.f32 %v1659_v34, %v5659_v36 }
 0x279   : > { %1838 = vadd.xlane.f32.xlu1 %v1737_v53  ;;  %v5728_v55 = vpop.f32.mrb[48].mxu0 }
 0x27a   : > { %7030 = vst [vmem:[#allocation106_spill] sm:$0xff] %v5728_v55  ;;  %v5731_v4 = vpop.f32.mrb[49].mxu0 }
 0x27b   : > { %7031 = vst [vmem:[#allocation107_spill] sm:$0xff] %v5731_v4  ;;  %v5734_v59 = vpop.f32.mrb[50].mxu0 }
 0x27c   : > { %7032 = vst [vmem:[#allocation108_spill] sm:$0xff] %v5734_v59  ;;  %1844 = vadd.xlane.f32.xlu0 %v1740_v50  ;;  %v5737_v45 = vpop.f32.mrb[51].mxu0 }
 0x27d   : > { %7033 = vst [vmem:[#allocation109_spill] sm:$0xff] %v5737_v45  ;;  %1950 = vadd.xlane.f32.xlu1 %v1793_v5  ;;  %v1530_v5 = vmul.f32 %v5661_v38, %v5445_v16  ;;  %v1748_v16 = vmul.f32 %v1663_v23, %v5672_v37  ;;  %v1749_v38 = vmul.f32 %v1663_v23, %v5681_v10 }
 0x280   : > { %1856 = vadd.xlane.f32.xlu0 %v1746_v9  ;;  %v1747_v9 = vmul.f32 %v5654_v11, %v1663_v23 }
 0x281   : > { %1850 = vadd.xlane.f32.xlu1 %v1743_v61  ;;  %v5740_v3 = vpop.f32.mrb[52].mxu0  ;;  %v1667_v61 = vrot.slane %v1586_v58, %v5456_v21 }
 0x282   : > { %7034 = vst [vmem:[#allocation110_spill] sm:$0xff] %v5740_v3  ;;  %v5743_v53 = vpop.f32.mrb[53].mxu0 }
 0x283   : > { %7035 = vst [vmem:[#allocation111_spill] sm:$0xff] %v5743_v53  ;;  %v5746_v54 = vpop.f32.mrb[54].mxu0  ;;  %v1751_v20 = vmul.f32 %v5678_v18, %v1667_v61  ;;  %v1754_v58 = vmul.f32 %v5687_v60, %v1667_v61  ;;  %v1755_v40 = vmul.f32 %v5694_v47, %v1667_v61  ;;  %v1753_v34 = vmul.f32 %v1667_v61, %v5697_v46 }
 0x284   : > { %7036 = vst [vmem:[#allocation112_spill] sm:$0xff] %v5746_v54  ;;  %1852 = vadd.xlane.f32.xlu0 %v1744_v26  ;;  %v5748_v50 = vpop.f32.mrb[55].mxu0  ;;  %v1750_v26 = vmul.f32 %v5670_v32, %v1663_v23 }
 0x285   : > { %7037 = vst [vmem:[#allocation113_spill] sm:$0xff] %v5748_v50  ;;  %1846 = vadd.xlane.f32.xlu1 %v1741_v8  ;;  %v6846_v8 = vmov 0  }
 0x286   : > { %4485 = vset.pattern.permute.xlu1 %v6846_v8  ;;  %4484 = vset.pattern.permute.xlu0 %v6846_v8 }
 0x287   : > { %3676 = vmatprep.subr.bf16.mxu1 %v6846_v8 }
 0x288   : > { %1532 = vadd.xlane.f32.xlu0 %v1530_v5  ;;  %v1675_v5 = vrot.slane %v5452_v19, %v5456_v21 }
 0x289   : > { %1858 = vadd.xlane.f32.xlu1 %v1747_v9 }
 0x28a   : > { %v1761_v19 = vmul.f32 %v1675_v5, %v5724_v31 }
 0x28c   : > { %1534 = vadd.xlane.f32.xlu0 %v1531_v44  ;;  %v1671_v44 = vrot.slane %v1610_v14, %v5456_v21 }
 0x28d   : > { %1854 = vadd.xlane.f32.xlu1 %v1745_v41  ;;  %v1752_v41 = vmul.f32 %v1667_v61, %v5691_v30  ;;  %v1762_v61 = vmul.f32 %v5715_v6, %v1675_v5 }
 0x28e   : > { %v1758_v23 = vmul.f32 %v5701_v52, %v1671_v44  ;;  %v1759_v13 = vmul.f32 %v5707_v7, %v1671_v44  ;;  %v1756_v15 = vmul.f32 %v1671_v44, %v5703_v56  ;;  %v1757_v9 = vmul.f32 %v1671_v44, %v5710_v28 }
 0x290   : > { %1864 = vadd.xlane.f32.xlu0 %v1750_v26  ;;  %v1632_v26 = vcombine.high %v1610_v14, %v1610_v14 }
 0x291   : > { %1866 = vadd.xlane.f32.xlu1 %v1751_v20  ;;  %v1763_v20 = vmul.f32 %v5721_v0, %v1675_v5 }
 0x294   : > { %1860 = vadd.xlane.f32.xlu0 %v1748_v16  ;;  %v1760_v16 = vmul.f32 %v1671_v44, %v5718_v25  ;;  %v1764_v44 = vmul.f32 %v1675_v5, %v5731_v4 }
 0x295   : > { %1862 = vadd.xlane.f32.xlu1 %v1749_v38  ;;  %v1679_v38 = vrot.slane %v1632_v26, %v5456_v21 }
 0x297   : > { %v1767_v14 = vmul.f32 %v5734_v59, %v1679_v38 }
 0x298   : > { %1872 = vadd.xlane.f32.xlu0 %v1754_v58 }
 0x299   : > { %1874 = vadd.xlane.f32.xlu1 %v1755_v40 }
 0x29c   : > { %1868 = vadd.xlane.f32.xlu0 %v1752_v41  ;;  %v1766_v41 = vmul.f32 %v5728_v55, %v1679_v38 }
 0x29d   : > { %1870 = vadd.xlane.f32.xlu1 %v1753_v34 }
 0x2a0   : > { %1880 = vadd.xlane.f32.xlu0 %v1758_v23 }
 0x2a1   : > { %1882 = vadd.xlane.f32.xlu1 %v1759_v13 }
 0x2a4   : > { %1876 = vadd.xlane.f32.xlu0 %v1756_v15  ;;  %v1765_v15 = vmul.f32 %v1675_v5, %v5737_v45  ;;  %v1769_v5 = vmul.f32 %v1679_v38, %v5748_v50 }
 0x2a5   : > { %1878 = vadd.xlane.f32.xlu1 %v1757_v9 }
 0x2a8   : > { %1888 = vadd.xlane.f32.xlu0 %v1762_v61  ;;  %v1770_v61 = vmul.f32 %v5740_v3, %v1679_v38 }
 0x2a9   : > { %v5781_v58 = vpop.xlane.xlu0 %1800  ;;  %1890 = vadd.xlane.f32.xlu1 %v1763_v20  ;;  %v1771_v20 = vmul.f32 %v5746_v54, %v5462_v24 }
 0x2aa   : > { %v5784_v40 = vpop.xlane.xlu1 %1796 }
 0x2ac   : > { %1884 = vadd.xlane.f32.xlu0 %v1760_v16 }
 0x2ad   : > { %v5787_v34 = vpop.xlane.xlu0 %1912  ;;  %1886 = vadd.xlane.f32.xlu1 %v1761_v19  ;;  %v1768_v19 = vmul.f32 %v1679_v38, %v5743_v53 }
 0x2ae   : > { %v5790_v23 = vpop.xlane.xlu1 %1802 }
 0x2b0   : > { %1896 = vadd.xlane.f32.xlu0 %v1766_v41 }
 0x2b1   : > { %v5793_v13 = vpop.xlane.xlu0 %1908  ;;  %1898 = vadd.xlane.f32.xlu1 %v1767_v14 }
 0x2b2   : > { %v5796_v9 = vpop.xlane.xlu1 %1914 }
 0x2b4   : > { %1892 = vadd.xlane.f32.xlu0 %v1764_v44 }
 0x2b5   : > { %v5799_v26 = vpop.xlane.xlu0 %1808  ;;  %1894 = vadd.xlane.f32.xlu1 %v1765_v15 }
 0x2b6   : > { %v1799_v16 = vpop.xlane.xlu1 %1798 }
 0x2b8   : > { %1904 = vadd.xlane.f32.xlu0 %v1770_v61 }
 0x2b9   : > { %v5804_v41 = vpop.xlane.xlu0 %1920  ;;  %1906 = vadd.xlane.f32.xlu1 %v1771_v20 }
 0x2ba   : > { %v5807_v14 = vpop.xlane.xlu1 %1910 }
 0x2bc   : > { %1900 = vadd.xlane.f32.xlu0 %v1768_v19 }
 0x2bd   : > { %v5809_v44 = vpop.xlane.xlu0 %1804  ;;  %1902 = vadd.xlane.f32.xlu1 %v1769_v5 }
 0x2be   : > { %v5811_v8 = vpop.xlane.xlu1 %1810 }
 0x2c1   : > { %v5813_v15 = vpop.xlane.xlu0 %1916 }
 0x2c2   : > { %v5815_v24 = vpop.xlane.xlu1 %1922 }
 0x2c5   : > { %v5817_v61 = vpop.xlane.xlu0 %1816 }
 0x2c6   : > { %v5819_v47 = vpop.xlane.xlu1 %1806 }
 0x2c9   : > { %v5821_v25 = vpop.xlane.xlu0 %1928 }
 0x2ca   : > { %v5823_v20 = vpop.xlane.xlu1 %1918 }
 0x2cd   : > { %v5825_v38 = vpop.xlane.xlu0 %1812 }
 0x2ce   : > { %v1819_v3 = vpop.xlane.xlu1 %1818 }
 0x2d1   : > { %v5827_v19 = vpop.xlane.xlu0 %1924 }
 0x2d2   : > { %v5831_v7 = vpop.xlane.xlu1 %1930 }
 0x2d5   : > { %v5829_v5 = vpop.xlane.xlu0 %1824 }
 0x2d6   : > { %v1815_v4 = vpop.xlane.xlu1 %1814 }
 0x2d9   : > { %v5833_v50 = vpop.xlane.xlu0 %1936 }
 0x2da   : > { %v5839_v52 = vpop.xlane.xlu1 %1926 }
 0x2dd   : > { %v5835_v45 = vpop.xlane.xlu0 %1820 }
 0x2de   : > { %v1827_v56 = vpop.xlane.xlu1 %1826 }
 0x2e1   : > { %v5837_v53 = vpop.xlane.xlu0 %1932 }
 0x2e2   : > { %v5847_v59 = vpop.xlane.xlu1 %1938 }
 0x2e5   : > { %v5841_v54 = vpop.xlane.xlu0 %1832 }
 0x2e6   : > { %v1823_v32 = vpop.xlane.xlu1 %1822 }
 0x2e9   : > { %v5843_v0 = vpop.xlane.xlu0 %1944 }
 0x2ea   : > { %7038 = vst [vmem:[#allocation114_spill] sm:$0xff] %v5843_v0  ;;  %v5855_v36 = vpop.xlane.xlu1 %1934 }
 0x2ed   : > { %v5845_v28 = vpop.xlane.xlu0 %1828 }
 0x2ee   : > { %v1835_v46 = vpop.xlane.xlu1 %1834 }
 0x2f1   : > { %v5849_v6 = vpop.xlane.xlu0 %1940 }
 0x2f2   : > { %v5863_v30 = vpop.xlane.xlu1 %1946 }
 0x2f5   : > { %v5851_v55 = vpop.xlane.xlu0 %1840 }
 0x2f6   : > { %v1831_v2 = vpop.xlane.xlu1 %1830 }
 0x2f9   : > { %v5853_v31 = vpop.xlane.xlu0 %1952 }
 0x2fa   : > { %7039 = vst [vmem:[#allocation115_spill] sm:$0xff] %v5853_v31  ;;  %v5874_v1 = vpop.xlane.xlu1 %1942 }
 0x2fd   : > { %v5857_v60 = vpop.xlane.xlu0 %1836 }
 0x2fe   : > { %v1843_v43 = vpop.xlane.xlu1 %1842 }
 0x301   : > { %v5859_v10 = vpop.xlane.xlu0 %1948 }
 0x305   : > { %v5861_v37 = vpop.xlane.xlu0 %1848 }
 0x309   : > { %v5865_v18 = vpop.xlane.xlu0 %1844 }
 0x30d   : > { %v5867_v11 = vpop.xlane.xlu0 %1856 }
 0x311   : > { %v5869_v42 = vpop.xlane.xlu0 %1852 }
 0x315   : > { %v5876_v33 = vpop.xlane.xlu0 %1532 }
 0x316   : > { %v1961_v17 = vrot.slane %v5876_v33, %v5456_v21  ;;  %v1965_v22 = vrot.slane %v5876_v33, %v5872_v63  ;;  %v5888_v48 = vrot.slane %v5876_v33, %v5879_v39  ;;  %v5896_v63 = vpop.xlane.xlu1 %1954 }
 0x318   : > { %v2038_v49 = vadd.f32 %v1961_v17, %v5784_v40  ;;  %v2039_v62 = vadd.f32 %v1961_v17, %v1799_v16  ;;  %v2047_v51 = vadd.f32 %v1965_v22, %v1815_v4  ;;  %v2040_v35 = vadd.f32 %v1961_v17, %v5781_v58 }
 0x319   : > { %v2049_v40 = vadd.f32 %v5888_v48, %v1819_v3  ;;  %v2041_v16 = vadd.f32 %v1961_v17, %v5790_v23  ;;  %v2042_v4 = vadd.f32 %v1961_v17, %v5809_v44  ;;  %v2044_v17 = vadd.f32 %v1965_v22, %v5799_v26 }
 0x31a   : > { %v2118_v57 = vmul.f32 0.125, %v2038_v49  ;;  %v2119_v27 = vmul.f32 0.125, %v2039_v62  ;;  %v2127_v0 = vmul.f32 0.125, %v2047_v51  ;;  %v2120_v31 = vmul.f32 0.125, %v2040_v35  ;;  %v1839_v35 = vpop.xlane.xlu1 %1838 }
 0x31b   : > { %v5900_v62 = vrot.slane %v5876_v33, %v5892_v29  ;;  %v2129_v49 = vmul.f32 0.125, %v2049_v40  ;;  %v2122_v3 = vmul.f32 0.125, %v2042_v4 }
 0x31c   : > { %2282 = vperm.xlu0 %4484, %v2118_v57   ;;  %2285 = vperm.xlu1 %4485, %v2119_v27   ;;  %v2121_v57 = vmul.f32 0.125, %v2041_v16  ;;  %v2051_v27 = vadd.f32 %v5888_v48, %v1823_v32  ;;  %v2124_v16 = vmul.f32 0.125, %v2044_v17  ;;  %v2050_v17 = vadd.f32 %v5888_v48, %v5835_v45 }
 0x31d   : > { %v2053_v58 = vadd.f32 %v5900_v62, %v1827_v56  ;;  %v2055_v32 = vadd.f32 %v5900_v62, %v1831_v2  ;;  %v5920_v2 = vsub.s32 5, %v5430_v12 }
 0x31e   : > { %v2131_v51 = vmul.f32 0.125, %v2051_v27  ;;  %v5911_v44 = vpop.xlane.xlu1 %1950 }
 0x31f   : > { %v2133_v23 = vmul.f32 0.125, %v2053_v58  ;;  %7044 = vst [vmem:[#allocation120_spill] sm:$0xff] %v5920_v2  ;;  %v5926_v58 = vrot.slane %v5876_v33, %v5920_v2 }
 0x320   : > { %2309 = vperm.xlu0 %4484, %v2127_v0   ;;  %2288 = vperm.xlu1 %4485, %v2120_v31   ;;  %v2043_v0 = vadd.f32 %v1965_v22, %v5819_v47  ;;  %v5907_v31 = vsub.s32 4, %v5430_v12  ;;  %v2135_v47 = vmul.f32 0.125, %v2055_v32 }
 0x321   : > { %v2064_v32 = vadd.f32 %v5926_v58, %v5861_v37 }
 0x322   : > { %7043 = vst [vmem:[#allocation119_spill] sm:$0xff] %v5907_v31  ;;  %v2123_v40 = vmul.f32 0.125, %v2043_v0  ;;  %v5915_v56 = vrot.slane %v5876_v33, %v5907_v31  ;;  %v1851_v26 = vpop.xlane.xlu1 %1850 }
 0x324   : > { %2315 = vperm.xlu0 %4484, %v2129_v49   ;;  %2291 = vperm.xlu1 %4485, %v2121_v57   ;;  %v2057_v49 = vadd.f32 %v5900_v62, %v1835_v46  ;;  %v2045_v57 = vadd.f32 %v1965_v22, %v5811_v8  ;;  %v2061_v0 = vadd.f32 %v5915_v56, %v1843_v43 }
 0x326   : > { %v2137_v27 = vmul.f32 0.125, %v2057_v49  ;;  %v2125_v4 = vmul.f32 0.125, %v2045_v57  ;;  %v2065_v49 = vadd.f32 %v5926_v58, %v1851_v26  ;;  %v2052_v57 = vadd.f32 %v5888_v48, %v5829_v5 }
 0x327   : > { %v2056_v5 = vadd.f32 %v5900_v62, %v5841_v54  ;;  %v2060_v54 = vadd.f32 %v5915_v56, %v5851_v55 }
 0x328   : > { %2321 = vperm.xlu0 %4484, %v2131_v51   ;;  %2294 = vperm.xlu1 %4485, %v2122_v3   ;;  %v2059_v51 = vadd.f32 %v5915_v56, %v1839_v35  ;;  %v2046_v3 = vadd.f32 %v1965_v22, %v5825_v38  ;;  %v5932_v35 = vsub.s32 6, %v5430_v12  ;;  %v2141_v22 = vmul.f32 0.125, %v2061_v0 }
 0x329   : > { %v2132_v45 = vmul.f32 0.125, %v2052_v57 }
 0x32a   : > { %v2139_v46 = vmul.f32 0.125, %v2059_v51  ;;  %v2126_v8 = vmul.f32 0.125, %v2046_v3  ;;  %7045 = vst [vmem:[#allocation121_spill] sm:$0xff] %v5932_v35  ;;  %v5940_v43 = vrot.slane %v5876_v33, %v5932_v35  ;;  %v5948_v51 = vpop.xlane.xlu0 %1534 }
 0x32b   : > { %v5952_v26 = vrot.slane %v5948_v51, %v5892_v29 }
 0x32c   : > { %2327 = vperm.xlu0 %4484, %v2133_v23   ;;  %2297 = vperm.xlu1 %4485, %v2123_v40   ;;  %v2048_v23 = vadd.f32 %v5888_v48, %v5817_v61  ;;  %v1847_v40 = vpop.xlane.xlu1 %1846  ;;  %v2066_v48 = vadd.f32 %v5926_v58, %v5869_v42 }
 0x32d   : > { %v2094_v0 = vadd.f32 %v5952_v26, %v5793_v13  ;;  %v2096_v55 = vadd.f32 %v5952_v26, %v5787_v34  ;;  %v2063_v57 = vadd.f32 %v5926_v58, %v1847_v40 }
 0x32e   : > { %v2128_v38 = vmul.f32 0.125, %v2048_v23  ;;  %v2058_v23 = vadd.f32 %v5915_v56, %v5857_v60 }
 0x330   : > { %2333 = vperm.xlu0 %4484, %v2135_v47   ;;  %2300 = vperm.xlu1 %4485, %v2124_v16   ;;  %v1859_v61 = vpop.xlane.xlu1 %1858  ;;  %v2144_v47 = vmul.f32 0.125, %v2064_v32  ;;  %v2130_v16 = vmul.f32 0.125, %v2050_v17  ;;  %v2138_v42 = vmul.f32 0.125, %v2058_v23  ;;  %v2140_v17 = vmul.f32 0.125, %v2060_v54 }
 0x331   : > { %v2069_v37 = vadd.f32 %v5940_v43, %v1859_v61  ;;  %v2062_v61 = vadd.f32 %v5915_v56, %v5865_v18  ;;  %v2143_v18 = vmul.f32 0.125, %v2063_v57  ;;  %v6008_v54 = vsub.s32 7, %v5430_v12 }
 0x333   : > { %v2149_v3 = vmul.f32 0.125, %v2069_v37  ;;  %v5978_v37 = vrot.slane %v5948_v51, %v5920_v2  ;;  %7046 = vst [vmem:[#allocation122_spill] sm:$0xff] %v6008_v54 }
 0x334   : > { %2339 = vperm.xlu0 %4484, %v2137_v27   ;;  %2303 = vperm.xlu1 %4485, %v2125_v4   ;;  %v2145_v27 = vmul.f32 0.125, %v2065_v49  ;;  %v2054_v4 = vadd.f32 %v5900_v62, %v5845_v28  ;;  %v2136_v28 = vmul.f32 0.125, %v2056_v5  ;;  %v2009_v62 = vrot.slane %v5948_v51, %v5907_v31  ;;  %v1855_v32 = vpop.xlane.xlu1 %1854 }
 0x335   : > { %v2142_v49 = vmul.f32 0.125, %v2062_v61  ;;  %v2103_v56 = vadd.f32 %v5978_v37, %v5839_v52  ;;  %v2067_v40 = vadd.f32 %v5926_v58, %v1855_v32  ;;  %v7058_v31 = vlaneseq }
 0x336   : > { %v2099_v60 = vadd.f32 %v2009_v62, %v5823_v20  ;;  %v2176_v20 = vmul.f32 0.125, %v2096_v55  ;;  %v2102_v23 = vadd.f32 %v2009_v62, %v5827_v19  ;;  %v6015_v19 = vrot.slane %v5948_v51, %v6008_v54 }
 0x337   : > { %v2147_v5 = vmul.f32 0.125, %v2067_v40  ;;  %v6197_v29 = vand.u32 127, %v7058_v31 }
 0x338   : > { %2345 = vperm.xlu0 %4484, %v2139_v46   ;;  %2306 = vperm.xlu1 %4485, %v2126_v8   ;;  %v2134_v46 = vmul.f32 0.125, %v2054_v4  ;;  %v2146_v8 = vmul.f32 0.125, %v2066_v48  ;;  %v2183_v4 = vmul.f32 0.125, %v2103_v56  ;;  %v5992_v48 = vrot.slane %v5948_v51, %v5932_v35 }
 0x339   : > { %v2182_v32 = vmul.f32 0.125, %v2102_v23  ;;  %v2114_v55 = vadd.f32 %v6015_v19, %v5859_v10  ;;  %v2105_v56 = vadd.f32 %v5978_v37, %v5831_v7  ;;  %7059 = vst [vmem:[#allocation129_spill] sm:$0xff] %v6197_v29  ;;  %v2539_v31 = vadd.s32 4294967272, %v6197_v29 }
 0x33a   : > { %v2108_v58 = vadd.f32 %v5992_v48, %v5833_v50  ;;  %v2110_v50 = vadd.f32 %v5992_v48, %v5849_v6  ;;  %v2104_v6 = vadd.f32 %v5978_v37, %v5821_v25  ;;  %v2115_v25 = vadd.f32 %v6015_v19, %v5911_v44 }
 0x33b   : > { %v2109_v44 = vadd.f32 %v5992_v48, %v5847_v59  ;;  %v2106_v59 = vadd.f32 %v5978_v37, %v5837_v53  ;;  %v2111_v53 = vadd.f32 %v5992_v48, %v5874_v1 }
 0x33c   : > { %2351 = vperm.xlu0 %4484, %v2141_v22   ;;  %2312 = vperm.xlu1 %4485, %v2128_v38   ;;  %v2095_v22 = vadd.f32 %v5952_v26, %v5807_v14  ;;  %v2174_v38 = vmul.f32 0.125, %v2094_v0  ;;  %v1865_v14 = vpop.xlane.xlu0 %1864  ;;  %v2188_v0 = vmul.f32 0.125, %v2108_v58  ;;  %v2190_v61 = vmul.f32 0.125, %v2110_v50 }
 0x33d   : > { %v2113_v50 = vadd.f32 %v6015_v19, %v5863_v30 }
 0x33e   : > { %v2175_v13 = vmul.f32 0.125, %v2095_v22  ;;  %v2098_v22 = vadd.f32 %v2009_v62, %v5813_v15 }
 0x340   : > { %2360 = vperm.xlu0 %4484, %v2144_v47   ;;  %2318 = vperm.xlu1 %4485, %v2130_v16   ;;  %v5971_v47 = vpop.xlane.xlu1 %1866  ;;  %v2179_v16 = vmul.f32 0.125, %v2099_v60 }
 0x344   : > { %2363 = vperm.xlu0 %4484, %v2145_v27   ;;  %2324 = vperm.xlu1 %4485, %v2132_v45   ;;  %v2068_v27 = vadd.f32 %v5940_v43, %v5867_v11  ;;  %v5984_v45 = vpop.xlane.xlu0 %1860  ;;  %v5986_v34 = vpop.xlane.xlu1 %1862 }
 0x348   : > { %2375 = vperm.xlu0 %4484, %v2149_v3   ;;  %2330 = vperm.xlu1 %4485, %v2134_v46   ;;  %v2148_v3 = vmul.f32 0.125, %v2068_v27  ;;  %v2101_v46 = vadd.f32 %v2009_v62, %v5815_v24  ;;  %v5994_v52 = vpop.xlane.xlu0 %1872  ;;  %v5996_v11 = vpop.xlane.xlu1 %1874  ;;  %v6033_v27 = vrot.slane %v5876_v33, %v6008_v54  ;;  %v2070_v33 = vadd.f32 %v5940_v43, %v5984_v45 }
 0x34a   : > { %v2073_v40 = vadd.f32 %v6033_v27, %v5971_v47  ;;  %v2150_v47 = vmul.f32 0.125, %v2070_v33 }
 0x34c   : > { %2366 = vperm.xlu0 %4484, %v2146_v8   ;;  %2336 = vperm.xlu1 %4485, %v2136_v28   ;;  %v2072_v8 = vadd.f32 %v5940_v43, %v1865_v14  ;;  %v2181_v28 = vmul.f32 0.125, %v2101_v46  ;;  %v2153_v7 = vmul.f32 0.125, %v2073_v40  ;;  %v2071_v46 = vadd.f32 %v5940_v43, %v5986_v34 }
 0x34e   : > { %v2152_v24 = vmul.f32 0.125, %v2072_v8  ;;  %v2151_v58 = vmul.f32 0.125, %v2071_v46 }
 0x350   : > { %2450 = vperm.xlu0 %4484, %v2174_v38   ;;  %2342 = vperm.xlu1 %4485, %v2138_v42   ;;  %v6003_v38 = vpop.xlane.xlu0 %1868  ;;  %v6005_v42 = vpop.xlane.xlu1 %1870 }
 0x351   : > { %v2075_v1 = vadd.f32 %v6033_v27, %v6005_v42 }
 0x354   : > { %2453 = vperm.xlu0 %4484, %v2175_v13   ;;  %2348 = vperm.xlu1 %4485, %v2140_v17   ;;  %v2178_v13 = vmul.f32 0.125, %v2098_v22  ;;  %v2100_v17 = vadd.f32 %v2009_v62, %v5804_v41  ;;  %v1881_v15 = vpop.xlane.xlu0 %1880  ;;  %v1883_v60 = vpop.xlane.xlu1 %1882  ;;  %v2184_v41 = vmul.f32 0.125, %v2104_v6  ;;  %v2107_v62 = vadd.f32 %v5978_v37, %v5855_v36  ;;  %v7047_v6 = vld [vmem:[#allocation116_spill] sm:$0xff] }
 0x355   : > { %v2186_v22 = vmul.f32 0.125, %v2106_v59  ;;  %v1997_v30 = vrot.slane %v5948_v51, %v7047_v6  ;;  %v7048_v59 = vld [vmem:[#allocation115_spill] sm:$0xff]  ;;  %v2525_v6 = vadd.s32 4294967288, %v6197_v29 }
 0x356   : > { %v2180_v14 = vmul.f32 0.125, %v2100_v17 }
 0x358   : > { %2465 = vperm.xlu0 %4484, %v2179_v16   ;;  %2354 = vperm.xlu1 %4485, %v2142_v49   ;;  %v2194_v16 = vmul.f32 0.125, %v2114_v55  ;;  %v2097_v49 = vadd.f32 %v5952_v26, %v5796_v9  ;;  %v1877_v57 = vpop.xlane.xlu0 %1876  ;;  %v2191_v55 = vmul.f32 0.125, %v2111_v53 }
 0x35a   : > { %v2177_v10 = vmul.f32 0.125, %v2097_v49 }
 0x35c   : > { %2456 = vperm.xlu0 %4484, %v2176_v20   ;;  %2357 = vperm.xlu1 %4485, %v2143_v18   ;;  %v6025_v20 = vpop.xlane.xlu1 %1878  ;;  %v2187_v18 = vmul.f32 0.125, %v2107_v62  ;;  %v6035_v36 = vpop.xlane.xlu0 %1888 }
 0x360   : > { %2477 = vperm.xlu0 %4484, %v2183_v4   ;;  %2372 = vperm.xlu1 %4485, %v2148_v3   ;;  %v6037_v9 = vpop.xlane.xlu1 %1890  ;;  %v2195_v4 = vmul.f32 0.125, %v2115_v25  ;;  %v2185_v3 = vmul.f32 0.125, %v2105_v56  ;;  %v1885_v8 = vpop.xlane.xlu0 %1884 }
 0x364   : > { %2471 = vperm.xlu0 %4484, %v2181_v28   ;;  %2369 = vperm.xlu1 %4485, %v2147_v5   ;;  %v2189_v5 = vmul.f32 0.125, %v2109_v44  ;;  %v1887_v28 = vpop.xlane.xlu1 %1886  ;;  %v1897_v45 = vpop.xlane.xlu0 %1896 }
 0x368   : > { %2492 = vperm.xlu0 %4484, %v2188_v0   ;;  %2384 = vperm.xlu1 %4485, %v2152_v24   ;;  %v2076_v24 = vadd.f32 %v6033_v27, %v5994_v52  ;;  %v1993_v0 = vrot.slane %v5948_v51, %v5456_v21  ;;  %v6053_v43 = vpop.xlane.xlu1 %1898  ;;  %v1893_v37 = vpop.xlane.xlu0 %1892 }
 0x36a   : > { %v2156_v34 = vmul.f32 0.125, %v2076_v24  ;;  %v2080_v23 = vadd.f32 %v1993_v0, %v1881_v15  ;;  %v2081_v15 = vadd.f32 %v1993_v0, %v1883_v60  ;;  %v2079_v60 = vadd.f32 %v1993_v0, %v6025_v20 }
 0x36b   : > { %v2082_v46 = vadd.f32 %v1993_v0, %v1885_v8 }
 0x36c   : > { %2474 = vperm.xlu0 %4484, %v2182_v32   ;;  %2462 = vperm.xlu1 %4485, %v2178_v13   ;;  %v2160_v52 = vmul.f32 0.125, %v2080_v23  ;;  %v2078_v32 = vadd.f32 %v1993_v0, %v1877_v57  ;;  %v2193_v13 = vmul.f32 0.125, %v2113_v50  ;;  %v1895_v17 = vpop.xlane.xlu1 %1894  ;;  %v2161_v49 = vmul.f32 0.125, %v2081_v15 }
 0x36d   : > { %v2083_v57 = vadd.f32 %v1997_v30, %v1887_v28  ;;  %v2087_v44 = vadd.f32 %v1997_v30, %v1895_v17  ;;  %v2086_v0 = vadd.f32 %v1997_v30, %v1893_v37  ;;  %v2117_v50 = vadd.f32 %v6015_v19, %v5896_v63 }
 0x36f   : > { %v2167_v20 = vmul.f32 0.125, %v2087_v44  ;;  %v2197_v53 = vmul.f32 0.125, %v2117_v50 }
 0x370   : > { %2498 = vperm.xlu0 %4484, %v2190_v61   ;;  %2468 = vperm.xlu1 %4485, %v2180_v14   ;;  %v2074_v61 = vadd.f32 %v6033_v27, %v6003_v38  ;;  %v2158_v14 = vmul.f32 0.125, %v2078_v32  ;;  %v2155_v38 = vmul.f32 0.125, %v2075_v1 }
 0x372   : > { %v2154_v62 = vmul.f32 0.125, %v2074_v61 }
 0x374   : > { %2510 = vperm.xlu0 %4484, %v2194_v16   ;;  %2480 = vperm.xlu1 %4485, %v2184_v41   ;;  %v1905_v16 = vpop.xlane.xlu0 %1904  ;;  %v1907_v41 = vpop.xlane.xlu1 %1906 }
 0x378   : > { %2489 = vperm.xlu0 %4484, %v2187_v18   ;;  %2459 = vperm.xlu1 %4485, %v2177_v10   ;;  %v2001_v18 = vrot.slane %v5948_v51, %v5879_v39  ;;  %v2163_v10 = vmul.f32 0.125, %v2083_v57  ;;  %v1901_v56 = vpop.xlane.xlu0 %1900  ;;  %v1903_v40 = vpop.xlane.xlu1 %1902 }
 0x37a   : > { %v2088_v25 = vadd.f32 %v2001_v18, %v1897_v45  ;;  %v2116_v45 = vadd.f32 %v6015_v19, %v7048_v59  ;;  %v2089_v32 = vadd.f32 %v2001_v18, %v6053_v43  ;;  %v2092_v15 = vadd.f32 %v2001_v18, %v1905_v16 }
 0x37b   : > { %v2091_v1 = vadd.f32 %v2001_v18, %v1903_v40 }
 0x37c   : > { %2513 = vperm.xlu0 %4484, %v2195_v4   ;;  %2483 = vperm.xlu1 %4485, %v2185_v3   ;;  %v2159_v4 = vmul.f32 0.125, %v2079_v60  ;;  %v2084_v3 = vadd.f32 %v1997_v30, %v6035_v36  ;;  %v2168_v42 = vmul.f32 0.125, %v2088_v25  ;;  %v2085_v36 = vadd.f32 %v1997_v30, %v6037_v9 }
 0x37d   : > { %v2169_v37 = vmul.f32 0.125, %v2089_v32  ;;  %v2172_v19 = vmul.f32 0.125, %v2092_v15  ;;  %v2171_v16 = vmul.f32 0.125, %v2091_v1 }
 0x37e   : > { %v2164_v51 = vmul.f32 0.125, %v2084_v3  ;;  %v2165_v8 = vmul.f32 0.125, %v2085_v36 }
 0x380   : > { %2387 = vperm.xlu0 %4484, %v2153_v7   ;;  %2495 = vperm.xlu1 %4485, %v2189_v5   ;;  %v2090_v5 = vadd.f32 %v2001_v18, %v1901_v56 }
 0x382   : > { %v2170_v24 = vmul.f32 0.125, %v2090_v5 }
 0x384   : > { %2381 = vperm.xlu0 %4484, %v2151_v58   ;;  %2378 = vperm.xlu1 %4485, %v2150_v47   ;;  %v2162_v58 = vmul.f32 0.125, %v2082_v46 }
 0x388   : > { %2396 = vperm.xlu0 %4484, %v2156_v34   ;;  %2486 = vperm.xlu1 %4485, %v2186_v22   ;;  %v2196_v22 = vmul.f32 0.125, %v2116_v45 }
 0x38c   : > { %2408 = vperm.xlu0 %4484, %v2160_v52   ;;  %2507 = vperm.xlu1 %4485, %v2193_v13   ;;  %v2166_v13 = vmul.f32 0.125, %v2086_v0 }
 0x390   : > { %2402 = vperm.xlu0 %4484, %v2158_v14   ;;  %2501 = vperm.xlu1 %4485, %v2191_v55   ;;  %v2093_v55 = vadd.f32 %v5952_v26, %v1907_v41  ;;  %v2077_v26 = vadd.f32 %v6033_v27, %v5996_v11 }
 0x392   : > { %v2157_v40 = vmul.f32 0.125, %v2077_v26 }
 0x394   : > { %2411 = vperm.xlu0 %4484, %v2161_v49   ;;  %2390 = vperm.xlu1 %4485, %v2154_v62   ;;  %v2173_v62 = vmul.f32 0.125, %v2093_v55 }
 0x398   : > { %2417 = vperm.xlu0 %4484, %v2163_v10   ;;  %2393 = vperm.xlu1 %4485, %v2155_v38   ;;  %v7049_v38 = vld [vmem:[#allocation114_spill] sm:$0xff] }
 0x399   : > { %v2112_v60 = vadd.f32 %v5992_v48, %v7049_v38 }
 0x39b   : > { %v6069_v7 = vpop.permute.xlu0 %2282  ;;  %v6071_v33 = vpop.permute.xlu1 %2285  ;;  %v2192_v41 = vmul.f32 0.125, %v2112_v60 }
 0x39c   : > { %2432 = vperm.xlu0 %4484, %v2168_v42   ;;  %2405 = vperm.xlu1 %4485, %v2159_v4  }
 0x39f   : > { %v6073_v28 = vpop.permute.xlu0 %2309  ;;  %v6075_v47 = vpop.permute.xlu1 %2288 }
 0x3a0   : > { %2429 = vperm.xlu0 %4484, %v2167_v20   ;;  %2420 = vperm.xlu1 %4485, %v2164_v51  }
 0x3a3   : > { %v6080_v34 = vpop.permute.xlu0 %2315  ;;  %v6082_v23 = vpop.permute.xlu1 %2291 }
 0x3a4   : > { %2438 = vperm.xlu0 %4484, %v2170_v24   ;;  %2414 = vperm.xlu1 %4485, %v2162_v58  }
 0x3a7   : > { %v6086_v52 = vpop.permute.xlu0 %2321  ;;  %v6088_v9 = vpop.permute.xlu1 %2294 }
 0x3a8   : > { %2516 = vperm.xlu0 %4484, %v2196_v22   ;;  %2423 = vperm.xlu1 %4485, %v2165_v8  }
 0x3ab   : > { %v6091_v17 = vpop.permute.xlu0 %2327  ;;  %v6093_v61 = vpop.permute.xlu1 %2297 }
 0x3ac   : > { %2519 = vperm.xlu0 %4484, %v2197_v53   ;;  %2426 = vperm.xlu1 %4485, %v2166_v13  }
 0x3af   : > { %v6095_v14 = vpop.permute.xlu0 %2333  ;;  %v6097_v63 = vpop.permute.xlu1 %2300 }
 0x3b0   : > { %2435 = vperm.xlu1 %4485, %v2169_v37  }
 0x3b3   : > { %v6100_v30 = vpop.permute.xlu0 %2339  ;;  %v6102_v43 = vpop.permute.xlu1 %2303 }
 0x3b4   : > { %2444 = vperm.xlu1 %4485, %v2172_v19  }
 0x3b7   : > { %v6104_v49 = vpop.permute.xlu0 %2345  ;;  %v6106_v57 = vpop.permute.xlu1 %2306 }
 0x3b8   : > { %2447 = vperm.xlu1 %4485, %v2173_v62  }
 0x3bb   : > { %v6110_v10 = vpop.permute.xlu0 %2351  ;;  %v6112_v25 = vpop.permute.xlu1 %2312 }
 0x3bc   : > { %2441 = vperm.xlu1 %4485, %v2171_v16  }
 0x3bf   : > { %v6116_v56 = vpop.permute.xlu0 %2360  ;;  %v6118_v18 = vpop.permute.xlu1 %2318 }
 0x3c0   : > { %2504 = vperm.xlu1 %4485, %v2192_v41  }
 0x3c3   : > { %v6120_v4 = vpop.permute.xlu0 %2363  ;;  %v6122_v3 = vpop.permute.xlu1 %2324 }
 0x3c4   : > { %2399 = vperm.xlu1 %4485, %v2157_v40  }
 0x3c7   : > { %v6124_v48 = vpop.permute.xlu0 %2375  ;;  %v6126_v42 = vpop.permute.xlu1 %2330 }
 0x3cb   : > { %v6128_v44 = vpop.permute.xlu0 %2366  ;;  %v6130_v51 = vpop.permute.xlu1 %2336 }
 0x3cf   : > { %v6132_v11 = vpop.permute.xlu0 %2450  ;;  %v6134_v27 = vpop.permute.xlu1 %2342 }
 0x3d3   : > { %v6136_v46 = vpop.permute.xlu0 %2453  ;;  %v6138_v20 = vpop.permute.xlu1 %2348 }
 0x3d7   : > { %v6140_v5 = vpop.permute.xlu0 %2465  ;;  %v6142_v36 = vpop.permute.xlu1 %2354 }
 0x3db   : > { %v6144_v58 = vpop.permute.xlu0 %2456  ;;  %v6146_v24 = vpop.permute.xlu1 %2357 }
 0x3df   : > { %v6148_v59 = vpop.permute.xlu0 %2477  ;;  %v6150_v45 = vpop.permute.xlu1 %2372 }
 0x3e3   : > { %v6152_v8 = vpop.permute.xlu0 %2471  ;;  %v6154_v0 = vpop.permute.xlu1 %2369 }
 0x3e7   : > { %v6156_v22 = vpop.permute.xlu0 %2492  ;;  %v6158_v50 = vpop.permute.xlu1 %2384 }
 0x3eb   : > { %v6160_v32 = vpop.permute.xlu0 %2474  ;;  %v6162_v13 = vpop.permute.xlu1 %2462 }
 0x3ef   : > { %v6164_v53 = vpop.permute.xlu0 %2498  ;;  %v6166_v37 = vpop.permute.xlu1 %2468 }
 0x3f3   : > { %v6168_v15 = vpop.permute.xlu0 %2510  ;;  %v6170_v19 = vpop.permute.xlu1 %2480 }
 0x3f7   : > { %v6172_v55 = vpop.permute.xlu0 %2489  ;;  %v6174_v62 = vpop.permute.xlu1 %2459 }
 0x3f8   : > { %7050 = vst [vmem:[#allocation115_spill] sm:$0xff] %v6174_v62 }
 0x3fb   : > { %v6176_v1 = vpop.permute.xlu0 %2513  ;;  %v6178_v16 = vpop.permute.xlu1 %2483 }
 0x3fc   : > { %7051 = vst [vmem:[#allocation114_spill] sm:$0xff] %v6176_v1  ;;  %v2532_v1 = vadd.s32 4294967280, %v6197_v29 }
 0x3ff   : > { %v6180_v38 = vpop.permute.xlu0 %2387  ;;  %v6182_v60 = vpop.permute.xlu1 %2495 }
 0x400   : > { %7052 = vst [vmem:[#allocation123_spill] sm:$0xff] %v6180_v38 }
 0x403   : > { %v6184_v26 = vpop.permute.xlu0 %2381  ;;  %v6186_v41 = vpop.permute.xlu1 %2378 }
 0x404   : > { %7053 = vst [vmem:[#allocation124_spill] sm:$0xff] %v6184_v26 }
 0x407   : > { %v6188_v40 = vpop.permute.xlu0 %2396  ;;  %v6190_v54 = vpop.permute.xlu1 %2486 }
 0x408   : > { %7054 = vst [vmem:[#allocation125_spill] sm:$0xff] %v6188_v40  ;;  %7055 = vst [vmem:[#allocation126_spill] sm:$0xff] %v6190_v54  ;;  %v6209_v40 = vsub.s32 %v6197_v29, %v5430_v12 }
 0x40a   : > { %v2524_v26 = vrot.slane %v6069_v7, %v6209_v40 }
 0x40b   : > { %v6192_v35 = vpop.permute.xlu1 %2507  ;;  %v6194_v2 = vpop.permute.xlu0 %2408 }
 0x40c   : > { %7056 = vst [vmem:[#allocation127_spill] sm:$0xff] %v6192_v35  ;;  %7057 = vst [vmem:[#allocation128_spill] sm:$0xff] %v6194_v2  ;;  %v6212_v35 = vsub.s32 %v2525_v6, %v5430_v12  ;;  %v6228_v6 = vsub.s32 %v2539_v31, %v5430_v12 }
 0x40e   : > { %v2560_v7 = vrot.slane %v6097_v63, %v6212_v35 }
 0x40f   : > { %v6199_v39 = vpop.permute.xlu1 %2501  ;;  %v6202_v21 = vpop.permute.xlu0 %2402 }
 0x410   : > { %7060 = vst [vmem:[#allocation130_spill] sm:$0xff] %v6199_v39  ;;  %7061 = vst [vmem:[#allocation131_spill] sm:$0xff] %v6202_v21  ;;  %v6218_v39 = vsub.s32 %v2532_v1, %v5430_v12  ;;  %v2529_v21 = vrot.slane %v6071_v33, %v6212_v35  ;;  %v2543_v33 = vrot.slane %v6082_v23, %v6228_v6 }
 0x411   : > { %v2608_v23 = vrot.slane %v6126_v42, %v6212_v35 }
 0x412   : > { %v2536_v1 = vrot.slane %v6075_v47, %v6218_v39  ;;  %v2565_v31 = vrot.slane %v6102_v43, %v6218_v39  ;;  %v2589_v43 = vrot.slane %v6118_v18, %v6218_v39 }
 0x413   : > { %v6204_v38 = vpop.permute.xlu1 %2390  ;;  %v6220_v2 = vpop.permute.xlu0 %2411 }
 0x414   : > { %7062 = vst [vmem:[#allocation132_spill] sm:$0xff] %v6204_v38  ;;  %7064 = vst [vmem:[#allocation134_spill] sm:$0xff] %v6220_v2  ;;  %v2546_v38 = vadd.s32 4294967264, %v6197_v29  ;;  %v2531_v29 = vsel %vm2530_vm3, %v2529_v21, %v2524_v26  ;;  %v2580_v21 = vrot.slane %v6112_v25, %v6209_v40  ;;  %v2584_v26 = vrot.slane %v6080_v34, %v6212_v35 }
 0x415   : > { %v2538_v63 = vsel %vm2537_vm4, %v2536_v1, %v2531_v29 }
 0x416   : > { %v2545_v29 = vsel %vm2544_vm5, %v2543_v33, %v2538_v63 }
 0x417   : > { %v6215_v54 = vpop.permute.xlu1 %2393  ;;  %v6244_v2 = vpop.permute.xlu0 %2417 }
 0x418   : > { %7063 = vst [vmem:[#allocation133_spill] sm:$0xff] %v6215_v54  ;;  %v6235_v54 = vsub.s32 %v2546_v38, %v5430_v12  ;;  %7065 = vst [vmem:[#allocation135_spill] sm:$0xff] %v6244_v2  ;;  %v2556_v12 = vrot.slane %v6093_v61, %v6209_v40  ;;  %v2570_v38 = vrot.slane %v6106_v57, %v6228_v6 }
 0x419   : > { %v2604_v57 = vrot.slane %v6091_v17, %v6209_v40  ;;  %v2585_v2 = vsel %vm2530_vm3, %v2584_v26, %v2580_v21  ;;  %v2618_v17 = vrot.slane %v6130_v51, %v6228_v6  ;;  %v2632_v21 = vrot.slane %v6104_v49, %v6212_v35 }
 0x41a   : > { %v2550_v61 = vrot.slane %v6088_v9, %v6235_v54  ;;  %v2561_v25 = vsel %vm2530_vm3, %v2560_v7, %v2556_v12  ;;  %v2575_v42 = vrot.slane %v6073_v28, %v6235_v54  ;;  %v2594_v7 = vrot.slane %v6086_v52, %v6228_v6 }
 0x41b   : > { %v6230_v62 = vpop.permute.xlu1 %2405  ;;  %v2566_v18 = vsel %vm2537_vm4, %v2565_v31, %v2561_v25  ;;  %v2609_v9 = vsel %vm2530_vm3, %v2608_v23, %v2604_v57  ;;  %v2613_v28 = vrot.slane %v6095_v14, %v6218_v39  ;;  %v2590_v33 = vsel %vm2537_vm4, %v2589_v43, %v2585_v2  ;;  %v6284_v12 = vpop.permute.xlu0 %2432 }
 0x41c   : > { %v2571_v34 = vsel %vm2544_vm5, %v2570_v38, %v2566_v18  ;;  %v2599_v31 = vrot.slane %v6122_v3, %v6235_v54  ;;  %v2552_v38 = vsel %vm2551_vm6, %v2550_v61, %v2545_v29  ;;  %v2628_v51 = vrot.slane %v6134_v27, %v6209_v40 }
 0x41d   : > { %v2652_v52 = vrot.slane %v6146_v24, %v6209_v40  ;;  %v2576_v14 = vsel %vm2551_vm6, %v2575_v42, %v2571_v34  ;;  %v2614_v2 = vsel %vm2537_vm4, %v2613_v28, %v2609_v9  ;;  %v2637_v3 = vrot.slane %v6138_v20, %v6218_v39 }
 0x41e   : > { %v2820_v23 = vrot.slane %v6162_v13, %v6209_v40  ;;  %v2656_v49 = vrot.slane %v6116_v56, %v6212_v35  ;;  %v2595_v27 = vsel %vm2544_vm5, %v2594_v7, %v2590_v33  ;;  %v2619_v43 = vsel %vm2544_vm5, %v2618_v17, %v2614_v2 }
 0x41f   : > { %v6246_v47 = vpop.permute.xlu1 %2420  ;;  %v2829_v24 = vrot.slane %v6166_v37, %v6218_v39  ;;  %v2623_v26 = vrot.slane %v6100_v30, %v6235_v54  ;;  %v2642_v20 = vrot.slane %v6110_v10, %v6228_v6  ;;  %v2600_v13 = vsel %vm2551_vm6, %v2599_v31, %v2595_v27  ;;  %v6324_v18 = vpop.permute.xlu0 %2429 }
 0x420   : > { %v2824_v61 = vrot.slane %v6140_v5, %v6212_v35  ;;  %v2661_v56 = vrot.slane %v6120_v4, %v6218_v39  ;;  %v2914_v57 = vsel %vm2913_vm7, %v2576_v14, %v2552_v38  ;;  %v2633_v25 = vsel %vm2530_vm3, %v2632_v21, %v2628_v51 }
 0x421   : > { %v2657_v37 = vsel %vm2530_vm3, %v2656_v49, %v2652_v52  ;;  %v2624_v42 = vsel %vm2551_vm6, %v2623_v26, %v2619_v43  ;;  %v2638_v30 = vsel %vm2537_vm4, %v2637_v3, %v2633_v25  ;;  %v2647_v10 = vrot.slane %v6142_v36, %v6235_v54 }
 0x422   : > { %v2825_v29 = vsel %vm2530_vm3, %v2824_v61, %v2820_v23  ;;  %v2916_v4 = vsel %vm2915_vm8, %v2600_v13, %v2914_v57  ;;  %v2680_v34 = vrot.slane %v6124_v48, %v6212_v35  ;;  %v2676_v9 = vrot.slane %v6150_v45, %v6209_v40 }
 0x423   : > { %v6270_v1 = vpop.permute.xlu1 %2414  ;;  %v2830_v17 = vsel %vm2537_vm4, %v2829_v24, %v2825_v29  ;;  %v2666_v7 = vrot.slane %v6128_v44, %v6228_v6  ;;  %v2662_v36 = vsel %vm2537_vm4, %v2661_v56, %v2657_v37  ;;  %v2834_v28 = vrot.slane %v6152_v8, %v6228_v6 }
 0x424   : > { %v2671_v33 = vrot.slane %v6154_v0, %v6235_v54  ;;  %v2800_v31 = vrot.slane %v6132_v11, %v6212_v35  ;;  %v2805_v48 = vrot.slane %v6136_v46, %v6218_v39  ;;  %v2643_v45 = vsel %vm2544_vm5, %v2642_v20, %v2638_v30  ;;  %v7070_v30 = vld [vmem:[#allocation114_spill] sm:$0xff] }
 0x425   : > { %v6347_v38 = vsel %vm2917_vm9, %v2624_v42, %v2916_v4  ;;  %v6350_v44 = vsel %vm2551_vm6, %v2647_v10, %v2643_v45  ;;  %v2810_v8 = vrot.slane %v6144_v58, %v6228_v6  ;;  %v2835_v21 = vsel %vm2544_vm5, %v2834_v28, %v2830_v17 }
 0x426   : > { %v2848_v0 = vrot.slane %v6170_v19, %v6212_v35  ;;  %v2844_v51 = vrot.slane %v6148_v59, %v6209_v40  ;;  %v2681_v52 = vsel %vm2530_vm3, %v2680_v34, %v2676_v9  ;;  %v2667_v14 = vsel %vm2544_vm5, %v2666_v7, %v2662_v36  ;;  %v2439_v59 = vpop.permute.xlu0 %2438  ;;  %v7071_v9 = vld [vmem:[#allocation123_spill] sm:$0xff]  ;;  %v7072_v7 = vld [vmem:[#allocation128_spill] sm:$0xff] }
 0x427   : > { %v6299_v63 = vpop.permute.xlu1 %2423  ;;  %v2839_v2 = vrot.slane %v6160_v32, %v6235_v54  ;;  %v6364_v3 = vsel %vm2551_vm6, %v2671_v33, %v2667_v14  ;;  %v2868_v23 = vrot.slane %v6156_v22, %v6209_v40  ;;  %v2695_v19 = vrot.slane %v6158_v50, %v6235_v54 }
 0x428   : > { %v2872_v49 = vrot.slane %v6182_v60, %v6212_v35  ;;  %v2877_v27 = vrot.slane %v6164_v53, %v6218_v39  ;;  %v2685_v32 = vrot.slane %v6186_v41, %v6218_v39  ;;  %v2728_v24 = vrot.slane %v6230_v62, %v6212_v35  ;;  %v7066_v41 = vld [vmem:[#allocation115_spill] sm:$0xff] }
 0x429   : > { %v6375_v43 = vsel %vm2551_vm6, %v2839_v2, %v2835_v21  ;;  %v2896_v22 = vrot.slane %v6168_v15, %v6212_v35  ;;  %v2849_v26 = vsel %vm2530_vm3, %v2848_v0, %v2844_v51  ;;  %v2853_v60 = vrot.slane %v6178_v16, %v6218_v39  ;;  %v7067_v62 = vld [vmem:[#allocation131_spill] sm:$0xff]  ;;  %v7068_v16 = vld [vmem:[#allocation124_spill] sm:$0xff] }
 0x42a   : > { %v2752_v53 = vrot.slane %v6246_v47, %v6212_v35  ;;  %v2863_v13 = vrot.slane %v6172_v55, %v6235_v54  ;;  %v2815_v61 = vrot.slane %v7066_v41, %v6235_v54  ;;  %v2724_v56 = vrot.slane %v7067_v62, %v6209_v40  ;;  %v7069_v47 = vld [vmem:[#allocation135_spill] sm:$0xff]  ;;  %v7076_v62 = vld [vmem:[#allocation129_spill] sm:$0xff] }
 0x42b   : > { %v6326_v5 = vpop.permute.xlu1 %2426  ;;  %v2757_v15 = vrot.slane %v6299_v63, %v6218_v39  ;;  %v2873_v57 = vsel %vm2530_vm3, %v2872_v49, %v2868_v23  ;;  %v2690_v25 = vrot.slane %v7068_v16, %v6228_v6  ;;  %v2748_v37 = vrot.slane %v7069_v47, %v6209_v40 }
 0x42c   : > { %v2762_v42 = vrot.slane %v6326_v5, %v6228_v6  ;;  %v2901_v10 = vrot.slane %v7070_v30, %v6218_v39  ;;  %v2686_v29 = vsel %vm2537_vm4, %v2685_v32, %v2681_v52  ;;  %v2729_v4 = vsel %vm2530_vm3, %v2728_v24, %v2724_v56  ;;  %v2517_v5 = vpop.permute.xlu0 %2516  ;;  %v7073_v52 = vld [vmem:[#allocation126_spill] sm:$0xff]  ;;  %v7074_v24 = vld [vmem:[#allocation127_spill] sm:$0xff] }
 0x42d   : > { %v2854_v34 = vsel %vm2537_vm4, %v2853_v60, %v2849_v26  ;;  %v2700_v17 = vrot.slane %v7071_v9, %v6209_v40  ;;  %v2733_v36 = vrot.slane %v7072_v7, %v6218_v39  ;;  %v2753_v28 = vsel %vm2530_vm3, %v2752_v53, %v2748_v37  ;;  %v7075_v60 = vld [vmem:[#allocation134_spill] sm:$0xff] }
 0x42e   : > { %v2878_v45 = vsel %vm2537_vm4, %v2877_v27, %v2873_v57  ;;  %v2772_v21 = vrot.slane %v6284_v12, %v6209_v40  ;;  %v2758_v0 = vsel %vm2537_vm4, %v2757_v15, %v2753_v28  ;;  %v2691_v51 = vsel %vm2544_vm5, %v2690_v25, %v2686_v29  ;;  %v7078_v15 = vld [vmem:[#allocation132_spill] sm:$0xff] }
 0x42f   : > { %v2436_v11 = vpop.permute.xlu1 %2435  ;;  %v2858_v14 = vrot.slane %v7073_v52, %v6228_v6  ;;  %v2734_v2 = vsel %vm2537_vm4, %v2733_v36, %v2729_v4  ;;  %v2763_v23 = vsel %vm2544_vm5, %v2762_v42, %v2758_v0  ;;  %v2767_v49 = vrot.slane %v6324_v18, %v6235_v54 }
 0x430   : > { %v2776_v63 = vrot.slane %v2436_v11, %v6212_v35  ;;  %v2743_v12 = vrot.slane %v6270_v1, %v6235_v54  ;;  %v2892_v26 = vrot.slane %v7074_v24, %v6209_v40  ;;  %v2738_v53 = vrot.slane %v7075_v60, %v6228_v6  ;;  %v2520_v46 = vpop.permute.xlu0 %2519  ;;  %v4570_v24 = vld [vmem:[%s450_s23 + $0x4] ss:$8 sps:$4 sm:$0xff]  }
 0x431   : > { %v2781_v41 = vrot.slane %v2439_v59, %v6218_v39  ;;  %vm2200_vm13 = vcmp.lt.s32.totalorder %v7076_v62, 36  ;;  %v2768_v57 = vsel %vm2551_vm6, %v2767_v49, %v2763_v23  ;;  %v2859_v37 = vsel %vm2544_vm5, %v2858_v14, %v2854_v34  ;;  %4161 = vmatprep.mubr.msk.bf16.mxu1 %vm3668_vm0, %v4570_v24  ;;  %v4562_v60 = vld [vmem:[#allocation14 + $0x18] sm:$0xff]   ;;  %v4567_v62 = vld [vmem:[#allocation14 + $0x40] sm:$0xff]  }
 0x432   : > { %v2777_v27 = vsel %vm2530_vm3, %v2776_v63, %v2772_v21  ;;  %v2739_v59 = vsel %vm2544_vm5, %v2738_v53, %v2734_v2  ;;  %v2897_v4 = vsel %vm2530_vm3, %v2896_v22, %v2892_v26  ;;  %v2911_v9 = vrot.slane %v2520_v46, %v6235_v54  ;;  %v4561_v26 = vld [vmem:[#allocation14 + $0x10] sm:$0xff]   ;;  %v4563_v53 = vld [vmem:[#allocation14 + $0x20] sm:$0xff]  }
 0x433   : > { %v2445_v20 = vpop.permute.xlu1 %2444  ;;  %v2782_v47 = vsel %vm2537_vm4, %v2781_v41, %v2777_v27  ;;  %v2744_v30 = vsel %vm2551_vm6, %v2743_v12, %v2739_v59  ;;  %v2864_v22 = vsel %vm2551_vm6, %v2863_v13, %v2859_v37  ;;  %v2902_v21 = vsel %vm2537_vm4, %v2901_v10, %v2897_v4  ;;  %v4559_v27 = vld [vmem:[#allocation14] sm:$0xff]   ;;  %v4564_v41 = vld [vmem:[#allocation14 + $0x28] sm:$0xff]  }
 0x434   : > { %v2927_v63 = vsel %vm2913_vm7, %v2768_v57, %v2744_v30  ;;  %v2920_v10 = vsel %vm2919_vm10, %v6350_v44, %v6347_v38  ;;  %3677 = vmatpush1.bf16.msra.mxu1 %v4559_v27  ;;  %v2961_v4 = vld [vmem:[%s459_s5] sm:$0xff] }
 0x435   : > { %v2922_v50 = vsel %vm2921_vm11, %v6364_v3, %v2920_v10  ;;  %v4560_v3 = vld [vmem:[#allocation14 + $0x8] sm:$0xff]  }
 0x436   : > { %v7091_v27 = vld [vmem:[#allocation40_spill] sm:$0xff] }
 0x437   : > { %v2448_v33 = vpop.permute.xlu1 %2447 }
 0x438   : > { %v2796_v11 = vrot.slane %v2448_v33, %v6209_v40  ;;  %v2704_v40 = vrot.slane %v7078_v15, %v6212_v35  ;;  %v7079_v35 = vld [vmem:[#allocation133_spill] sm:$0xff] }
 0x439   : > { %v2709_v42 = vrot.slane %v7079_v35, %v6218_v39 }
 0x43a   : > { %v2801_v32 = vsel %vm2530_vm3, %v2800_v31, %v2796_v11  ;;  %v7077_v31 = vld [vmem:[#allocation130_spill] sm:$0xff]  ;;  %v2705_v28 = vsel %vm2530_vm3, %v2704_v40, %v2700_v17  ;;  %v7080_v11 = vld [vmem:[#allocation125_spill] sm:$0xff]  ;;  %v2696_v17 = vsel %vm2551_vm6, %v2695_v19, %v2691_v51  ;;  %vm3842_vm3 = vcmask 818176  }
 0x43b   : > { %v2806_v18 = vsel %vm2537_vm4, %v2805_v48, %v2801_v32  ;;  %v2442_v1 = vpop.permute.xlu1 %2441  ;;  %v2882_v56 = vrot.slane %v7077_v31, %v6228_v6  ;;  %v2791_v48 = vrot.slane %v2445_v20, %v6235_v54  ;;  %v2906_v20 = vrot.slane %v2517_v5, %v6228_v6  ;;  %v4568_v31 = vld [vmem:[#allocation14 + $0x48] sm:$0xff]  }
 0x43c   : > { %v2786_v16 = vrot.slane %v2442_v1, %v6228_v6  ;;  %v2811_v25 = vsel %vm2544_vm5, %v2810_v8, %v2806_v18  ;;  %v2710_v33 = vsel %vm2537_vm4, %v2709_v42, %v2705_v28  ;;  %v2714_v55 = vrot.slane %v7080_v11, %v6228_v6  ;;  %v4565_v18 = vld [vmem:[#allocation14 + $0x30] sm:$0xff]   ;;  %v4566_v1 = vld [vmem:[#allocation14 + $0x38] sm:$0xff]   ;;  %v7086_v28 = vld [vmem:[#allocation119_spill] sm:$0xff] }
 0x43d   : > { %v2816_v34 = vsel %vm2551_vm6, %v2815_v61, %v2811_v25  ;;  %v2883_v36 = vsel %vm2544_vm5, %v2882_v56, %v2878_v45  ;;  %v2907_v13 = vsel %vm2544_vm5, %v2906_v20, %v2902_v21  ;;  %v2924_v38 = vsel %vm2923_vm14, %v2696_v17, %v2922_v50  ;;  %v4569_v56 = vld [vmem:[#allocation14 + $0x50] ss:$0 sps:$4 sm:$0x33]   ;;  %v7089_v11 = vld [vmem:[#allocation122_spill] sm:$0xff] }
 0x43e   : > { %v2787_v29 = vsel %vm2544_vm5, %v2786_v16, %v2782_v47  ;;  %v2912_v14 = vsel %vm2551_vm6, %v2911_v9, %v2907_v13  ;;  %v2715_v2 = vsel %vm2544_vm5, %v2714_v55, %v2710_v33  ;;  %v7081_v32 = vmov 0   ;;  %v4572_v40 = vld [vmem:[%s450_s23] ss:$8 sps:$4 sm:$0xff]  }
 0x43f   : > { %v2792_v58 = vsel %vm2551_vm6, %v2791_v48, %v2787_v29  ;;  %v2505_v8 = vpop.permute.xlu1 %2504  ;;  %3678 = vmatprep.subr.bf16.mxu1 %v7081_v32  ;;  %v3674_v15 = vsel %vm3672_vm1, %v4569_v56, 0  ;;  %v7083_v9 = vld [vmem:[#allocation116_spill] sm:$0xff] }
 0x440   : > { %v2928_v7 = vsel %vm2915_vm8, %v2792_v58, %v2927_v63  ;;  %v2887_v39 = vrot.slane %v2505_v8, %v6235_v54  ;;  %3679 = vmatpush1.bf16.msra.mxu1 %v4560_v3  ;;  %v7082_v58 = vld [vmem:[#allocation33_spill] sm:$0xff]  ;;  %v7087_v33 = vld [vmem:[#allocation120_spill] sm:$0xff] }
 0x441   : > { %v2929_v5 = vsel %vm2917_vm9, %v2816_v34, %v2928_v7  ;;  %3680 = vmatprep.subr.bf16.mxu1 %v7081_v32  ;;  %v7084_v7 = vld [vmem:[#allocation117_spill] sm:$0xff] }
 0x442   : > { %v2888_v61 = vsel %vm2551_vm6, %v2887_v39, %v2883_v36  ;;  %v2930_v0 = vsel %vm2919_vm10, %v6375_v43, %v2929_v5 }
 0x443   : > { %v2400_v52 = vpop.permute.xlu1 %2399  ;;  %v2931_v45 = vsel %vm2921_vm11, %v2864_v22, %v2930_v0  ;;  %v7085_v22 = vld [vmem:[#allocation118_spill] sm:$0xff] }
 0x444   : > { %v2719_v43 = vrot.slane %v2400_v52, %v6235_v54  ;;  %v2932_v6 = vsel %vm2923_vm14, %v2888_v61, %v2931_v45  ;;  %3681 = vmatpush1.bf16.msra.mxu1 %v4561_v26  ;;  %v7088_v61 = vld [vmem:[#allocation121_spill] sm:$0xff] }
 0x445   : > { %v2933_v23 = vsel %vm2925_vm12, %v2912_v14, %v2932_v6  ;;  %3682 = vmatprep.subr.bf16.mxu1 %v7081_v32  ;;  %v2962_v14 = vld [vmem:[%s459_s5 + $0x8] sm:$0xff] }
 0x446   : > { %v2720_v19 = vsel %vm2551_vm6, %v2719_v43, %v2715_v2  ;;  %v2937_v51 = vsel %vm2200_vm13, %v2933_v23, -1e+30 }
 0x447   : > { %v2942_v44 = vsel %vm2938_vm15, %v2937_v51, -inf  ;;  %v2926_v54 = vsel %vm2925_vm12, %v2720_v19, %v2924_v38 }
 0x448   : > { %2943 = vmax.xlane.f32.xlu0 %v2942_v44  ;;  %v2936_v49 = vsel %vm2200_vm13, %v2926_v54, -1e+30  ;;  %3683 = vmatpush1.bf16.msra.mxu1 %v4562_v60  ;;  %v7092_v60 = vld [vmem:[#allocation48_spill] sm:$0xff] }
 0x449   : > { %v2939_v12 = vsel %vm2938_vm15, %v2936_v49, -inf  ;;  %3684 = vmatprep.subr.bf16.mxu1 %v7081_v32 }
 0x44a   : > { %2940 = vmax.xlane.f32.xlu1 %v2939_v12 }
 0x44c   : > { %3685 = vmatpush1.bf16.msra.mxu1 %v4563_v53 }
 0x44d   : > { %3686 = vmatprep.subr.bf16.mxu1 %v7081_v32 }
 0x450   : > { %3687 = vmatpush1.bf16.msra.mxu1 %v4564_v41  ;;  %v7093_v41 = vld [vmem:[#allocation34_spill] sm:$0xff] }
 0x451   : > { %3688 = vmatprep.subr.bf16.mxu1 %v7081_v32 }
 0x454   : > { %3689 = vmatpush1.bf16.msra.mxu1 %v4565_v18 }
 0x455   : > { %3690 = vmatprep.subr.bf16.mxu1 %v7081_v32 }
 0x458   : > { %3691 = vmatpush1.bf16.msra.mxu1 %v4566_v1 }
 0x459   : > { %3692 = vmatprep.subr.bf16.mxu1 %v7081_v32 }
 0x45c   : > { %3693 = vmatpush1.bf16.msra.mxu1 %v4567_v62 }
 0x45d   : > { %3694 = vmatprep.subr.bf16.mxu1 %v7081_v32 }
 0x460   : > { %3695 = vmatpush1.bf16.msra.mxu1 %v4568_v31 }
 0x461   : > { %3696 = vmatprep.subr.bf16.mxu1 %v7081_v32 }
 0x464   : > { %3697 = vmatpush1.bf16.msra.mxu1 %v3674_v15  ;;  %v7094_v15 = vld [vmem:[#allocation50_spill] sm:$0xff] }
 0x467   : > { %3709 = vmatmul.mubr.bf16.vlgmr.msra.gmra.mrb[32].mxu1 %v4572_v40 }
 0x4d5   : > { %v2944_v57 = vpop.xlane.xlu0 %2943 }
 0x4d6   : > { %v2946_v16 = vsub.f32 %v2937_v51, %v2944_v57  ;;  %v7095_v57 = vld [vmem:[#allocation42_spill] sm:$0xff] }
 0x4d7   : > { %v2941_v59 = vpop.xlane.xlu1 %2940 }
 0x4d8   : > { %v2949_v46 = vmul.f32 1.442695, %v2946_v16  ;;  %v2945_v48 = vsub.f32 %v2936_v49, %v2941_v59  ;;  %v7090_v49 = vld [vmem:[#allocation36_spill] sm:$0xff] }
 0x4da   : > { %4573 = vpow2.f32 %v2949_v46  ;;  %v2947_v25 = vmul.f32 1.442695, %v2945_v48 }
 0x4dc   : > { %4575 = vpow2.f32 %v2947_v25  ;;  %v7096_v25 = vld [vmem:[#allocation46_spill] sm:$0xff] }
 0x4e4   : > { %v4574_v47 = vpop.eup %4573 }
 0x4e5   : > { %v2954_v37 = vsel %vm2938_vm15, %v4574_v47, 0.0 }
 0x4e6   : > { %v4576_v35 = vpop.eup %4575  ;;  %2955 = vadd.xlane.f32.xlu1 %v2954_v37  ;;  %v7097_v37 = vld [vmem:[#allocation54_spill] sm:$0xff] }
 0x4e7   : > { %v2951_v42 = vsel %vm2938_vm15, %v4576_v35, 0.0 }
 0x4e8   : > { %2952 = vadd.xlane.f32.xlu0 %v2951_v42 }
 0x53a   : > { %v6538_v52 = vpop.f32.mrb[32].mxu1 }
 0x53b   : > { %v3712_v45 = vpop.f32.mrb[33].mxu1 }
 0x573   : > { %v2956_v13 = vpop.xlane.xlu1 %2955 }
 0x575   : > { %v2953_v30 = vpop.xlane.xlu0 %2952 }
 0x576   : > { %4577 = vrcp.f32 %v2953_v30 }
 0x577   : > { %4579 = vrcp.f32 %v2956_v13  ;;  %v7102_v13 = vld [vmem:[#allocation80_spill] sm:$0xff] }
 0x580   : > { %v4578_v29 = vpop.eup %4577 }
 0x581   : > { %v6523_v20 = vmul.f32 %v4578_v29, %v4576_v35  ;;  %v4580_v17 = vpop.eup %4579  ;;  %v6588_v29 = vpop.f32.mrb[34].mxu1 }
 0x582   : > { %v6541_v10 = vmul.f32 %v4580_v17, %v4574_v47  ;;  %v7103_v17 = vld [vmem:[#allocation72_spill] sm:$0xff] }
 0x583   : > { %v2963_v63 = vmul.f32 %v2961_v4, %v6523_v20 }
 0x584   : > { %v2964_v43 = vmul.f32 %v2962_v14, %v6541_v10 }
 0x585   : > { %v2968_v8 = vrot.slane %v2963_v63, %v7082_v58  ;;  %v2991_v34 = vrot.slane %v2963_v63, %v7083_v9  ;;  %v3014_v39 = vrot.slane %v2963_v63, %v7084_v7  ;;  %v3037_v36 = vrot.slane %v2963_v63, %v7085_v22 }
 0x586   : > { %v3060_v5 = vrot.slane %v2963_v63, %v7086_v28  ;;  %v3083_v21 = vrot.slane %v2963_v63, %v7087_v33  ;;  %v3106_v0 = vrot.slane %v2963_v63, %v7088_v61  ;;  %v6534_v55 = vrot.slane %v2963_v63, %v7089_v11 }
 0x587   : > { %2974 = vbcast.lane.b32.xlu1 %v2968_v8, 264  ;;  %2970 = vbcast.lane.b32.xlu0 %v2968_v8, 256  ;;  %v3175_v6 = vrot.slane %v2964_v43, %v7083_v9  ;;  %v3198_v2 = vrot.slane %v2964_v43, %v7084_v7  ;;  %v6550_v23 = vrot.slane %v2964_v43, %v7082_v58  ;;  %v7098_v58 = vld [vmem:[#allocation68_spill] sm:$0xff]  ;;  %v7099_v9 = vld [vmem:[#allocation62_spill] sm:$0xff]  ;;  %v3715_v7 = vpop.f32.mrb[35].mxu1 }
 0x588   : > { %v3221_v50 = vrot.slane %v2964_v43, %v7085_v22  ;;  %v6556_v19 = vrot.slane %v2964_v43, %v7086_v28  ;;  %v6561_v51 = vrot.slane %v2964_v43, %v7087_v33  ;;  %v6567_v38 = vrot.slane %v2964_v43, %v7088_v61  ;;  %v7100_v28 = vld [vmem:[#allocation60_spill] sm:$0xff] }
 0x589   : > { %v6580_v56 = vrot.slane %v2964_v43, %v7089_v11  ;;  %v7101_v33 = vld [vmem:[#allocation76_spill] sm:$0xff] }
 0x58b   : > { %2978 = vbcast.lane.b32.xlu1 %v2968_v8, 272  ;;  %2993 = vbcast.lane.b32.xlu0 %v2991_v34, 256 }
 0x58f   : > { %2997 = vbcast.lane.b32.xlu1 %v2991_v34, 264  ;;  %3016 = vbcast.lane.b32.xlu0 %v3014_v39, 256 }
 0x593   : > { %3020 = vbcast.lane.b32.xlu1 %v3014_v39, 264  ;;  %3001 = vbcast.lane.b32.xlu0 %v2991_v34, 272 }
 0x597   : > { %3039 = vbcast.lane.b32.xlu1 %v3037_v36, 256  ;;  %3043 = vbcast.lane.b32.xlu0 %v3037_v36, 264 }
 0x59b   : > { %3062 = vbcast.lane.b32.xlu1 %v3060_v5, 256  ;;  %3024 = vbcast.lane.b32.xlu0 %v3014_v39, 272 }
 0x59f   : > { %3047 = vbcast.lane.b32.xlu1 %v3037_v36, 272  ;;  %3066 = vbcast.lane.b32.xlu0 %v3060_v5, 264 }
 0x5a3   : > { %3089 = vbcast.lane.b32.xlu1 %v3083_v21, 264  ;;  %3005 = vbcast.lane.b32.xlu0 %v2991_v34, 280 }
 0x5a7   : > { %3028 = vbcast.lane.b32.xlu1 %v3014_v39, 280  ;;  %3085 = vbcast.lane.b32.xlu0 %v3083_v21, 256 }
 0x5ab   : > { %3108 = vbcast.lane.b32.xlu1 %v3106_v0, 256  ;;  %3070 = vbcast.lane.b32.xlu0 %v3060_v5, 272 }
 0x5af   : > { %2982 = vbcast.lane.b32.xlu1 %v2968_v8, 280  ;;  %3112 = vbcast.lane.b32.xlu0 %v3106_v0, 264 }
 0x5b3   : > { %3051 = vbcast.lane.b32.xlu1 %v3037_v36, 280  ;;  %3009 = vbcast.lane.b32.xlu0 %v2991_v34, 288 }
 0x5b7   : > { %3131 = vbcast.lane.b32.xlu1 %v6534_v55, 256  ;;  %3093 = vbcast.lane.b32.xlu0 %v3083_v21, 272 }
 0x5bb   : > { %3032 = vbcast.lane.b32.xlu1 %v3014_v39, 288  ;;  %3135 = vbcast.lane.b32.xlu0 %v6534_v55, 264 }
 0x5bf   : > { %3116 = vbcast.lane.b32.xlu1 %v3106_v0, 272  ;;  %3074 = vbcast.lane.b32.xlu0 %v3060_v5, 280 }
 0x5c3   : > { %2986 = vbcast.lane.b32.xlu1 %v2968_v8, 288  ;;  %3055 = vbcast.lane.b32.xlu0 %v3037_v36, 288 }
 0x5c7   : > { %3097 = vbcast.lane.b32.xlu1 %v3083_v21, 280  ;;  %3139 = vbcast.lane.b32.xlu0 %v6534_v55, 272 }
 0x5cb   : > { %3078 = vbcast.lane.b32.xlu1 %v3060_v5, 288  ;;  %3120 = vbcast.lane.b32.xlu0 %v3106_v0, 280 }
 0x5cf   : > { %3101 = vbcast.lane.b32.xlu1 %v3083_v21, 288  ;;  %3143 = vbcast.lane.b32.xlu0 %v6534_v55, 280 }
 0x5d3   : > { %3124 = vbcast.lane.b32.xlu1 %v3106_v0, 288  ;;  %3177 = vbcast.lane.b32.xlu0 %v3175_v6, 256 }
 0x5d7   : > { %3181 = vbcast.lane.b32.xlu1 %v3175_v6, 264  ;;  %3200 = vbcast.lane.b32.xlu0 %v3198_v2, 256 }
 0x5db   : > { %3204 = vbcast.lane.b32.xlu1 %v3198_v2, 264  ;;  %3158 = vbcast.lane.b32.xlu0 %v6550_v23, 264 }
 0x5df   : > { %3223 = vbcast.lane.b32.xlu0 %v3221_v50, 256  ;;  %3154 = vbcast.lane.b32.xlu1 %v6550_v23, 256 }
 0x5e3   : > { %3246 = vbcast.lane.b32.xlu0 %v6556_v19, 256  ;;  %3185 = vbcast.lane.b32.xlu1 %v3175_v6, 272 }
 0x5e7   : > { %3162 = vbcast.lane.b32.xlu0 %v6550_v23, 272  ;;  %3227 = vbcast.lane.b32.xlu1 %v3221_v50, 264 }
 0x5eb   : > { %3231 = vbcast.lane.b32.xlu0 %v3221_v50, 272  ;;  %3208 = vbcast.lane.b32.xlu1 %v3198_v2, 272 }
 0x5ef   : > { %3273 = vbcast.lane.b32.xlu0 %v6561_v51, 264  ;;  %3250 = vbcast.lane.b32.xlu1 %v6556_v19, 264 }
 0x5f3   : > { %3254 = vbcast.lane.b32.xlu0 %v6556_v19, 272  ;;  %3189 = vbcast.lane.b32.xlu1 %v3175_v6, 280 }
 0x5f7   : > { %3296 = vbcast.lane.b32.xlu0 %v6567_v38, 264  ;;  %3269 = vbcast.lane.b32.xlu1 %v6561_v51, 256 }
 0x5f9   : > { %v2971_v44 = vpop.permute.xlu0 %2970  ;;  %v2975_v54 = vpop.permute.xlu1 %2974 }
 0x5fa   : > { %v3333_v12 = vmul.f32 %v2971_v44, %v7090_v49  ;;  %v3334_v3 = vmul.f32 %v2975_v54, %v7091_v27  ;;  %v7104_v54 = vld [vmem:[#allocation52_spill] sm:$0xff] }
 0x5fb   : > { %3193 = vbcast.lane.b32.xlu0 %v3175_v6, 288  ;;  %3212 = vbcast.lane.b32.xlu1 %v3198_v2, 280 }
 0x5fc   : > { %v3413_v32 = vadd.f32 %v3334_v3, %v3333_v12 }
 0x5fd   : > { %v2994_v24 = vpop.permute.xlu0 %2993  ;;  %v2979_v26 = vpop.permute.xlu1 %2978 }
 0x5fe   : > { %v3338_v53 = vmul.f32 %v2994_v24, %v7092_v60  ;;  %v3335_v18 = vmul.f32 %v7093_v41, %v2979_v26  ;;  %v7106_v24 = vld [vmem:[#allocation85_spill] sm:$0xff]  ;;  %v7107_v60 = vld [vmem:[#allocation64_spill] sm:$0xff] }
 0x5ff   : > { %3277 = vbcast.lane.b32.xlu0 %v6561_v51, 272  ;;  %3292 = vbcast.lane.b32.xlu1 %v6567_v38, 256 }
 0x600   : > { %v6577_v1 = vadd.f32 %v3413_v32, %v3335_v18 }
 0x601   : > { %v3017_v62 = vpop.permute.xlu0 %3016  ;;  %v2998_v31 = vpop.permute.xlu1 %2997 }
 0x602   : > { %v3343_v40 = vmul.f32 %v7094_v15, %v3017_v62  ;;  %v3339_v16 = vmul.f32 %v7095_v57, %v2998_v31  ;;  %v7108_v31 = vld [vmem:[#allocation74_spill] sm:$0xff] }
 0x603   : > { %3319 = vbcast.lane.b32.xlu0 %v6580_v56, 264  ;;  %3166 = vbcast.lane.b32.xlu1 %v6550_v23, 280 }
 0x604   : > { %v3423_v59 = vadd.f32 %v3339_v16, %v3338_v53 }
 0x605   : > { %v3002_v46 = vpop.permute.xlu0 %3001  ;;  %v3021_v48 = vpop.permute.xlu1 %3020 }
 0x606   : > { %v3340_v47 = vmul.f32 %v7096_v25, %v3002_v46  ;;  %v3344_v35 = vmul.f32 %v7097_v37, %v3021_v48  ;;  %v7110_v48 = vld [vmem:[#allocation88_spill] sm:$0xff] }
 0x607   : > { %3216 = vbcast.lane.b32.xlu0 %v3198_v2, 288  ;;  %3235 = vbcast.lane.b32.xlu1 %v3221_v50, 280 }
 0x608   : > { %v3424_v42 = vadd.f32 %v3423_v59, %v3340_v47  ;;  %v3433_v30 = vadd.f32 %v3344_v35, %v3343_v40  ;;  %v7109_v40 = vld [vmem:[#allocation86_spill] sm:$0xff] }
 0x609   : > { %v3044_v4 = vpop.permute.xlu0 %3043  ;;  %v3040_v63 = vpop.permute.xlu1 %3039  ;;  %v7111_v47 = vld [vmem:[#allocation38_spill] sm:$0xff] }
 0x60a   : > { %v3349_v8 = vmul.f32 %v3044_v4, %v7098_v58  ;;  %v3348_v34 = vmul.f32 %v7099_v9, %v3040_v63  ;;  %v7112_v4 = vld [vmem:[#allocation56_spill] sm:$0xff]  ;;  %v7113_v63 = vld [vmem:[#allocation66_spill] sm:$0xff] }
 0x60b   : > { %3300 = vbcast.lane.b32.xlu0 %v6567_v38, 272  ;;  %3315 = vbcast.lane.b32.xlu1 %v6580_v56, 256 }
 0x60c   : > { %v3443_v39 = vadd.f32 %v3349_v8, %v3348_v34 }
 0x60d   : > { %v3025_v22 = vpop.permute.xlu0 %3024  ;;  %v3063_v36 = vpop.permute.xlu1 %3062 }
 0x60e   : > { %v3345_v5 = vmul.f32 %v3025_v22, %v7100_v28  ;;  %v3353_v21 = vmul.f32 %v3063_v36, %v7101_v33  ;;  %v7115_v36 = vld [vmem:[#allocation92_spill] sm:$0xff] }
 0x60f   : > { %3239 = vbcast.lane.b32.xlu0 %v3221_v50, 288  ;;  %3258 = vbcast.lane.b32.xlu1 %v6556_v19, 280  ;;  %v7105_v50 = vld [vmem:[#allocation82_spill] sm:$0xff] }
 0x610   : > { %v3434_v61 = vadd.f32 %v3433_v30, %v3345_v5 }
 0x611   : > { %v3067_v0 = vpop.permute.xlu0 %3066  ;;  %v3048_v11 = vpop.permute.xlu1 %3047 }
 0x612   : > { %v3354_v45 = vmul.f32 %v3067_v0, %v7102_v13  ;;  %v3350_v14 = vmul.f32 %v3048_v11, %v7103_v17  ;;  %v7117_v0 = vld [vmem:[#allocation58_spill] sm:$0xff] }
 0x613   : > { %3323 = vbcast.lane.b32.xlu0 %v6580_v56, 272  ;;  %3170 = vbcast.lane.b32.xlu1 %v6550_v23, 288 }
 0x614   : > { %v3453_v43 = vadd.f32 %v3354_v45, %v3353_v21  ;;  %v3444_v6 = vadd.f32 %v3443_v39, %v3350_v14  ;;  %v7114_v39 = vld [vmem:[#allocation84_spill] sm:$0xff]  ;;  %v7116_v21 = vld [vmem:[#allocation95_spill] sm:$0xff] }
 0x615   : > { %v3006_v2 = vpop.permute.xlu0 %3005  ;;  %v3090_v44 = vpop.permute.xlu1 %3089 }
 0x616   : > { %v3341_v49 = vmul.f32 %v3006_v2, %v7104_v54  ;;  %v3359_v12 = vmul.f32 %v7105_v50, %v3090_v44  ;;  %v7118_v54 = vld [vmem:[#allocation78_spill] sm:$0xff]  ;;  %v7119_v50 = vld [vmem:[#allocation91_spill] sm:$0xff] }
 0x617   : > { %3304 = vbcast.lane.b32.xlu0 %v6567_v38, 280  ;;  %3281 = vbcast.lane.b32.xlu1 %v6561_v51, 280 }
 0x618   : > { %v3425_v27 = vadd.f32 %v3424_v42, %v3341_v49 }
 0x619   : > { %v3086_v3 = vpop.permute.xlu0 %3085  ;;  %v3029_v32 = vpop.permute.xlu1 %3028 }
 0x61a   : > { %v3358_v26 = vmul.f32 %v3086_v3, %v7106_v24  ;;  %v3346_v53 = vmul.f32 %v3029_v32, %v7107_v60 }
 0x61b   : > { %3327 = vbcast.lane.b32.xlu0 %v6580_v56, 280  ;;  %3262 = vbcast.lane.b32.xlu1 %v6556_v19, 288 }
 0x61c   : > { %v3463_v23 = vadd.f32 %v3359_v12, %v3358_v26  ;;  %v3435_v41 = vadd.f32 %v3434_v61, %v3346_v53 }
 0x61d   : > { %v3071_v18 = vpop.permute.xlu0 %3070  ;;  %v3109_v62 = vpop.permute.xlu1 %3108 }
 0x61e   : > { %v3355_v15 = vmul.f32 %v7108_v31, %v3071_v18  ;;  %v3363_v57 = vmul.f32 %v7109_v40, %v3109_v62  ;;  %v7120_v18 = vld [vmem:[#allocation70_spill] sm:$0xff]  ;;  %v7121_v62 = vld [vmem:[#allocation44_spill] sm:$0xff] }
 0x61f   : > { %3308 = vbcast.lane.b32.xlu0 %v6567_v38, 288  ;;  %3285 = vbcast.lane.b32.xlu1 %v6561_v51, 288 }
 0x620   : > { %v3454_v16 = vadd.f32 %v3453_v43, %v3355_v15 }
 0x621   : > { %v3113_v59 = vpop.permute.xlu0 %3112  ;;  %v2983_v46 = vpop.permute.xlu1 %2982 }
 0x622   : > { %v3364_v25 = vmul.f32 %v7110_v48, %v3113_v59  ;;  %v3336_v37 = vmul.f32 %v7111_v47, %v2983_v46  ;;  %v3720_v59 = vrot.slane %v6538_v52, 2 }
 0x623   : > { %3331 = vbcast.lane.b32.xlu0 %v6580_v56, 288  ;;  %3147 = vbcast.lane.b32.xlu1 %v6534_v55, 288 }
 0x624   : > { %v3473_v19 = vadd.f32 %v3364_v25, %v3363_v57  ;;  %v3415_v35 = vadd.f32 %v6577_v1, %v3336_v37 }
 0x625   : > { %v3010_v42 = vpop.permute.xlu0 %3009  ;;  %v3052_v30 = vpop.permute.xlu1 %3051 }
 0x626   : > { %v3342_v38 = vmul.f32 %v3010_v42, %v7112_v4  ;;  %v3351_v51 = vmul.f32 %v7113_v63, %v3052_v30  ;;  %v7123_v42 = vld [vmem:[#allocation87_spill] sm:$0xff] }
 0x628   : > { %v3426_v58 = vadd.f32 %v3425_v27, %v3342_v38  ;;  %v3445_v8 = vadd.f32 %v3444_v6, %v3351_v51  ;;  %v3719_v6 = vrot.slane %v6538_v52, 1 }
 0x629   : > { %v3094_v9 = vpop.permute.xlu0 %3093  ;;  %v3132_v34 = vpop.permute.xlu1 %3131 }
 0x62a   : > { %v3427_v7 = vrot.slane %v3426_v58, 4  ;;  %v3360_v22 = vmul.f32 %v7114_v39, %v3094_v9  ;;  %v3368_v56 = vmul.f32 %v7115_v36, %v3132_v34  ;;  %v7124_v39 = vld [vmem:[#allocation93_spill] sm:$0xff]  ;;  %v7125_v36 = vld [vmem:[#allocation83_spill] sm:$0xff] }
 0x62c   : > { %v3428_v28 = vadd.f32 %v3427_v7, %v3426_v58  ;;  %v3464_v55 = vadd.f32 %v3463_v23, %v3360_v22 }
 0x62d   : > { %v3136_v5 = vpop.permute.xlu0 %3135  ;;  %v3033_v33 = vpop.permute.xlu1 %3032 }
 0x62e   : > { %v3429_v1 = vrot.slane %v3428_v28, 2  ;;  %v3369_v61 = vmul.f32 %v3136_v5, %v7116_v21  ;;  %v3347_v11 = vmul.f32 %v7117_v0, %v3033_v33 }
 0x630   : > { %v3430_v13 = vadd.f32 %v3429_v1, %v3428_v28  ;;  %v3483_v45 = vadd.f32 %v3369_v61, %v3368_v56  ;;  %v3436_v17 = vadd.f32 %v3435_v41, %v3347_v11  ;;  %v3721_v1 = vrot.slane %v6538_v52, 3 }
 0x631   : > { %v3075_v14 = vpop.permute.xlu0 %3074  ;;  %v3117_v43 = vpop.permute.xlu1 %3116 }
 0x632   : > { %v3431_v2 = vrot.slane %v3430_v13, 1  ;;  %v3437_v44 = vrot.slane %v3436_v17, 4  ;;  %v3356_v49 = vmul.f32 %v7118_v54, %v3075_v14  ;;  %v3365_v12 = vmul.f32 %v3117_v43, %v7119_v50 }
 0x634   : > { %v3432_v27 = vadd.f32 %v3431_v2, %v3430_v13  ;;  %v3438_v3 = vadd.f32 %v3437_v44, %v3436_v17  ;;  %v3455_v32 = vadd.f32 %v3454_v16, %v3356_v49  ;;  %v3474_v24 = vadd.f32 %v3473_v19, %v3365_v12  ;;  %v7122_v16 = vld [vmem:[#allocation97_spill] sm:$0xff] }
 0x635   : > { %v3056_v26 = vpop.permute.xlu0 %3055  ;;  %v2987_v60 = vpop.permute.xlu1 %2986  ;;  %v7127_v17 = vld [vmem:[#allocation89_spill] sm:$0xff] }
 0x636   : > { %v3439_v53 = vrot.slane %v3438_v3, 2  ;;  %v3750_v23 = vadd.f32 %v3719_v6, %v3432_v27  ;;  %v3352_v41 = vmul.f32 %v7120_v18, %v3056_v26  ;;  %v3337_v31 = vmul.f32 %v2987_v60, %v7121_v62 }
 0x638   : > { %v3440_v15 = vadd.f32 %v3439_v53, %v3438_v3  ;;  %v3446_v40 = vadd.f32 %v3445_v8, %v3352_v41  ;;  %v3416_v57 = vadd.f32 %v3415_v35, %v3337_v31  ;;  %4581 = vtanh.f32 %v3750_v23  ;;  %v7129_v53 = vld [vmem:[#allocation90_spill] sm:$0xff] }
 0x639   : > { %v3140_v46 = vpop.permute.xlu0 %3139  ;;  %v3098_v48 = vpop.permute.xlu1 %3097 }
 0x63a   : > { %v3441_v25 = vrot.slane %v3440_v15, 1  ;;  %v3447_v47 = vrot.slane %v3446_v40, 4  ;;  %v3417_v37 = vrot.slane %v3416_v57, 4  ;;  %v3370_v19 = vmul.f32 %v3140_v46, %v7122_v16  ;;  %v7131_v46 = vld [vmem:[#allocation102_spill] sm:$0xff] }
 0x63b   : > { %v3361_v30 = vmul.f32 %v3098_v48, %v7123_v42 }
 0x63c   : > { %v3442_v4 = vadd.f32 %v3441_v25, %v3440_v15  ;;  %v3448_v38 = vadd.f32 %v3447_v47, %v3446_v40  ;;  %v3418_v63 = vadd.f32 %v3417_v37, %v3416_v57  ;;  %v3484_v51 = vadd.f32 %v3483_v45, %v3370_v19  ;;  %v7130_v57 = vld [vmem:[#allocation106_spill] sm:$0xff] }
 0x63d   : > { %v3465_v58 = vadd.f32 %v3464_v55, %v3361_v30  ;;  %v3121_v9 = vpop.permute.xlu0 %3120  ;;  %v3079_v34 = vpop.permute.xlu1 %3078  ;;  %v7126_v55 = vld [vmem:[#allocation94_spill] sm:$0xff]  ;;  %v3722_v25 = vrot.slane %v6538_v52, 4 }
 0x63e   : > { %v3751_v8 = vadd.f32 %v3720_v59, %v3442_v4  ;;  %v3449_v35 = vrot.slane %v3448_v38, 2  ;;  %v3419_v7 = vrot.slane %v3418_v63, 2  ;;  %v3366_v22 = vmul.f32 %v3121_v9, %v7124_v39  ;;  %v7132_v9 = vld [vmem:[#allocation108_spill] sm:$0xff] }
 0x63f   : > { %v3357_v56 = vmul.f32 %v3079_v34, %v7125_v36 }
 0x640   : > { %v3450_v28 = vadd.f32 %v3449_v35, %v3448_v38  ;;  %v3420_v5 = vadd.f32 %v3419_v7, %v3418_v63  ;;  %v3475_v33 = vadd.f32 %v3474_v24, %v3366_v22  ;;  %4583 = vtanh.f32 %v3751_v8  ;;  %v7128_v24 = vld [vmem:[#allocation105_spill] sm:$0xff] }
 0x641   : > { %v3456_v21 = vadd.f32 %v3455_v32, %v3357_v56  ;;  %v3144_v61 = vpop.permute.xlu0 %3143  ;;  %v3102_v0 = vpop.permute.xlu1 %3101 }
 0x642   : > { %v3451_v11 = vrot.slane %v3450_v28, 1  ;;  %v3421_v13 = vrot.slane %v3420_v5, 1  ;;  %v3371_v45 = vmul.f32 %v7126_v55, %v3144_v61  ;;  %v3362_v14 = vmul.f32 %v3102_v0, %v7127_v17  ;;  %v4582_v42 = vpop.eup %4581  ;;  %v7134_v61 = vld [vmem:[#allocation99_spill] sm:$0xff] }
 0x643   : > { %v3457_v43 = vrot.slane %v3456_v21, 4 }
 0x644   : > { %v3452_v6 = vadd.f32 %v3451_v11, %v3450_v28  ;;  %v3422_v2 = vadd.f32 %v3421_v13, %v3420_v5  ;;  %v6637_v44 = vadd.f32 %v3484_v51, %v3371_v45  ;;  %v3466_v54 = vadd.f32 %v3465_v58, %v3362_v14 }
 0x645   : > { %v3458_v49 = vadd.f32 %v3457_v43, %v3456_v21  ;;  %v3178_v50 = vpop.permute.xlu0 %3177  ;;  %v3125_v12 = vpop.permute.xlu1 %3124  ;;  %v3723_v51 = vrot.slane %v6538_v52, 5  ;;  %v3797_v11 = vrot.slane %v4582_v42, 7  ;;  %v3724_v45 = vrot.slane %v6538_v52, 6 }
 0x646   : > { %v3752_v27 = vadd.f32 %v3721_v1, %v3452_v6  ;;  %v3749_v3 = vadd.f32 %v6538_v52, %v3422_v2  ;;  %v3467_v32 = vrot.slane %v3466_v54, 4  ;;  %v3378_v26 = vmul.f32 %v3178_v50, %v7128_v24  ;;  %v7133_v1 = vld [vmem:[#allocation101_spill] sm:$0xff] }
 0x647   : > { %v3459_v60 = vrot.slane %v3458_v49, 2  ;;  %v3367_v18 = vmul.f32 %v7129_v53, %v3125_v12  ;;  %v7135_v12 = vld [vmem:[#allocation104_spill] sm:$0xff] }
 0x648   : > { %4585 = vtanh.f32 %v3752_v27  ;;  %v3468_v23 = vadd.f32 %v3467_v32, %v3466_v54  ;;  %v7136_v53 = vld [vmem:[#allocation112_spill] sm:$0xff] }
 0x649   : > { %4587 = vtanh.f32 %v3749_v3  ;;  %v3460_v41 = vadd.f32 %v3459_v60, %v3458_v49  ;;  %v3476_v62 = vadd.f32 %v3475_v33, %v3367_v18  ;;  %v3201_v31 = vpop.permute.xlu0 %3200  ;;  %v3182_v15 = vpop.permute.xlu1 %3181 }
 0x64a   : > { %v3469_v40 = vrot.slane %v3468_v23, 2  ;;  %v3383_v59 = vmul.f32 %v7130_v57, %v3201_v31  ;;  %v3379_v48 = vmul.f32 %v7131_v46, %v3182_v15  ;;  %v4584_v8 = vpop.eup %4583 }
 0x64b   : > { %v3461_v47 = vrot.slane %v3460_v41, 1  ;;  %v3477_v37 = vrot.slane %v3476_v62, 4  ;;  %v3799_v14 = vrot.slane %v4584_v8, 6  ;;  %v7142_v8 = vld [vmem:[#allocation49_spill] sm:$0xff] }
 0x64c   : > { %v3470_v16 = vadd.f32 %v3469_v40, %v3468_v23  ;;  %v3503_v19 = vadd.f32 %v3379_v48, %v3378_v26  ;;  %v7137_v23 = vld [vmem:[#allocation98_spill] sm:$0xff] }
 0x64d   : > { %v3462_v30 = vadd.f32 %v3461_v47, %v3460_v41  ;;  %v3478_v4 = vadd.f32 %v3477_v37, %v3476_v62  ;;  %v3159_v38 = vpop.permute.xlu0 %3158  ;;  %v3205_v63 = vpop.permute.xlu1 %3204  ;;  %v7138_v62 = vld [vmem:[#allocation37_spill] sm:$0xff] }
 0x64e   : > { %v3471_v58 = vrot.slane %v3470_v16, 1  ;;  %v3384_v34 = vmul.f32 %v7132_v9, %v3205_v63  ;;  %v3374_v21 = vmul.f32 %v3159_v38, %v7133_v1  ;;  %v7139_v47 = vld [vmem:[#allocation41_spill] sm:$0xff]  ;;  %v7144_v1 = vld [vmem:[#allocation107_spill] sm:$0xff] }
 0x64f   : > { %v3753_v35 = vadd.f32 %v3722_v25, %v3462_v30  ;;  %v3479_v7 = vrot.slane %v3478_v4, 2  ;;  %v7141_v9 = vld [vmem:[#allocation45_spill] sm:$0xff] }
 0x650   : > { %v3472_v39 = vadd.f32 %v3471_v58, %v3470_v16  ;;  %v3513_v22 = vadd.f32 %v3384_v34, %v3383_v59  ;;  %v7140_v16 = vld [vmem:[#allocation111_spill] sm:$0xff] }
 0x651   : > { %4589 = vtanh.f32 %v3753_v35  ;;  %v3480_v36 = vadd.f32 %v3479_v7, %v3478_v4  ;;  %v3224_v56 = vpop.permute.xlu0 %3223  ;;  %v3155_v28 = vpop.permute.xlu1 %3154 }
 0x652   : > { %v4586_v5 = vpop.eup %4585  ;;  %v3754_v33 = vadd.f32 %v3723_v51, %v3472_v39  ;;  %v3373_v0 = vmul.f32 %v3155_v28, %v7134_v61  ;;  %v3388_v18 = vmul.f32 %v7136_v53, %v3224_v56 }
 0x653   : > { %v4588_v13 = vpop.eup %4587  ;;  %v3801_v55 = vrot.slane %v4586_v5, 5  ;;  %v3481_v17 = vrot.slane %v3480_v36, 1  ;;  %v7143_v5 = vld [vmem:[#allocation43_spill] sm:$0xff] }
 0x654   : > { %4591 = vtanh.f32 %v3754_v33  ;;  %v3493_v43 = vadd.f32 %v3374_v21, %v3373_v0  ;;  %v3798_v6 = vsel %vm2913_vm7, %v3797_v11, %v4588_v13 }
 0x655   : > { %v3482_v2 = vadd.f32 %v3481_v17, %v3480_v36  ;;  %v3247_v54 = vpop.permute.xlu0 %3246  ;;  %v3186_v49 = vpop.permute.xlu1 %3185  ;;  %v3800_v50 = vsel %vm2915_vm8, %v3799_v14, %v3798_v6  ;;  %v7146_v17 = vld [vmem:[#allocation57_spill] sm:$0xff] }
 0x656   : > { %v3380_v27 = vmul.f32 %v7135_v12, %v3186_v49  ;;  %v3802_v3 = vsel %vm2917_vm9, %v3801_v55, %v3800_v50  ;;  %v3393_v34 = vmul.f32 %v3247_v54, %v7141_v9  ;;  %v7145_v55 = vld [vmem:[#allocation51_spill] sm:$0xff]  ;;  %v7147_v54 = vld [vmem:[#allocation109_spill] sm:$0xff]  ;;  %v3726_v9 = vrot.slane %v6588_v29, 1 }
 0x657   : > { %v3755_v32 = vadd.f32 %v3724_v45, %v3482_v2  ;;  %v7148_v50 = vld [vmem:[#allocation113_spill] sm:$0xff] }
 0x658   : > { %v3504_v24 = vadd.f32 %v3503_v19, %v3380_v27 }
 0x659   : > { %4593 = vtanh.f32 %v3755_v32  ;;  %v3163_v26 = vpop.permute.xlu0 %3162  ;;  %v3228_v60 = vpop.permute.xlu1 %3227 }
 0x65a   : > { %v3375_v41 = vmul.f32 %v7137_v23, %v3163_v26  ;;  %v3389_v31 = vmul.f32 %v3228_v60, %v7138_v62  ;;  %v7149_v60 = vld [vmem:[#allocation63_spill] sm:$0xff] }
 0x65b   : > { %v4590_v15 = vpop.eup %4589 }
 0x65c   : > { %v3803_v40 = vrot.slane %v4590_v15, 4  ;;  %v3494_v57 = vadd.f32 %v3493_v43, %v3375_v41  ;;  %v3523_v59 = vadd.f32 %v3389_v31, %v3388_v18  ;;  %v7150_v18 = vld [vmem:[#allocation55_spill] sm:$0xff] }
 0x65d   : > { %v3232_v46 = vpop.permute.xlu0 %3231  ;;  %v3209_v48 = vpop.permute.xlu1 %3208  ;;  %v7151_v41 = vld [vmem:[#allocation59_spill] sm:$0xff] }
 0x65e   : > { %v4592_v25 = vpop.eup %4591  ;;  %v3390_v37 = vmul.f32 %v3232_v46, %v7139_v47  ;;  %v3385_v19 = vmul.f32 %v3209_v48, %v7140_v16  ;;  %v3804_v42 = vsel %vm2919_vm10, %v3803_v40, %v3802_v3 }
 0x65f   : > { %v3805_v30 = vrot.slane %v4592_v25, 3  ;;  %v7152_v25 = vld [vmem:[#allocation100_spill] sm:$0xff] }
 0x660   : > { %v3524_v4 = vadd.f32 %v3523_v59, %v3390_v37  ;;  %v3514_v38 = vadd.f32 %v3513_v22, %v3385_v19 }
 0x661   : > { %v3274_v63 = vpop.permute.xlu0 %3273  ;;  %v3251_v51 = vpop.permute.xlu1 %3250  ;;  %v3806_v58 = vsel %vm2921_vm11, %v3805_v30, %v3804_v42 }
 0x662   : > { %v3394_v35 = vmul.f32 %v3251_v51, %v7142_v8  ;;  %v3399_v45 = vmul.f32 %v7145_v55, %v3274_v63  ;;  %v7154_v51 = vld [vmem:[#allocation35_spill] sm:$0xff] }
 0x663   : > { %v4594_v7 = vpop.eup %4593 }
 0x664   : > { %v3533_v39 = vadd.f32 %v3394_v35, %v3393_v34  ;;  %v3807_v36 = vrot.slane %v4594_v7, 2  ;;  %v7155_v7 = vld [vmem:[#allocation77_spill] sm:$0xff] }
 0x665   : > { %v3255_v56 = vpop.permute.xlu0 %3254  ;;  %v3190_v28 = vpop.permute.xlu1 %3189 }
 0x666   : > { %v3395_v33 = vmul.f32 %v7143_v5, %v3255_v56  ;;  %v3381_v21 = vmul.f32 %v3190_v28, %v7144_v1  ;;  %v6666_v61 = vsel %vm2923_vm14, %v3807_v36, %v3806_v58  ;;  %v7157_v1 = vld [vmem:[#allocation71_spill] sm:$0xff] }
 0x668   : > { %v3534_v22 = vadd.f32 %v3533_v39, %v3395_v33  ;;  %v3505_v0 = vadd.f32 %v3504_v24, %v3381_v21  ;;  %v7156_v33 = vld [vmem:[#allocation69_spill] sm:$0xff] }
 0x669   : > { %v3297_v11 = vpop.permute.xlu0 %3296  ;;  %v3270_v13 = vpop.permute.xlu1 %3269 }
 0x66a   : > { %v3398_v14 = vmul.f32 %v3270_v13, %v7146_v17  ;;  %v3404_v53 = vmul.f32 %v7149_v60, %v3297_v11 }
 0x66c   : > { %v3543_v43 = vadd.f32 %v3399_v45, %v3398_v14  ;;  %v7158_v14 = vld [vmem:[#allocation39_spill] sm:$0xff] }
 0x66d   : > { %v3194_v6 = vpop.permute.xlu0 %3193  ;;  %v3213_v2 = vpop.permute.xlu1 %3212 }
 0x66e   : > { %v3382_v49 = vmul.f32 %v3194_v6, %v7147_v54  ;;  %v3386_v12 = vmul.f32 %v3213_v2, %v7148_v50  ;;  %v7159_v6 = vld [vmem:[#allocation47_spill] sm:$0xff]  ;;  %v3727_v50 = vrot.slane %v6588_v29, 2 }
 0x670   : > { %v3506_v27 = vadd.f32 %v3505_v0, %v3382_v49  ;;  %v3515_v3 = vadd.f32 %v3514_v38, %v3386_v12  ;;  %v7153_v38 = vld [vmem:[#allocation110_spill] sm:$0xff] }
 0x671   : > { %v3278_v32 = vpop.permute.xlu0 %3277  ;;  %v3293_v26 = vpop.permute.xlu1 %3292 }
 0x672   : > { %v3507_v24 = vrot.slane %v3506_v27, 4  ;;  %v3400_v23 = vmul.f32 %v7150_v18, %v3278_v32  ;;  %v3403_v62 = vmul.f32 %v7151_v41, %v3293_v26  ;;  %v7160_v26 = vld [vmem:[#allocation81_spill] sm:$0xff] }
 0x674   : > { %v3508_v31 = vadd.f32 %v3507_v24, %v3506_v27  ;;  %v3544_v15 = vadd.f32 %v3543_v43, %v3400_v23  ;;  %v3553_v40 = vadd.f32 %v3404_v53, %v3403_v62  ;;  %v7161_v53 = vld [vmem:[#allocation103_spill] sm:$0xff] }
 0x675   : > { %v3320_v59 = vpop.permute.xlu0 %3319  ;;  %v3167_v46 = vpop.permute.xlu1 %3166 }
 0x676   : > { %v3509_v48 = vrot.slane %v3508_v31, 2  ;;  %v3376_v47 = vmul.f32 %v7152_v25, %v3167_v46  ;;  %v3409_v39 = vmul.f32 %v3320_v59, %v7155_v7 }
 0x678   : > { %v3510_v37 = vadd.f32 %v3509_v48, %v3508_v31  ;;  %v3495_v16 = vadd.f32 %v3494_v57, %v3376_v47  ;;  %v7163_v47 = vld [vmem:[#allocation61_spill] sm:$0xff] }
 0x679   : > { %v3217_v19 = vpop.permute.xlu0 %3216  ;;  %v3236_v42 = vpop.permute.xlu1 %3235 }
 0x67a   : > { %v3511_v30 = vrot.slane %v3510_v37, 1  ;;  %v3387_v63 = vmul.f32 %v7153_v38, %v3217_v19  ;;  %v3391_v58 = vmul.f32 %v7154_v51, %v3236_v42  ;;  %v3728_v38 = vrot.slane %v6588_v29, 3 }
 0x67c   : > { %v3512_v34 = vadd.f32 %v3511_v30, %v3510_v37  ;;  %v3516_v8 = vadd.f32 %v3515_v3, %v3387_v63  ;;  %v3525_v35 = vadd.f32 %v3524_v4, %v3391_v58 }
 0x67d   : > { %v3301_v36 = vpop.permute.xlu0 %3300  ;;  %v3316_v56 = vpop.permute.xlu1 %3315 }
 0x67e   : > { %v3517_v28 = vrot.slane %v3516_v8, 4  ;;  %v3758_v5 = vadd.f32 %v3726_v9, %v3512_v34  ;;  %v3405_v57 = vmul.f32 %v3301_v36, %v7156_v33  ;;  %v3408_v21 = vmul.f32 %v7157_v1, %v3316_v56 }
 0x680   : > { %v3518_v0 = vadd.f32 %v3517_v28, %v3516_v8  ;;  %v3554_v11 = vadd.f32 %v3553_v40, %v3405_v57  ;;  %v3563_v13 = vadd.f32 %v3409_v39, %v3408_v21  ;;  %4595 = vtanh.f32 %v3758_v5 }
 0x681   : > { %v3240_v55 = vpop.permute.xlu0 %3239  ;;  %v3259_v45 = vpop.permute.xlu1 %3258 }
 0x682   : > { %v3519_v17 = vrot.slane %v3518_v0, 2  ;;  %v3392_v43 = vmul.f32 %v7158_v14, %v3240_v55  ;;  %v3396_v4 = vmul.f32 %v7159_v6, %v3259_v45 }
 0x684   : > { %v3520_v2 = vadd.f32 %v3519_v17, %v3518_v0  ;;  %v3526_v54 = vadd.f32 %v3525_v35, %v3392_v43  ;;  %v3535_v49 = vadd.f32 %v3534_v22, %v3396_v4  ;;  %v7162_v22 = vld [vmem:[#allocation73_spill] sm:$0xff] }
 0x685   : > { %v3324_v12 = vpop.permute.xlu0 %3323  ;;  %v3171_v27 = vpop.permute.xlu1 %3170  ;;  %v7165_v35 = vld [vmem:[#allocation53_spill] sm:$0xff] }
 0x686   : > { %v3521_v3 = vrot.slane %v3520_v2, 1  ;;  %v3527_v32 = vrot.slane %v3526_v54, 4  ;;  %v3410_v60 = vmul.f32 %v3324_v12, %v7160_v26  ;;  %v3377_v24 = vmul.f32 %v3171_v27, %v7161_v53 }
 0x688   : > { %v3522_v18 = vadd.f32 %v3521_v3, %v3520_v2  ;;  %v3528_v23 = vadd.f32 %v3527_v32, %v3526_v54  ;;  %v3564_v41 = vadd.f32 %v3563_v13, %v3410_v60  ;;  %v3496_v62 = vadd.f32 %v3495_v16, %v3377_v24  ;;  %v7164_v16 = vld [vmem:[#allocation75_spill] sm:$0xff]  ;;  %v7169_v3 = vld [vmem:[#allocation96_spill] sm:$0xff] }
 0x689   : > { %v3305_v31 = vpop.permute.xlu0 %3304  ;;  %v3282_v40 = vpop.permute.xlu1 %3281 }
 0x68a   : > { %v3759_v59 = vadd.f32 %v3727_v50, %v3522_v18  ;;  %v3529_v46 = vrot.slane %v3528_v23, 2  ;;  %v3497_v48 = vrot.slane %v3496_v62, 4  ;;  %v3406_v25 = vmul.f32 %v3305_v31, %v7162_v22  ;;  %v7168_v50 = vld [vmem:[#allocation79_spill] sm:$0xff]  ;;  %v4596_v22 = vpop.eup %4595 }
 0x68b   : > { %v3401_v37 = vmul.f32 %v3282_v40, %v7163_v47  ;;  %v3729_v18 = vrot.slane %v6588_v29, 4 }
 0x68c   : > { %v3530_v19 = vadd.f32 %v3529_v46, %v3528_v23  ;;  %v3498_v42 = vadd.f32 %v3497_v48, %v3496_v62  ;;  %v3555_v30 = vadd.f32 %v3554_v11, %v3406_v25  ;;  %v7166_v11 = vld [vmem:[#allocation67_spill] sm:$0xff]  ;;  %4597 = vtanh.f32 %v3759_v59 }
 0x68d   : > { %v3545_v63 = vadd.f32 %v3544_v15, %v3401_v37  ;;  %v3328_v51 = vpop.permute.xlu0 %3327  ;;  %v3263_v58 = vpop.permute.xlu1 %3262  ;;  %v7167_v15 = vld [vmem:[#allocation65_spill] sm:$0xff] }
 0x68e   : > { %v3531_v9 = vrot.slane %v3530_v19, 1  ;;  %v3499_v34 = vrot.slane %v3498_v42, 2  ;;  %v3411_v8 = vmul.f32 %v7164_v16, %v3328_v51  ;;  %v3397_v7 = vmul.f32 %v3263_v58, %v7165_v35 }
 0x68f   : > { %v3731_v51 = vrot.slane %v6588_v29, 6  ;;  %v3811_v35 = vrot.slane %v4596_v22, 7 }
 0x690   : > { %v3532_v39 = vadd.f32 %v3531_v9, %v3530_v19  ;;  %v3500_v36 = vadd.f32 %v3499_v34, %v3498_v42  ;;  %v3565_v56 = vadd.f32 %v3564_v41, %v3411_v8  ;;  %v3536_v28 = vadd.f32 %v3535_v49, %v3397_v7 }
 0x691   : > { %v3309_v33 = vpop.permute.xlu0 %3308  ;;  %v3286_v57 = vpop.permute.xlu1 %3285  ;;  %v3730_v34 = vrot.slane %v6588_v29, 5 }
 0x692   : > { %v3760_v1 = vadd.f32 %v3728_v38, %v3532_v39  ;;  %v3501_v21 = vrot.slane %v3500_v36, 1  ;;  %v3537_v0 = vrot.slane %v3536_v28, 4  ;;  %v3407_v13 = vmul.f32 %v7166_v11, %v3309_v33 }
 0x693   : > { %v3402_v55 = vmul.f32 %v3286_v57, %v7167_v15 }
 0x694   : > { %v3502_v45 = vadd.f32 %v3501_v21, %v3500_v36  ;;  %v3538_v17 = vadd.f32 %v3537_v0, %v3536_v28  ;;  %v3556_v14 = vadd.f32 %v3555_v30, %v3407_v13  ;;  %4599 = vtanh.f32 %v3760_v1 }
 0x695   : > { %v3546_v43 = vadd.f32 %v3545_v63, %v3402_v55  ;;  %v3332_v6 = vpop.permute.xlu0 %3331  ;;  %v3148_v4 = vpop.permute.xlu1 %3147  ;;  %v3732_v21 = vrot.slane %v6588_v29, 7  ;;  %v3725_v13 = vrot.slane %v6538_v52, 7 }
 0x696   : > { %v3757_v2 = vadd.f32 %v6588_v29, %v3502_v45  ;;  %v3539_v54 = vrot.slane %v3538_v17, 2  ;;  %v3557_v49 = vrot.slane %v3556_v14, 4  ;;  %v3412_v12 = vmul.f32 %v7168_v50, %v3332_v6  ;;  %v4598_v37 = vpop.eup %4597 }
 0x697   : > { %v3547_v27 = vrot.slane %v3546_v43, 4  ;;  %v3372_v32 = vmul.f32 %v7169_v3, %v3148_v4 }
 0x698   : > { %4601 = vtanh.f32 %v3757_v2  ;;  %v3540_v5 = vadd.f32 %v3539_v54, %v3538_v17  ;;  %v3558_v26 = vadd.f32 %v3557_v49, %v3556_v14  ;;  %v3566_v60 = vadd.f32 %v3565_v56, %v3412_v12 }
 0x699   : > { %v3548_v53 = vadd.f32 %v3547_v27, %v3546_v43  ;;  %v3486_v24 = vadd.f32 %v6637_v44, %v3372_v32  ;;  %v3813_v56 = vrot.slane %v4598_v37, 6 }
 0x69a   : > { %v3541_v23 = vrot.slane %v3540_v5, 1  ;;  %v3559_v41 = vrot.slane %v3558_v26, 2  ;;  %v3567_v62 = vrot.slane %v3566_v60, 4 }
 0x69b   : > { %v3549_v31 = vrot.slane %v3548_v53, 2  ;;  %v3487_v40 = vrot.slane %v3486_v24, 4 }
 0x69c   : > { %v3542_v59 = vadd.f32 %v3541_v23, %v3540_v5  ;;  %v3560_v46 = vadd.f32 %v3559_v41, %v3558_v26  ;;  %v3568_v48 = vadd.f32 %v3567_v62, %v3566_v60 }
 0x69d   : > { %v3550_v25 = vadd.f32 %v3549_v31, %v3548_v53  ;;  %v3488_v47 = vadd.f32 %v3487_v40, %v3486_v24 }
 0x69e   : > { %v3761_v19 = vadd.f32 %v3729_v18, %v3542_v59  ;;  %v3561_v42 = vrot.slane %v3560_v46, 1  ;;  %v3569_v30 = vrot.slane %v3568_v48, 2  ;;  %v4600_v38 = vpop.eup %4599 }
 0x69f   : > { %v3551_v63 = vrot.slane %v3550_v25, 1  ;;  %v3489_v44 = vrot.slane %v3488_v47, 2  ;;  %v3815_v28 = vrot.slane %v4600_v38, 5 }
 0x6a0   : > { %4603 = vtanh.f32 %v3761_v19  ;;  %v3562_v58 = vadd.f32 %v3561_v42, %v3560_v46  ;;  %v3570_v9 = vadd.f32 %v3569_v30, %v3568_v48 }
 0x6a1   : > { %v3552_v16 = vadd.f32 %v3551_v63, %v3550_v25  ;;  %v3490_v8 = vadd.f32 %v3489_v44, %v3488_v47 }
 0x6a2   : > { %v4602_v7 = vpop.eup %4601  ;;  %v3763_v39 = vadd.f32 %v3731_v51, %v3562_v58  ;;  %v3571_v36 = vrot.slane %v3570_v9, 1 }
 0x6a3   : > { %v3762_v33 = vadd.f32 %v3730_v34, %v3552_v16  ;;  %v3491_v57 = vrot.slane %v3490_v8, 1  ;;  %v3812_v1 = vsel %vm2913_vm7, %v3811_v35, %v4602_v7 }
 0x6a4   : > { %4605 = vtanh.f32 %v3763_v39  ;;  %v3572_v0 = vadd.f32 %v3571_v36, %v3570_v9  ;;  %v3814_v11 = vsel %vm2915_vm8, %v3813_v56, %v3812_v1 }
 0x6a5   : > { %4607 = vtanh.f32 %v3762_v33  ;;  %v3492_v15 = vadd.f32 %v3491_v57, %v3490_v8  ;;  %v3816_v55 = vsel %vm2917_vm9, %v3815_v28, %v3814_v11 }
 0x6a6   : > { %v3764_v45 = vadd.f32 %v3732_v21, %v3572_v0 }
 0x6a7   : > { %v3756_v17 = vadd.f32 %v3725_v13, %v3492_v15 }
 0x6a8   : > { %4609 = vtanh.f32 %v3764_v45 }
 0x6a9   : > { %4611 = vtanh.f32 %v3756_v17 }
 0x6aa   : > { %v4604_v14 = vpop.eup %4603 }
 0x6ab   : > { %v3817_v43 = vrot.slane %v4604_v14, 4 }
 0x6ad   : > { %v3818_v6 = vsel %vm2919_vm10, %v3817_v43, %v3816_v55 }
 0x6ae   : > { %v4606_v4 = vpop.eup %4605 }
 0x6af   : > { %v4608_v2 = vpop.eup %4607  ;;  %v3821_v29 = vrot.slane %v4606_v4, 2 }
 0x6b0   : > { %v3819_v54 = vrot.slane %v4608_v2, 3 }
 0x6b2   : > { %v4610_v49 = vpop.eup %4609  ;;  %v3820_v50 = vsel %vm2921_vm11, %v3819_v54, %v3818_v6 }
 0x6b3   : > { %v4612_v52 = vpop.eup %4611  ;;  %v3822_v12 = vsel %vm2923_vm14, %v3821_v29, %v3820_v50  ;;  %v3823_v27 = vrot.slane %v4610_v49, 1 }
 0x6b4   : > { %v3809_v3 = vrot.slane %v4612_v52, 1 }
 0x6b5   : > { %v3824_v32 = vsel %vm2925_vm12, %v3823_v27, %v3822_v12 }
 0x6b6   : > { %3827 = vrot.lane.b32.xlu0 %v3824_v32, %s4949_s10  ;;  %v3810_v5 = vsel %vm2925_vm12, %v3809_v3, %v6666_v61 }
 0x6b7   : > { %3825 = vrot.lane.b32.xlu1 %v3810_v5, %s4949_s10 }
 0x6ba   : > { %3835 = vrot.lane.b32.xlu0 %v6541_v10, %s4949_s10 }
 0x6bb   : > { %3833 = vrot.lane.b32.xlu1 %v6523_v20, %s4949_s10 }
 0x728   : > { %v3828_v26 = vpop.permute.xlu0 %3827 }
 0x729   : > { %v3826_v60 = vpop.permute.xlu1 %3825 }
 0x72c   : > { %v3836_v53 = vpop.permute.xlu0 %3835 }
 0x72d   : > { %v3841_v61 = vsel %vm3839_vm2, %v3828_v26, %v3836_v53  ;;  %v3834_v24 = vpop.permute.xlu1 %3833 }
 0x72e   : > { %v3844_v20 = vsel %vm3842_vm3, %v3841_v61, 0.0  ;;  %v3840_v10 = vsel %vm3839_vm2, %v3826_v60, %v3834_v24 }
 0x72f   : > { %3846 = vst [vmem:[%s523_s17 + $0x8] sm:$0xff] %v3844_v20  ;;  %v3843_v18 = vsel %vm3842_vm3, %v3840_v10, 0.0 }
 0x730   : > { %3845 = vst [vmem:[%s523_s17] sm:$0xff] %v3843_v18 }
 0x731   : > { %4860 = shalt.err (!%p4857_p10)
}
 0x732   : > { %s4861_s9 = scalar_lea.hbm %s6721_s29, 256  ;;  %s4865_s8 = scalar_lea.hbm %s7172_s22, 512 }
 0x733   : > { %p4862_p1 = scmp.ne.s32.totalorder %s6721_s29, %s4861_s9  ;;  %p4866_p12 = scmp.lt.u32.totalorder %s6721_s29, %s7172_s22 }
 0x734   : > { %p4867_p0 = scmp.lt.u32.totalorder %s4865_s8, %s4861_s9  ;;  %p4869_p6 = scmp.lt.u32.totalorder %s4861_s9, %s6721_s29 }
 0x735   : > { %p4863_p8 = pnand %p4862_p1, %p7173_p5 }
 0x736   : > { %p4868_p4 = por %p4867_p0, %p4866_p12 }
 0x737   : > { %p4864_p11 = pneg %p4863_p8 }
 0x738   : > { %p4870_p3 = por %p4869_p6, %p4868_p4 }
 0x73a   : > { %p4871_p7 = pnand %p4870_p3, %p4864_p11 }
 0x73c   : > { %4874 = shalt.err (!%p4871_p7)
}
 0x73d   : > { %s4951_s11 = smov 128   ;;  %s4952_s23 = smov 8  }
 0x73e   : > { %4396 = dma.vmem_to_hbm [thread:$0]  (%p7173_p5), %s6716_s16, 256, %s6721_s29, %s3848_s20, %s4951_s11, %s4951_s11, %s4952_s23  }
 0x73f PF: > { %s7174_s5 = sld [smem:[#allocation23_spill]]  ;;  %s7175_s10 = sld [smem:[#allocation31_spill]] }
 0x740   : > { %p7177_p2 = scmp.ge.s32.totalorder %s4929_s30, 2 }
 0x745   : > { %s3876_s17 = sand.u32 1, %s7174_s5   ;;  %p7176_p13 = scmp.ne.s32.totalorder %s7175_s10, 0 }
 0x746   : > { %s3877_s13 = scalar_lea.sflag [#allocation4], %s3876_s17 }
 0x747   : > { %p4425_p9 = pnand %p7177_p2, %p7176_p13 }
 0x749   : > { %4912 = dma.done.wait (!%p4425_p9), %s3877_s13, 256  }
 0x74a   : > { %4914 = vsyncadd (!%p4425_p9), %s3877_s13, 4294967040  ;;  %s7178_s30 = sld [smem:[#allocation27_spill]]  ;;  %s7179_s27 = sld [smem:[#allocation24_spill]] }
 0x74b   : > { %s7180_s28 = sld [smem:[#allocation25_spill]]  ;;  %s7181_s29 = sld [smem:[#allocation28_spill]] }
 0x750   : > { %p29_p10 = scmp.ge.s32.totalorder %s7178_s30, 4  }
 0x752   :  { %31 = sbr.rel (!%p29_p10) target bundleno = 16 (0x10), region = 157 }
 0x759   :  { %3882 = vsyncpa [#allocation3], 1 }
 0x75a   :  { %3884 = vsyncpa [#allocation3 + $0x1], 1 }
 0x75b   :  { %3885 = vsyncpa [#allocation6], 1 }
 0x75c   :  { %3887 = vsyncpa [#allocation6 + $0x1], 1 }
 0x75d   :  { %3888 = vsyncpa [#allocation9], 1 }
 0x75e   :  { %3890 = vsyncpa [#allocation9 + $0x1], 1 }
 0x75f   :  { %3891 = vsyncpa [#allocation12], 1 }
 0x760   :  { %3892 = vsyncpa [#allocation15], 1 }
 0x761   :  { %3893 = vsyncpa [#allocation4], 1 }
 0x762   :  { %3895 = vsyncpa [#allocation4 + $0x1], 1 }

</bundles_post_ra>
